<compile_context>
chip_gen: v7x
topology: tpu7x:2x2x1
jax: 0.10.0
libtpu: 0.0.40
codegen_flags: <defaults>
</compile_context>

<pallas_src>
import math

import numpy as np
import jax
import jax.numpy as jnp
from jax.experimental import pallas as pl
from jax.experimental.pallas import tpu as pltpu


_LANE = 128      # lane width: batch tile must be a multiple of this
_TB_MAX = 256    # max matrices per grid step (per-step DMA/compute block)


def _round_up(a, b):
    return (a + b - 1) // b * b


def _log_map_kernel(u_ref, s_ref, o_ref):
    """o[i,k,t] = sum_j log(s[j,t]) * u[j,i,t] * u[j,k,t]  (batch t in lanes).

    u_ref: (n, n, TB)  indexed [j, i, t]  -- component i of eigenvector j of matrix t
    s_ref: (n, TB)     indexed [j, t]     -- eigenvalue j of matrix t
    o_ref: (n, n, TB)  indexed [i, k, t]  -- matrix-log entries
    """
    n = s_ref.shape[0]
    tb = o_ref.shape[2]
    eps = jnp.finfo(s_ref.dtype).tiny
    # Clamp guards log() against tiny negative eigenvalues from numerical
    # noise (no kernel analogue of the PyTorch data-dependent NaN raise).
    ls = jnp.log(jnp.maximum(s_ref[...], eps))                    # (n, TB), EUP

    acc = None
    for j in range(n):                       # unrolled rank-1 updates over eigenpairs
        v = u_ref[j]                                               # (n, TB): v[i, t]
        w = v * ls[j:j + 1, :]                                     # u * log s (lane-wise)
        # term[i, k, t] = w[i, t] * v[k, t]
        w_b = jax.lax.broadcast_in_dim(w, (n, n, tb), (0, 2))      # bcast over k (sublanes)
        v_b = jax.lax.broadcast_in_dim(v, (n, n, tb), (1, 2))      # bcast over i (major)
        term = w_b * v_b
        acc = term if acc is None else acc + term
    o_ref[...] = acc.astype(o_ref.dtype)


def spd_log_map_pallas(u, s):
    """u: (N, n, n) eigenvectors (columns), s: (N, n) eigenvalues.

    Returns the matrix logs in batch-minor layout (n, n, N), indexed [i, k, t].
    """
    N, n, _ = u.shape
    n_pad = _round_up(max(N, 1), _LANE)
    tb = math.gcd(n_pad, _TB_MAX)            # multiple of 128, divides n_pad

    # Batch-minor layout: last dim = batch -> lane-dense blocks, dense DMAs.
    u_t = jnp.transpose(u, (2, 1, 0))        # (n, n, N): [j, i, t] = u[t, i, j]
    s_t = jnp.transpose(s, (1, 0))           # (n, N):    [j, t]
    if n_pad != N:
        u_t = jnp.pad(u_t, ((0, 0), (0, 0), (0, n_pad - N)))
        # Pad eigenvalues with 1.0 so log() of padded lanes is exactly 0.
        s_t = jnp.pad(s_t, ((0, 0), (0, n_pad - N)), constant_values=1.0)

    out_t = pl.pallas_call(
        _log_map_kernel,
        out_shape=jax.ShapeDtypeStruct((n, n, n_pad), u.dtype),
        grid_spec=pltpu.PrefetchScalarGridSpec(
            num_scalar_prefetch=0,
            grid=(n_pad // tb,),
            in_specs=[
                pl.BlockSpec((n, n, tb), lambda b: (0, 0, b)),
                pl.BlockSpec((n, tb), lambda b: (0, b)),
            ],
            out_specs=pl.BlockSpec((n, n, tb), lambda b: (0, 0, b)),
        ),
        compiler_params=pltpu.CompilerParams(
            dimension_semantics=("parallel",),
        ),
    )(u_t, s_t)
    return out_t[:, :, :N]                   # (n, n, N)


def spd_tangent_space(x, vectorize=True, vectorize_all=True):
    """Forward pass of SPDTangentSpace.  x: (B, C, n, n) SPD matrices."""
    n = x.shape[-1]
    lead = x.shape[:-2]
    xf = x.reshape((-1, n, n))
    # TODO(synk): torch.linalg.eigh (iterative eigendecomposition) has no clean
    # Pallas equivalent; it stays in plain XLA.
    s, u = jnp.linalg.eigh(xf)
    log_t = spd_log_map_pallas(u, s)                   # (n, n, N) [i, k, t]

    if not vectorize:
        return jnp.transpose(log_t, (2, 0, 1)).reshape(x.shape)

    row_idx, col_idx = np.triu_indices(n)              # static index glue
    # TODO(synk): emitting only the n*(n+1)/2 upper-triangle rows directly from
    # the kernel needs sublane-misaligned concatenation that Mosaic handles
    # poorly; the compaction stays as a static XLA gather.
    vec = log_t[row_idx, col_idx, :]                   # (n*(n+1)/2, N)
    out = jnp.transpose(vec, (1, 0)).reshape(lead + (row_idx.shape[0],))
    if vectorize_all:
        out = out.reshape(out.shape[0], -1)            # (B, C * n*(n+1)/2)
    return out


def _reference(x):
    """Pure-JAX reference mirroring the PyTorch module."""
    n = x.shape[-1]
    s, u = jnp.linalg.eigh(x)
    log_x = jnp.einsum("...ij,...j,...kj->...ik", u, jnp.log(s), u)
    row_idx, col_idx = np.triu_indices(n)
    out = log_x[..., row_idx, col_idx]
    return out.reshape(out.shape[0], -1)


def _make_spd(key, B, C, n):
    a = jax.random.normal(key, (B, C, n, n), dtype=jnp.float32)
    # Well-conditioned SPD inputs: A A^T / n + 0.1 I
    return jnp.einsum("bcij,bckj->bcik", a, a) / n + 0.1 * jnp.eye(n, dtype=jnp.float32)


if __name__ == "__main__":
    n = 16
    key = jax.random.PRNGKey(0)
    k1, k2 = jax.random.split(key)

    # Main small case matching the module's expected layout (N=8 -> one block).
    B, C = 2, 4
    x = _make_spd(k1, B, C, n)
    out = jax.block_until_ready(spd_tangent_space(x, vectorize=True, vectorize_all=True))
    ref = jax.block_until_ready(_reference(x))
    assert out.shape == (B, C * (n * (n + 1) // 2)), out.shape
    assert jnp.allclose(out, ref, atol=1e-4, rtol=1e-4), float(jnp.max(jnp.abs(out - ref)))

    # Larger batch: N = 288 -> padded to 384, TB = 128, 3 grid steps.  Exercises
    # the multi-block grid and the batch-remainder padding path.
    B2, C2 = 4, 72
    x2 = _make_spd(k2, B2, C2, n)
    out2 = jax.block_until_ready(spd_tangent_space(x2, vectorize=True, vectorize_all=True))
    ref2 = jax.block_until_ready(_reference(x2))
    assert out2.shape == (B2, C2 * (n * (n + 1) // 2)), out2.shape
    assert jnp.allclose(out2, ref2, atol=1e-4, rtol=1e-4), float(jnp.max(jnp.abs(out2 - ref2)))

    print("KERNEL_OK")
</pallas_src>

<mosaic_0001>
module attributes {stable_mosaic.version = 11 : i64} {
  func.func @_log_map_kernel(%arg0: i32, %arg1: memref<16x16x128xf32, #tpu.memory_space<vmem>>, %arg2: memref<16x128xf32, #tpu.memory_space<vmem>>, %arg3: memref<16x16x128xf32, #tpu.memory_space<vmem>>) attributes {dimension_semantics = [#tpu.dimension_semantics<parallel>], iteration_bounds = array<i64: 1>, scalar_prefetch = 0 : i64, scratch_operands = 0 : i64, tpu.core_type = #tpu.core_type<tc>, window_params = [{transform_indices = @transform_0, window_bounds = array<i64: 16, 16, 128>}, {transform_indices = @transform_1, window_bounds = array<i64: 16, 128>}, {transform_indices = @transform_2, window_bounds = array<i64: 16, 16, 128>}]} {
    %c0 = arith.constant 0 : index
    %c0_0 = arith.constant 0 : index
    %0 = vector.load %arg2[%c0, %c0_0] : memref<16x128xf32, #tpu.memory_space<vmem>>, vector<16x128xf32>
    %cst = arith.constant 1.17549435E-38 : f32
    %1 = vector.broadcast %cst : f32 to vector<16x128xf32>
    %2 = arith.maximumf %0, %1 : vector<16x128xf32>
    %3 = math.log %2 : vector<16x128xf32>
    %c0_1 = arith.constant 0 : index
    %c0_2 = arith.constant 0 : index
    %c0_3 = arith.constant 0 : index
    %4 = vector.load %arg1[%c0_1, %c0_2, %c0_3] : memref<16x16x128xf32, #tpu.memory_space<vmem>>, vector<1x16x128xf32>
    %5 = vector.shape_cast %4 : vector<1x16x128xf32> to vector<16x128xf32>
    %6 = vector.extract_strided_slice %3 {offsets = [0, 0], sizes = [1, 128], strides = [1, 1]} : vector<16x128xf32> to vector<1x128xf32>
    %7 = vector.broadcast %6 : vector<1x128xf32> to vector<16x128xf32>
    %8 = arith.mulf %5, %7 : vector<16x128xf32>
    %9 = vector.shape_cast %8 : vector<16x128xf32> to vector<16x1x128xf32>
    %10 = vector.broadcast %9 : vector<16x1x128xf32> to vector<16x16x128xf32>
    %11 = vector.shape_cast %5 : vector<16x128xf32> to vector<1x16x128xf32>
    %12 = vector.broadcast %11 : vector<1x16x128xf32> to vector<16x16x128xf32>
    %13 = arith.mulf %10, %12 : vector<16x16x128xf32>
    %c1 = arith.constant 1 : index
    %c0_4 = arith.constant 0 : index
    %c0_5 = arith.constant 0 : index
    %14 = vector.load %arg1[%c1, %c0_4, %c0_5] : memref<16x16x128xf32, #tpu.memory_space<vmem>>, vector<1x16x128xf32>
    %15 = vector.shape_cast %14 : vector<1x16x128xf32> to vector<16x128xf32>
    %16 = vector.extract_strided_slice %3 {offsets = [1, 0], sizes = [1, 128], strides = [1, 1]} : vector<16x128xf32> to vector<1x128xf32>
    %17 = vector.broadcast %16 : vector<1x128xf32> to vector<16x128xf32>
    %18 = arith.mulf %15, %17 : vector<16x128xf32>
    %19 = vector.shape_cast %18 : vector<16x128xf32> to vector<16x1x128xf32>
    %20 = vector.broadcast %19 : vector<16x1x128xf32> to vector<16x16x128xf32>
    %21 = vector.shape_cast %15 : vector<16x128xf32> to vector<1x16x128xf32>
    %22 = vector.broadcast %21 : vector<1x16x128xf32> to vector<16x16x128xf32>
    %23 = arith.mulf %20, %22 : vector<16x16x128xf32>
    %24 = arith.addf %13, %23 : vector<16x16x128xf32>
    %c2 = arith.constant 2 : index
    %c0_6 = arith.constant 0 : index
    %c0_7 = arith.constant 0 : index
    %25 = vector.load %arg1[%c2, %c0_6, %c0_7] : memref<16x16x128xf32, #tpu.memory_space<vmem>>, vector<1x16x128xf32>
    %26 = vector.shape_cast %25 : vector<1x16x128xf32> to vector<16x128xf32>
    %27 = vector.extract_strided_slice %3 {offsets = [2, 0], sizes = [1, 128], strides = [1, 1]} : vector<16x128xf32> to vector<1x128xf32>
    %28 = vector.broadcast %27 : vector<1x128xf32> to vector<16x128xf32>
    %29 = arith.mulf %26, %28 : vector<16x128xf32>
    %30 = vector.shape_cast %29 : vector<16x128xf32> to vector<16x1x128xf32>
    %31 = vector.broadcast %30 : vector<16x1x128xf32> to vector<16x16x128xf32>
    %32 = vector.shape_cast %26 : vector<16x128xf32> to vector<1x16x128xf32>
    %33 = vector.broadcast %32 : vector<1x16x128xf32> to vector<16x16x128xf32>
    %34 = arith.mulf %31, %33 : vector<16x16x128xf32>
    %35 = arith.addf %24, %34 : vector<16x16x128xf32>
    %c3 = arith.constant 3 : index
    %c0_8 = arith.constant 0 : index
    %c0_9 = arith.constant 0 : index
    %36 = vector.load %arg1[%c3, %c0_8, %c0_9] : memref<16x16x128xf32, #tpu.memory_space<vmem>>, vector<1x16x128xf32>
    %37 = vector.shape_cast %36 : vector<1x16x128xf32> to vector<16x128xf32>
    %38 = vector.extract_strided_slice %3 {offsets = [3, 0], sizes = [1, 128], strides = [1, 1]} : vector<16x128xf32> to vector<1x128xf32>
    %39 = vector.broadcast %38 : vector<1x128xf32> to vector<16x128xf32>
    %40 = arith.mulf %37, %39 : vector<16x128xf32>
    %41 = vector.shape_cast %40 : vector<16x128xf32> to vector<16x1x128xf32>
    %42 = vector.broadcast %41 : vector<16x1x128xf32> to vector<16x16x128xf32>
    %43 = vector.shape_cast %37 : vector<16x128xf32> to vector<1x16x128xf32>
    %44 = vector.broadcast %43 : vector<1x16x128xf32> to vector<16x16x128xf32>
    %45 = arith.mulf %42, %44 : vector<16x16x128xf32>
    %46 = arith.addf %35, %45 : vector<16x16x128xf32>
    %c4 = arith.constant 4 : index
    %c0_10 = arith.constant 0 : index
    %c0_11 = arith.constant 0 : index
    %47 = vector.load %arg1[%c4, %c0_10, %c0_11] : memref<16x16x128xf32, #tpu.memory_space<vmem>>, vector<1x16x128xf32>
    %48 = vector.shape_cast %47 : vector<1x16x128xf32> to vector<16x128xf32>
    %49 = vector.extract_strided_slice %3 {offsets = [4, 0], sizes = [1, 128], strides = [1, 1]} : vector<16x128xf32> to vector<1x128xf32>
    %50 = vector.broadcast %49 : vector<1x128xf32> to vector<16x128xf32>
    %51 = arith.mulf %48, %50 : vector<16x128xf32>
    %52 = vector.shape_cast %51 : vector<16x128xf32> to vector<16x1x128xf32>
    %53 = vector.broadcast %52 : vector<16x1x128xf32> to vector<16x16x128xf32>
    %54 = vector.shape_cast %48 : vector<16x128xf32> to vector<1x16x128xf32>
    %55 = vector.broadcast %54 : vector<1x16x128xf32> to vector<16x16x128xf32>
    %56 = arith.mulf %53, %55 : vector<16x16x128xf32>
    %57 = arith.addf %46, %56 : vector<16x16x128xf32>
    %c5 = arith.constant 5 : index
    %c0_12 = arith.constant 0 : index
    %c0_13 = arith.constant 0 : index
    %58 = vector.load %arg1[%c5, %c0_12, %c0_13] : memref<16x16x128xf32, #tpu.memory_space<vmem>>, vector<1x16x128xf32>
    %59 = vector.shape_cast %58 : vector<1x16x128xf32> to vector<16x128xf32>
    %60 = vector.extract_strided_slice %3 {offsets = [5, 0], sizes = [1, 128], strides = [1, 1]} : vector<16x128xf32> to vector<1x128xf32>
    %61 = vector.broadcast %60 : vector<1x128xf32> to vector<16x128xf32>
    %62 = arith.mulf %59, %61 : vector<16x128xf32>
    %63 = vector.shape_cast %62 : vector<16x128xf32> to vector<16x1x128xf32>
    %64 = vector.broadcast %63 : vector<16x1x128xf32> to vector<16x16x128xf32>
    %65 = vector.shape_cast %59 : vector<16x128xf32> to vector<1x16x128xf32>
    %66 = vector.broadcast %65 : vector<1x16x128xf32> to vector<16x16x128xf32>
    %67 = arith.mulf %64, %66 : vector<16x16x128xf32>
    %68 = arith.addf %57, %67 : vector<16x16x128xf32>
    %c6 = arith.constant 6 : index
    %c0_14 = arith.constant 0 : index
    %c0_15 = arith.constant 0 : index
    %69 = vector.load %arg1[%c6, %c0_14, %c0_15] : memref<16x16x128xf32, #tpu.memory_space<vmem>>, vector<1x16x128xf32>
    %70 = vector.shape_cast %69 : vector<1x16x128xf32> to vector<16x128xf32>
    %71 = vector.extract_strided_slice %3 {offsets = [6, 0], sizes = [1, 128], strides = [1, 1]} : vector<16x128xf32> to vector<1x128xf32>
    %72 = vector.broadcast %71 : vector<1x128xf32> to vector<16x128xf32>
    %73 = arith.mulf %70, %72 : vector<16x128xf32>
    %74 = vector.shape_cast %73 : vector<16x128xf32> to vector<16x1x128xf32>
    %75 = vector.broadcast %74 : vector<16x1x128xf32> to vector<16x16x128xf32>
    %76 = vector.shape_cast %70 : vector<16x128xf32> to vector<1x16x128xf32>
    %77 = vector.broadcast %76 : vector<1x16x128xf32> to vector<16x16x128xf32>
    %78 = arith.mulf %75, %77 : vector<16x16x128xf32>
    %79 = arith.addf %68, %78 : vector<16x16x128xf32>
    %c7 = arith.constant 7 : index
    %c0_16 = arith.constant 0 : index
    %c0_17 = arith.constant 0 : index
    %80 = vector.load %arg1[%c7, %c0_16, %c0_17] : memref<16x16x128xf32, #tpu.memory_space<vmem>>, vector<1x16x128xf32>
    %81 = vector.shape_cast %80 : vector<1x16x128xf32> to vector<16x128xf32>
    %82 = vector.extract_strided_slice %3 {offsets = [7, 0], sizes = [1, 128], strides = [1, 1]} : vector<16x128xf32> to vector<1x128xf32>
    %83 = vector.broadcast %82 : vector<1x128xf32> to vector<16x128xf32>
    %84 = arith.mulf %81, %83 : vector<16x128xf32>
    %85 = vector.shape_cast %84 : vector<16x128xf32> to vector<16x1x128xf32>
    %86 = vector.broadcast %85 : vector<16x1x128xf32> to vector<16x16x128xf32>
    %87 = vector.shape_cast %81 : vector<16x128xf32> to vector<1x16x128xf32>
    %88 = vector.broadcast %87 : vector<1x16x128xf32> to vector<16x16x128xf32>
    %89 = arith.mulf %86, %88 : vector<16x16x128xf32>
    %90 = arith.addf %79, %89 : vector<16x16x128xf32>
    %c8 = arith.constant 8 : index
    %c0_18 = arith.constant 0 : index
    %c0_19 = arith.constant 0 : index
    %91 = vector.load %arg1[%c8, %c0_18, %c0_19] : memref<16x16x128xf32, #tpu.memory_space<vmem>>, vector<1x16x128xf32>
    %92 = vector.shape_cast %91 : vector<1x16x128xf32> to vector<16x128xf32>
    %93 = vector.extract_strided_slice %3 {offsets = [8, 0], sizes = [1, 128], strides = [1, 1]} : vector<16x128xf32> to vector<1x128xf32>
    %94 = vector.broadcast %93 : vector<1x128xf32> to vector<16x128xf32>
    %95 = arith.mulf %92, %94 : vector<16x128xf32>
    %96 = vector.shape_cast %95 : vector<16x128xf32> to vector<16x1x128xf32>
    %97 = vector.broadcast %96 : vector<16x1x128xf32> to vector<16x16x128xf32>
    %98 = vector.shape_cast %92 : vector<16x128xf32> to vector<1x16x128xf32>
    %99 = vector.broadcast %98 : vector<1x16x128xf32> to vector<16x16x128xf32>
    %100 = arith.mulf %97, %99 : vector<16x16x128xf32>
    %101 = arith.addf %90, %100 : vector<16x16x128xf32>
    %c9 = arith.constant 9 : index
    %c0_20 = arith.constant 0 : index
    %c0_21 = arith.constant 0 : index
    %102 = vector.load %arg1[%c9, %c0_20, %c0_21] : memref<16x16x128xf32, #tpu.memory_space<vmem>>, vector<1x16x128xf32>
    %103 = vector.shape_cast %102 : vector<1x16x128xf32> to vector<16x128xf32>
    %104 = vector.extract_strided_slice %3 {offsets = [9, 0], sizes = [1, 128], strides = [1, 1]} : vector<16x128xf32> to vector<1x128xf32>
    %105 = vector.broadcast %104 : vector<1x128xf32> to vector<16x128xf32>
    %106 = arith.mulf %103, %105 : vector<16x128xf32>
    %107 = vector.shape_cast %106 : vector<16x128xf32> to vector<16x1x128xf32>
    %108 = vector.broadcast %107 : vector<16x1x128xf32> to vector<16x16x128xf32>
    %109 = vector.shape_cast %103 : vector<16x128xf32> to vector<1x16x128xf32>
    %110 = vector.broadcast %109 : vector<1x16x128xf32> to vector<16x16x128xf32>
    %111 = arith.mulf %108, %110 : vector<16x16x128xf32>
    %112 = arith.addf %101, %111 : vector<16x16x128xf32>
    %c10 = arith.constant 10 : index
    %c0_22 = arith.constant 0 : index
    %c0_23 = arith.constant 0 : index
    %113 = vector.load %arg1[%c10, %c0_22, %c0_23] : memref<16x16x128xf32, #tpu.memory_space<vmem>>, vector<1x16x128xf32>
    %114 = vector.shape_cast %113 : vector<1x16x128xf32> to vector<16x128xf32>
    %115 = vector.extract_strided_slice %3 {offsets = [10, 0], sizes = [1, 128], strides = [1, 1]} : vector<16x128xf32> to vector<1x128xf32>
    %116 = vector.broadcast %115 : vector<1x128xf32> to vector<16x128xf32>
    %117 = arith.mulf %114, %116 : vector<16x128xf32>
    %118 = vector.shape_cast %117 : vector<16x128xf32> to vector<16x1x128xf32>
    %119 = vector.broadcast %118 : vector<16x1x128xf32> to vector<16x16x128xf32>
    %120 = vector.shape_cast %114 : vector<16x128xf32> to vector<1x16x128xf32>
    %121 = vector.broadcast %120 : vector<1x16x128xf32> to vector<16x16x128xf32>
    %122 = arith.mulf %119, %121 : vector<16x16x128xf32>
    %123 = arith.addf %112, %122 : vector<16x16x128xf32>
    %c11 = arith.constant 11 : index
    %c0_24 = arith.constant 0 : index
    %c0_25 = arith.constant 0 : index
    %124 = vector.load %arg1[%c11, %c0_24, %c0_25] : memref<16x16x128xf32, #tpu.memory_space<vmem>>, vector<1x16x128xf32>
    %125 = vector.shape_cast %124 : vector<1x16x128xf32> to vector<16x128xf32>
    %126 = vector.extract_strided_slice %3 {offsets = [11, 0], sizes = [1, 128], strides = [1, 1]} : vector<16x128xf32> to vector<1x128xf32>
    %127 = vector.broadcast %126 : vector<1x128xf32> to vector<16x128xf32>
    %128 = arith.mulf %125, %127 : vector<16x128xf32>
    %129 = vector.shape_cast %128 : vector<16x128xf32> to vector<16x1x128xf32>
    %130 = vector.broadcast %129 : vector<16x1x128xf32> to vector<16x16x128xf32>
    %131 = vector.shape_cast %125 : vector<16x128xf32> to vector<1x16x128xf32>
    %132 = vector.broadcast %131 : vector<1x16x128xf32> to vector<16x16x128xf32>
    %133 = arith.mulf %130, %132 : vector<16x16x128xf32>
    %134 = arith.addf %123, %133 : vector<16x16x128xf32>
    %c12 = arith.constant 12 : index
    %c0_26 = arith.constant 0 : index
    %c0_27 = arith.constant 0 : index
    %135 = vector.load %arg1[%c12, %c0_26, %c0_27] : memref<16x16x128xf32, #tpu.memory_space<vmem>>, vector<1x16x128xf32>
    %136 = vector.shape_cast %135 : vector<1x16x128xf32> to vector<16x128xf32>
    %137 = vector.extract_strided_slice %3 {offsets = [12, 0], sizes = [1, 128], strides = [1, 1]} : vector<16x128xf32> to vector<1x128xf32>
    %138 = vector.broadcast %137 : vector<1x128xf32> to vector<16x128xf32>
    %139 = arith.mulf %136, %138 : vector<16x128xf32>
    %140 = vector.shape_cast %139 : vector<16x128xf32> to vector<16x1x128xf32>
    %141 = vector.broadcast %140 : vector<16x1x128xf32> to vector<16x16x128xf32>
    %142 = vector.shape_cast %136 : vector<16x128xf32> to vector<1x16x128xf32>
    %143 = vector.broadcast %142 : vector<1x16x128xf32> to vector<16x16x128xf32>
    %144 = arith.mulf %141, %143 : vector<16x16x128xf32>
    %145 = arith.addf %134, %144 : vector<16x16x128xf32>
    %c13 = arith.constant 13 : index
    %c0_28 = arith.constant 0 : index
    %c0_29 = arith.constant 0 : index
    %146 = vector.load %arg1[%c13, %c0_28, %c0_29] : memref<16x16x128xf32, #tpu.memory_space<vmem>>, vector<1x16x128xf32>
    %147 = vector.shape_cast %146 : vector<1x16x128xf32> to vector<16x128xf32>
    %148 = vector.extract_strided_slice %3 {offsets = [13, 0], sizes = [1, 128], strides = [1, 1]} : vector<16x128xf32> to vector<1x128xf32>
    %149 = vector.broadcast %148 : vector<1x128xf32> to vector<16x128xf32>
    %150 = arith.mulf %147, %149 : vector<16x128xf32>
    %151 = vector.shape_cast %150 : vector<16x128xf32> to vector<16x1x128xf32>
    %152 = vector.broadcast %151 : vector<16x1x128xf32> to vector<16x16x128xf32>
    %153 = vector.shape_cast %147 : vector<16x128xf32> to vector<1x16x128xf32>
    %154 = vector.broadcast %153 : vector<1x16x128xf32> to vector<16x16x128xf32>
    %155 = arith.mulf %152, %154 : vector<16x16x128xf32>
    %156 = arith.addf %145, %155 : vector<16x16x128xf32>
    %c14 = arith.constant 14 : index
    %c0_30 = arith.constant 0 : index
    %c0_31 = arith.constant 0 : index
    %157 = vector.load %arg1[%c14, %c0_30, %c0_31] : memref<16x16x128xf32, #tpu.memory_space<vmem>>, vector<1x16x128xf32>
    %158 = vector.shape_cast %157 : vector<1x16x128xf32> to vector<16x128xf32>
    %159 = vector.extract_strided_slice %3 {offsets = [14, 0], sizes = [1, 128], strides = [1, 1]} : vector<16x128xf32> to vector<1x128xf32>
    %160 = vector.broadcast %159 : vector<1x128xf32> to vector<16x128xf32>
    %161 = arith.mulf %158, %160 : vector<16x128xf32>
    %162 = vector.shape_cast %161 : vector<16x128xf32> to vector<16x1x128xf32>
    %163 = vector.broadcast %162 : vector<16x1x128xf32> to vector<16x16x128xf32>
    %164 = vector.shape_cast %158 : vector<16x128xf32> to vector<1x16x128xf32>
    %165 = vector.broadcast %164 : vector<1x16x128xf32> to vector<16x16x128xf32>
    %166 = arith.mulf %163, %165 : vector<16x16x128xf32>
    %167 = arith.addf %156, %166 : vector<16x16x128xf32>
    %c15 = arith.constant 15 : index
    %c0_32 = arith.constant 0 : index
    %c0_33 = arith.constant 0 : index
    %168 = vector.load %arg1[%c15, %c0_32, %c0_33] : memref<16x16x128xf32, #tpu.memory_space<vmem>>, vector<1x16x128xf32>
    %169 = vector.shape_cast %168 : vector<1x16x128xf32> to vector<16x128xf32>
    %170 = vector.extract_strided_slice %3 {offsets = [15, 0], sizes = [1, 128], strides = [1, 1]} : vector<16x128xf32> to vector<1x128xf32>
    %171 = vector.broadcast %170 : vector<1x128xf32> to vector<16x128xf32>
    %172 = arith.mulf %169, %171 : vector<16x128xf32>
    %173 = vector.shape_cast %172 : vector<16x128xf32> to vector<16x1x128xf32>
    %174 = vector.broadcast %173 : vector<16x1x128xf32> to vector<16x16x128xf32>
    %175 = vector.shape_cast %169 : vector<16x128xf32> to vector<1x16x128xf32>
    %176 = vector.broadcast %175 : vector<1x16x128xf32> to vector<16x16x128xf32>
    %177 = arith.mulf %174, %176 : vector<16x16x128xf32>
    %178 = arith.addf %167, %177 : vector<16x16x128xf32>
    %c0_34 = arith.constant 0 : index
    %c0_35 = arith.constant 0 : index
    %c0_36 = arith.constant 0 : index
    %179 = vector.load %arg3[%c0_34, %c0_35, %c0_36] : memref<16x16x128xf32, #tpu.memory_space<vmem>>, vector<16x16x128xf32>
    tpu.vector_store %arg3[%c0_34, %c0_35, %c0_36], %178 {strides = array<i32>} : memref<16x16x128xf32, #tpu.memory_space<vmem>>, vector<16x16x128xf32>,
    return
  }
  func.func @transform_0(%arg0: i32) -> (i32, i32, i32) {
    %c0_i32 = arith.constant 0 : i32
    %c0_i32_0 = arith.constant 0 : i32
    %c0_i32_1 = arith.constant 0 : i32
    return %c0_i32, %c0_i32_0, %arg0 : i32, i32, i32
  }
  func.func @transform_1(%arg0: i32) -> (i32, i32) {
    %c0_i32 = arith.constant 0 : i32
    %c0_i32_0 = arith.constant 0 : i32
    return %c0_i32, %arg0 : i32, i32
  }
  func.func @transform_2(%arg0: i32) -> (i32, i32, i32) {
    %c0_i32 = arith.constant 0 : i32
    %c0_i32_0 = arith.constant 0 : i32
    %c0_i32_1 = arith.constant 0 : i32
    return %c0_i32, %c0_i32_0, %arg0 : i32, i32, i32
  }
}

</mosaic_0001>

<bundles_post_ra>
// kernel: tpu_custom_call.1
= control target key start
LH: loop header
LB: loop body
LE: loop exit
PB: predicated region body
PF: predicated region fallthrough
CT: control target
= control target key end

     0   :  { %7 = vsyncpa [#allocation3], 0  ;;  %s7262_s0 = inlined_call_operand.hbm [shape: f32[16,16,128], index: 0, kind: input, shape index: {}]   ;;  %s7263_s1 = inlined_call_operand.hbm [shape: f32[16,128], index: 1, kind: input, shape index: {}]   ;;  %s7264_s2 = inlined_call_operand.hbm [shape: f32[16,16,128], index: 2, kind: output, shape index: {}]  }
   0x1   :  { %8 = vsyncpa [#allocation6], 0 }
   0x2   :  { %9 = vsyncpa [#allocation4], 0  ;;  %s4271_s9 = smov [#allocation2]   ;;  %s4199_s13 = scalar_lea.hbm %s7262_s0, 4096 }
   0x3   :  { %s15_s10 = sshll.u32 %s4271_s9, 4  ;;  %p4200_p0 = scmp.ne.s32.totalorder %s7262_s0, %s4199_s13  ;;  %s16_s10 = int_to_ptr.vmem [resolvable:$true] %s15_s10 }
   0x4   :  { %p4203_p1 = scmp.lt.u32.totalorder %s4199_s13, %s7262_s0 }
   0x6   :  { %p4205_p2 = pnand %p4203_p1, %p4200_p0 }
   0x8   :  { %4208 = shalt.err (!%p4205_p2)
}
   0x9   :  { %s4209_s18 = scalar_lea.vmem %s16_s10, 4096  ;;  %p4214_p4 = scmp.lt.s32.totalorder %s16_s10, %s16_s10 }
   0xa   :  { %p4210_p3 = scmp.ne.s32.totalorder %s16_s10, %s4209_s18  ;;  %p4215_p5 = scmp.lt.s32.totalorder %s4209_s18, %s4209_s18 }
   0xc   :  { %p4216_p6 = por %p4215_p5, %p4214_p4 }
   0xe   :  { %p4217_p7 = pnand %p4216_p6, %p4210_p3 }
  0x10   :  { %4220 = shalt.err (!%p4217_p7)
}
  0x11   :  { %s4272_s19 = smov 128   ;;  %s4273_s20 = smov 8  }
  0x12   :  { %21 = dma.hbm_to_vmem [thread:$0]  %s7262_s0, 4096, %s16_s10, [#allocation3], %s4272_s19, %s4272_s19, %s4273_s20  }
  0x13   :  { %s4274_s23 = smov [#allocation5]   ;;  %s4221_s27 = scalar_lea.hbm %s7263_s1, 256 }
  0x14   :  { %s27_s24 = sshll.u32 %s4274_s23, 4  ;;  %p4222_p8 = scmp.ne.s32.totalorder %s7263_s1, %s4221_s27  ;;  %s28_s24 = int_to_ptr.vmem [resolvable:$true] %s27_s24 }
  0x15   :  { %p4225_p9 = scmp.lt.u32.totalorder %s4221_s27, %s7263_s1 }
  0x17   :  { %p4227_p10 = pnand %p4225_p9, %p4222_p8 }
  0x19   :  { %4230 = shalt.err (!%p4227_p10)
}
  0x1a   :  { %s4231_s4 = scalar_lea.vmem %s28_s24, 256  ;;  %p4236_p12 = scmp.lt.s32.totalorder %s28_s24, %s28_s24 }
  0x1b   :  { %p4232_p11 = scmp.ne.s32.totalorder %s28_s24, %s4231_s4  ;;  %p4237_p13 = scmp.lt.s32.totalorder %s4231_s4, %s4231_s4 }
  0x1d   :  { %p4238_p0 = por %p4237_p13, %p4236_p12 }
  0x1f   :  { %p4239_p1 = pnand %p4238_p0, %p4232_p11 }
  0x21   :  { %4242 = shalt.err (!%p4239_p1)
}
  0x22   :  { %33 = dma.hbm_to_vmem [thread:$0]  %s7263_s1, 256, %s28_s24, [#allocation6], %s4272_s19, %s4272_s19, %s4273_s20  }
  0x23   :  { %4265 = dma.done.wait [#allocation3], 4096  }
  0x24   :  { %4266 = vsyncadd [#allocation3], 4294963200 }
  0x25   :  { %4267 = dma.done.wait [#allocation6], 256  }
  0x26   :  { %4268 = vsyncadd [#allocation6], 4294967040  ;;  %v40_v0 = vld [vmem:[#allocation5] sm:$0xff]  ;;  %v41_v1 = vld [vmem:[#allocation5 + $0x8] sm:$0xff]  ;;  %v50_v4 = vlaneseq  ;;  %v4275_v6 = vmov 1966171168  }
  0x27   :  { %v42_v2 = vmax.f32 %v40_v0, 1.1754944e-38  ;;  %v43_v3 = vmax.f32 %v41_v1, 1.1754944e-38  ;;  %v60_v7 = vunpack.c.l.s4 %v4275_v6  ;;  %v4331_v17 = vld [vmem:[#allocation2] sm:$0xff]  ;;  %v4333_v18 = vld [vmem:[#allocation2 + $0x10] sm:$0xff]  ;;  %v4335_v19 = vld [vmem:[#allocation2 + $0x18] sm:$0xff]  ;;  %s4276_s1 = smov [#allocation7]  }
  0x28   :  { %v4322_v5 = vshrl.u32 %v50_v4, 7  ;;  %7557 = vst [vmem:[#allocation11_spill] sm:$0xff] %v4335_v19  ;;  %v4337_v20 = vld [vmem:[#allocation2 + $0x20] sm:$0xff]  ;;  %v4350_v27 = vld [vmem:[#allocation2 + $0x28] sm:$0xff]  ;;  %v4367_v36 = vld [vmem:[#allocation2 + $0x30] sm:$0xff]  ;;  %s4100_s6 = sshll.u32 %s4276_s1, 4  ;;  %s4101_s6 = int_to_ptr.vmem [resolvable:$true] %s4100_s6 }
  0x29   :  { %4119 = vlog2.f32 %v42_v2  ;;  %v61_v9 = vunpack.c.0.s8 %v60_v7  ;;  %7558 = vst [vmem:[#allocation12_spill] sm:$0xff] %v4337_v20  ;;  %7561 = vst [vmem:[#allocation15_spill] sm:$0xff] %v4350_v27  ;;  %v4369_v37 = vld [vmem:[#allocation2 + $0x38] sm:$0xff]  ;;  %v4372_v39 = vld [vmem:[#allocation2 + $0x40] sm:$0xff]  ;;  %s4243_s7 = scalar_lea.vmem %s4101_s6, 4096  ;;  %p4248_p3 = scmp.lt.s32.totalorder %s4101_s6, %s4101_s6 }
  0x2a   :  { %4121 = vlog2.f32 %v43_v3  ;;  %v4325_v8 = vsub.s32 0, %v4322_v5  ;;  %v7271_v10 = vsub.s32 1, %v4322_v5  ;;  %v7270_v11 = vsub.s32 2, %v4322_v5  ;;  %7563 = vst [vmem:[#allocation17_spill] sm:$0xff] %v4367_v36  ;;  %7564 = vst [vmem:[#allocation18_spill] sm:$0xff] %v4369_v37  ;;  %v4439_v3 = vld [vmem:[#allocation2 + $0x48] sm:$0xff]  ;;  %p4244_p2 = scmp.ne.s32.totalorder %s4101_s6, %s4243_s7  ;;  %p4249_p4 = scmp.lt.s32.totalorder %s4243_s7, %s4243_s7 }
  0x2b   :  { %v7269_v13 = vsub.s32 3, %v4322_v5  ;;  %v7268_v14 = vsub.s32 4, %v4322_v5  ;;  %v7267_v21 = vsub.s32 5, %v4322_v5  ;;  %v7266_v22 = vsub.s32 6, %v4322_v5  ;;  %7565 = vst [vmem:[#allocation19_spill] sm:$0xff] %v4372_v39 }
  0x2c   :  { %v7265_v23 = vsub.s32 7, %v4322_v5  ;;  %v4346_v25 = vsub.s32 %v61_v9, %v4322_v5  ;;  %p4250_p5 = por %p4249_p4, %p4248_p3 }
  0x2e   :  { %7560 = vst [vmem:[#allocation14_spill] sm:$0xff] %v4346_v25  ;;  %p4251_p6 = pnand %p4250_p5, %p4244_p2 }
  0x33   :  { %v4120_v12 = vpop.eup %4119 }
  0x34   :  { %v4122_v15 = vpop.eup %4121  ;;  %v45_v16 = vmul.f32 0.6931472, %v4120_v12 }
  0x35   :  { %v4354_v29 = vmul.f32 0.6931472, %v4122_v15 }
  0x36   :  { %v4343_v24 = vrot.slane %v45_v16, %v4325_v8  ;;  %v274_v26 = vrot.slane %v45_v16, %v7271_v10  ;;  %v527_v28 = vrot.slane %v45_v16, %v7270_v11  ;;  %v780_v30 = vrot.slane %v45_v16, %v7269_v13  ;;  %v4530_v13 = vld [vmem:[#allocation2 + $0x70] sm:$0xff]  ;;  %v4542_v11 = vld [vmem:[#allocation2 + $0x78] sm:$0xff] }
  0x37   :  { %v1033_v31 = vrot.slane %v45_v16, %v7268_v14  ;;  %v1286_v40 = vrot.slane %v45_v16, %v7267_v21  ;;  %v4378_v41 = vrot.slane %v45_v16, %v7266_v22  ;;  %v4382_v42 = vrot.slane %v45_v16, %v7265_v23  ;;  %7587 = vst [vmem:[#allocation41_spill] sm:$0xff] %v4530_v13 }
  0x38   :  { %7559 = vst [vmem:[#allocation13_spill] sm:$0xff] %v4343_v24  ;;  %v4362_v32 = vmul.f32 %v4343_v24, %v4331_v17  ;;  %v275_v33 = vmul.f32 %v274_v26, %v4333_v18  ;;  %v276_v34 = vmul.f32 %v274_v26, %v4335_v19  ;;  %v528_v35 = vmul.f32 %v527_v28, %v4337_v20 }
  0x39   :  { %v529_v38 = vmul.f32 %v527_v28, %v4350_v27  ;;  %v781_v49 = vmul.f32 %v780_v30, %v4367_v36  ;;  %v782_v50 = vmul.f32 %v780_v30, %v4369_v37  ;;  %v1034_v54 = vmul.f32 %v1033_v31, %v4372_v39  ;;  %v4461_v28 = vld [vmem:[#allocation2 + $0x50] sm:$0xff] }
  0x3a   :  { %7562 = vst [vmem:[#allocation16_spill] sm:$0xff] %v4362_v32  ;;  %v4386_v43 = vrot.slane %v4362_v32, %v4346_v25  ;;  %v279_v44 = vcombine.high %v275_v33, %v275_v33  ;;  %v4389_v45 = vrot.slane %v275_v33, %v4346_v25  ;;  %v328_v46 = vcombine.high %v276_v34, %v276_v34 }
  0x3b   :  { %v4392_v47 = vrot.slane %v276_v34, %v4346_v25  ;;  %v532_v48 = vcombine.high %v528_v35, %v528_v35  ;;  %v4405_v53 = vrot.slane %v528_v35, %v4346_v25  ;;  %v581_v58 = vcombine.high %v529_v38, %v529_v38 }
  0x3c   :  { %v4398_v51 = vrot.slane %v4386_v43, %v4346_v25  ;;  %v4402_v52 = vrot.slane %v4389_v45, %v4346_v25  ;;  %v4409_v55 = vrot.slane %v279_v44, %v4346_v25  ;;  %v4414_v57 = vrot.slane %v328_v46, %v4346_v25 }
  0x3d   :  { %7566 = vst [vmem:[#allocation20_spill] sm:$0xff] %v4392_v47  ;;  %v4426_v61 = vrot.slane %v4405_v53, %v4346_v25  ;;  %v4429_v62 = vrot.slane %v529_v38, %v4346_v25  ;;  %v4434_v0 = vrot.slane %v532_v48, %v4346_v25  ;;  %v785_v1 = vcombine.high %v781_v49, %v781_v49 }
  0x3e   :  { %7567 = vst [vmem:[#allocation21_spill] sm:$0xff] %v4398_v51  ;;  %7568 = vst [vmem:[#allocation22_spill] sm:$0xff] %v4402_v52  ;;  %v4418_v59 = vrot.slane %v4398_v51, %v4325_v8  ;;  %v4422_v60 = vrot.slane %v4402_v52, %v4325_v8  ;;  %v4437_v2 = vrot.slane %v781_v49, %v4346_v25  ;;  %v4478_v49 = vld [vmem:[#allocation2 + $0x58] sm:$0xff] }
  0x3f   :  { %7569 = vst [vmem:[#allocation23_spill] sm:$0xff] %v4409_v55  ;;  %7570 = vst [vmem:[#allocation24_spill] sm:$0xff] %v4414_v57  ;;  %v4447_v7 = vrot.slane %v4426_v61, %v4325_v8  ;;  %v834_v9 = vcombine.high %v782_v50, %v782_v50  ;;  %v4452_v15 = vrot.slane %v581_v58, %v4346_v25 }
  0x40   :  { %7571 = vst [vmem:[#allocation25_spill] sm:$0xff] %v4426_v61  ;;  %7572 = vst [vmem:[#allocation26_spill] sm:$0xff] %v4429_v62  ;;  %v236_v4 = vmul.f32 %v4418_v59, %v4331_v17  ;;  %v457_v6 = vmul.f32 %v4422_v60, %v4333_v18  ;;  %v4456_v16 = vrot.slane %v4437_v2, %v4346_v25 }
  0x41   :  { %7573 = vst [vmem:[#allocation27_spill] sm:$0xff] %v4434_v0  ;;  %7574 = vst [vmem:[#allocation28_spill] sm:$0xff] %v4452_v15  ;;  %v4459_v26 = vrot.slane %v782_v50, %v4346_v25  ;;  %v710_v34 = vmul.f32 %v4447_v7, %v4337_v20  ;;  %v1035_v35 = vmul.f32 %v1033_v31, %v4439_v3  ;;  %v4665_v0 = vld [vmem:[#allocation2 + $0xe0] sm:$0xff] }
  0x42   :  { %7575 = vst [vmem:[#allocation29_spill] sm:$0xff] %v4456_v16  ;;  %v489_v30 = vadd.f32 %v457_v6, %v236_v4  ;;  %v4469_v38 = vrot.slane %v785_v1, %v4346_v25  ;;  %v4473_v44 = vrot.slane %v4456_v16, %v4325_v8  ;;  %v1038_v46 = vcombine.high %v1034_v54, %v1034_v54  ;;  %v4486_v1 = vld [vmem:[#allocation2 + $0x60] sm:$0xff] }
  0x43   :  { %7576 = vst [vmem:[#allocation30_spill] sm:$0xff] %v4459_v26  ;;  %v4476_v48 = vrot.slane %v1034_v54, %v4346_v25  ;;  %v4483_v4 = vrot.slane %v834_v9, %v4346_v25  ;;  %v1287_v31 = vmul.f32 %v1286_v40, %v4461_v28  ;;  %7579 = vst [vmem:[#allocation33_spill] sm:$0xff] %v4486_v1 }
  0x44   :  { %7577 = vst [vmem:[#allocation31_spill] sm:$0xff] %v4469_v38  ;;  %v742_v50 = vadd.f32 %v710_v34, %v489_v30  ;;  %v963_v54 = vmul.f32 %v4473_v44, %v4367_v36  ;;  %v1087_v30 = vcombine.high %v1035_v35, %v1035_v35  ;;  %v4496_v34 = vld [vmem:[#allocation2 + $0x68] sm:$0xff]  ;;  %v4499_v9 = vrot.slane %v1038_v46, %v4346_v25 }
  0x45   :  { %7578 = vst [vmem:[#allocation32_spill] sm:$0xff] %v4483_v4  ;;  %v4494_v33 = vrot.slane %v4476_v48, %v4346_v25  ;;  %7581 = vst [vmem:[#allocation35_spill] sm:$0xff] %v4496_v34  ;;  %v4502_v63 = vrot.slane %v1035_v35, %v4346_v25  ;;  %v1288_v58 = vmul.f32 %v1286_v40, %v4478_v49 }
  0x46   :  { %7582 = vst [vmem:[#allocation36_spill] sm:$0xff] %v4499_v9  ;;  %v1291_v12 = vcombine.high %v1287_v31, %v1287_v31  ;;  %v995_v6 = vadd.f32 %v963_v54, %v742_v50  ;;  %v4510_v23 = vrot.slane %v1287_v31, %v4346_v25  ;;  %v1540_v22 = vmul.f32 %v4378_v41, %v4486_v1 }
  0x47   :  { %7580 = vst [vmem:[#allocation34_spill] sm:$0xff] %v4494_v33  ;;  %7583 = vst [vmem:[#allocation37_spill] sm:$0xff] %v4502_v63  ;;  %v4507_v56 = vrot.slane %v4494_v33, %v4325_v8  ;;  %v1340_v21 = vcombine.high %v1288_v58, %v1288_v58  ;;  %v4517_v35 = vrot.slane %v1288_v58, %v4346_v25  ;;  %v4584_v63 = vld [vmem:[#allocation2 + $0x90] sm:$0xff] }
  0x48   :  { %v1541_v40 = vmul.f32 %v4378_v41, %v4496_v34  ;;  %v4522_v50 = vrot.slane %v1087_v30, %v4346_v25  ;;  %v4528_v54 = vrot.slane %v4510_v23, %v4346_v25  ;;  %v1544_v14 = vcombine.high %v1540_v22, %v1540_v22  ;;  %7595 = vst [vmem:[#allocation49_spill] sm:$0xff] %v4584_v63 }
  0x49   :  { %7584 = vst [vmem:[#allocation38_spill] sm:$0xff] %v4517_v35  ;;  %v1216_v31 = vmul.f32 %v4507_v56, %v4372_v39  ;;  %v4535_v46 = vrot.slane %v1291_v12, %v4346_v25  ;;  %v4540_v30 = vrot.slane %v1540_v22, %v4346_v25  ;;  %v4571_v12 = vmul.f32 %v4382_v42, %v4542_v11 }
  0x4a   :  { %7585 = vst [vmem:[#allocation39_spill] sm:$0xff] %v4522_v50  ;;  %7586 = vst [vmem:[#allocation40_spill] sm:$0xff] %v4528_v54  ;;  %v4545_v50 = vrot.slane %v1340_v21, %v4346_v25  ;;  %v4549_v4 = vrot.slane %v4528_v54, %v4325_v8  ;;  %v1593_v58 = vcombine.high %v1541_v40, %v1541_v40  ;;  %v4562_v21 = vld [vmem:[#allocation2 + $0x80] sm:$0xff] }
  0x4b   :  { %7588 = vst [vmem:[#allocation42_spill] sm:$0xff] %v4535_v46  ;;  %v1248_v10 = vadd.f32 %v1216_v31, %v995_v6  ;;  %v4555_v41 = vrot.slane %v4540_v30, %v4346_v25  ;;  %v4558_v22 = vrot.slane %v1541_v40, %v4346_v25  ;;  %v1793_v6 = vmul.f32 %v4382_v42, %v4530_v13  ;;  %v4645_v46 = vld [vmem:[#allocation2 + $0xd0] sm:$0xff] }
  0x4c   :  { %7589 = vst [vmem:[#allocation43_spill] sm:$0xff] %v4545_v50  ;;  %7592 = vst [vmem:[#allocation46_spill] sm:$0xff] %v4562_v21  ;;  %v1469_v31 = vmul.f32 %v4549_v4, %v4461_v28  ;;  %v4567_v50 = vrot.slane %v1544_v14, %v4346_v25  ;;  %v4575_v15 = vrot.slane %v4354_v29, %v4325_v8  ;;  %v7596_v14 = vsub.s32 1, %v4322_v5 }
  0x4d   :  { %7590 = vst [vmem:[#allocation44_spill] sm:$0xff] %v4555_v41  ;;  %7591 = vst [vmem:[#allocation45_spill] sm:$0xff] %v4558_v22  ;;  %v4579_v40 = vrot.slane %v4555_v41, %v4325_v8  ;;  %v1797_v57 = vcombine.high %v1793_v6, %v1793_v6  ;;  %v4582_v35 = vrot.slane %v1793_v6, %v4346_v25 }
  0x4e   :  { %7593 = vst [vmem:[#allocation47_spill] sm:$0xff] %v4567_v50  ;;  %7594 = vst [vmem:[#allocation48_spill] sm:$0xff] %v4575_v15  ;;  %v4589_v26 = vrot.slane %v4354_v29, %v7596_v14  ;;  %v1501_v42 = vadd.f32 %v1469_v31, %v1248_v10  ;;  %v4594_v47 = vrot.slane %v1593_v58, %v4346_v25 }
  0x4f   :  { %v4598_v24 = vmul.f32 %v4575_v15, %v4562_v21  ;;  %v1722_v50 = vmul.f32 %v4579_v40, %v4486_v1  ;;  %v4606_v14 = vrot.slane %v4582_v35, %v4346_v25  ;;  %v1846_v10 = vcombine.high %v4571_v12, %v4571_v12  ;;  %v4627_v15 = vld [vmem:[#allocation2 + $0xb0] sm:$0xff]  ;;  %7611 = vst [vmem:[#allocation62_spill] sm:$0xff] %v4645_v46 }
  0x50   :  { %7597 = vst [vmem:[#allocation50_spill] sm:$0xff] %v4589_v26  ;;  %7598 = vst [vmem:[#allocation51_spill] sm:$0xff] %v4594_v47  ;;  %v4611_v58 = vrot.slane %v1797_v57, %v4346_v25  ;;  %v4615_v31 = vrot.slane %v4571_v12, %v4346_v25  ;;  %v4623_v62 = vmul.f32 %v4589_v26, %v4584_v63  ;;  %v4625_v47 = vld [vmem:[#allocation2 + $0xa0] sm:$0xff]  ;;  %v7606_v12 = vsub.s32 2, %v4322_v5 }
  0x51   :  { %7599 = vst [vmem:[#allocation52_spill] sm:$0xff] %v4598_v24  ;;  %7600 = vst [vmem:[#allocation53_spill] sm:$0xff] %v4606_v14  ;;  %v4619_v6 = vrot.slane %v4598_v24, %v4346_v25  ;;  %v1754_v22 = vadd.f32 %v1722_v50, %v1501_v42  ;;  %v4631_v57 = vrot.slane %v4606_v14, %v4325_v8  ;;  %v7608_v24 = vsub.s32 3, %v4322_v5  ;;  %v4643_v26 = vld [vmem:[#allocation2 + $0xc0] sm:$0xff] }
  0x52   :  { %7601 = vst [vmem:[#allocation54_spill] sm:$0xff] %v4611_v58  ;;  %7602 = vst [vmem:[#allocation55_spill] sm:$0xff] %v4615_v31  ;;  %v4636_v31 = vrot.slane %v4354_v29, %v7606_v12  ;;  %v4653_v42 = vrot.slane %v4623_v62, %v4346_v25  ;;  %v7613_v12 = vsub.s32 4, %v4322_v5 }
  0x53   :  { %7603 = vst [vmem:[#allocation56_spill] sm:$0xff] %v4623_v62  ;;  %7604 = vst [vmem:[#allocation57_spill] sm:$0xff] %v4625_v47  ;;  %v4641_v58 = vrot.slane %v4354_v29, %v7608_v24  ;;  %v4649_v50 = vrot.slane %v4619_v6, %v4346_v25  ;;  %v7615_v24 = vsub.s32 5, %v4322_v5  ;;  %v1975_v55 = vmul.f32 %v4631_v57, %v4530_v13 }
  0x54   :  { %7605 = vst [vmem:[#allocation58_spill] sm:$0xff] %v4627_v15  ;;  %7607 = vst [vmem:[#allocation59_spill] sm:$0xff] %v4636_v31  ;;  %v4658_v9 = vrot.slane %v4354_v29, %v7613_v12  ;;  %v4671_v32 = vmul.f32 %v4636_v31, %v4625_v47  ;;  %v7620_v12 = vsub.s32 6, %v4322_v5  ;;  %v4686_v41 = vrot.slane %v4653_v42, %v4346_v25 }
  0x55   :  { %7609 = vst [vmem:[#allocation60_spill] sm:$0xff] %v4641_v58  ;;  %7610 = vst [vmem:[#allocation61_spill] sm:$0xff] %v4643_v26  ;;  %v4663_v38 = vrot.slane %v4354_v29, %v7615_v24  ;;  %v4675_v62 = vmul.f32 %v4641_v58, %v4627_v15  ;;  %v2151_v24 = vrot.slane %v4649_v50, %v4325_v8 }
  0x56   :  { %7612 = vst [vmem:[#allocation63_spill] sm:$0xff] %v4649_v50  ;;  %7614 = vst [vmem:[#allocation64_spill] sm:$0xff] %v4658_v9  ;;  %v4680_v14 = vrot.slane %v4354_v29, %v7620_v12  ;;  %v4690_v31 = vmul.f32 %v4658_v9, %v4643_v26  ;;  %v2007_v54 = vadd.f32 %v1975_v55, %v1754_v22 }
  0x57   :  { %7616 = vst [vmem:[#allocation65_spill] sm:$0xff] %v4663_v38  ;;  %7617 = vst [vmem:[#allocation66_spill] sm:$0xff] %v4665_v0  ;;  %v4694_v58 = vmul.f32 %v4663_v38, %v4645_v46  ;;  %v4698_v12 = vrot.slane %v4671_v32, %v4346_v25  ;;  %v4702_v50 = vrot.slane %v4675_v62, %v4346_v25  ;;  %v4719_v38 = vld [vmem:[#allocation2 + $0xf0] sm:$0xff] }
  0x58   :  { %7618 = vst [vmem:[#allocation67_spill] sm:$0xff] %v4671_v32  ;;  %7619 = vst [vmem:[#allocation68_spill] sm:$0xff] %v4675_v62  ;;  %v4706_v33 = vmul.f32 %v4680_v14, %v4665_v0  ;;  %v2228_v9 = vmul.f32 %v2151_v24, %v4562_v21  ;;  %v2404_v16 = vrot.slane %v4686_v41, %v4325_v8 }
  0x59   :  { %7621 = vst [vmem:[#allocation69_spill] sm:$0xff] %v4680_v14  ;;  %7622 = vst [vmem:[#allocation70_spill] sm:$0xff] %v4686_v41  ;;  %v4713_v55 = vrot.slane %v4690_v31, %v4346_v25  ;;  %v4717_v22 = vrot.slane %v4694_v58, %v4346_v25  ;;  %v4723_v62 = vrot.slane %v4698_v12, %v4346_v25 }
  0x5a   :  { %7623 = vst [vmem:[#allocation71_spill] sm:$0xff] %v4690_v31  ;;  %7624 = vst [vmem:[#allocation72_spill] sm:$0xff] %v4694_v58  ;;  %v4727_v14 = vrot.slane %v4702_v50, %v4346_v25  ;;  %v4731_v32 = vrot.slane %v4706_v33, %v4346_v25  ;;  %v7630_v31 = vsub.s32 7, %v4322_v5  ;;  %v2260_v58 = vadd.f32 %v2228_v9, %v2007_v54  ;;  %v4759_v54 = vld [vmem:[#allocation2 + $0x8] sm:$0xff] }
  0x5b   :  { %7625 = vst [vmem:[#allocation73_spill] sm:$0xff] %v4706_v33  ;;  %7626 = vst [vmem:[#allocation74_spill] sm:$0xff] %v4717_v22  ;;  %v2481_v61 = vmul.f32 %v2404_v16, %v4584_v63  ;;  %v4741_v52 = vrot.slane %v4713_v55, %v4346_v25  ;;  %v4745_v51 = vrot.slane %v4717_v22, %v4346_v25 }
  0x5c   :  { %7627 = vst [vmem:[#allocation75_spill] sm:$0xff] %v4723_v62  ;;  %7628 = vst [vmem:[#allocation76_spill] sm:$0xff] %v4727_v14  ;;  %v4736_v41 = vrot.slane %v4354_v29, %v7630_v31  ;;  %v2657_v33 = vrot.slane %v4723_v62, %v4325_v8  ;;  %v2910_v5 = vrot.slane %v4727_v14, %v4325_v8 }
  0x5d   :  { %7629 = vst [vmem:[#allocation77_spill] sm:$0xff] %v4731_v32  ;;  %7632 = vst [vmem:[#allocation79_spill] sm:$0xff] %v4741_v52  ;;  %v4753_v29 = vrot.slane %v4731_v32, %v4346_v25  ;;  %v2513_v31 = vadd.f32 %v2481_v61, %v2260_v58  ;;  %v3163_v63 = vrot.slane %v4741_v52, %v4325_v8 }
  0x5e   :  { %7631 = vst [vmem:[#allocation78_spill] sm:$0xff] %v4736_v41  ;;  %7633 = vst [vmem:[#allocation80_spill] sm:$0xff] %v4745_v51  ;;  %v4757_v9 = vmul.f32 %v4736_v41, %v4719_v38  ;;  %v3416_v62 = vrot.slane %v4745_v51, %v4325_v8  ;;  %v237_v14 = vmul.f32 %v4418_v59, %v4759_v54 }
  0x5f   :  { %7634 = vst [vmem:[#allocation81_spill] sm:$0xff] %v4753_v29  ;;  %7636 = vst [vmem:[#allocation83_spill] sm:$0xff] %v4759_v54  ;;  %v2734_v21 = vmul.f32 %v2657_v33, %v4625_v47  ;;  %v2987_v32 = vmul.f32 %v2910_v5, %v4627_v15  ;;  %v3669_v41 = vrot.slane %v4753_v29, %v4325_v8 }
  0x60   :  { %7635 = vst [vmem:[#allocation82_spill] sm:$0xff] %v4757_v9  ;;  %v4773_v22 = vrot.slane %v4757_v9, %v4346_v25  ;;  %v1812_v61 = vcombine.high %v4582_v35, %v4582_v35  ;;  %v4778_v58 = vrot.slane %v1846_v10, %v4346_v25  ;;  %v458_v59 = vmul.f32 %v4422_v60, %v4335_v19 }
  0x61   :  { %v711_v51 = vmul.f32 %v4447_v7, %v4350_v27  ;;  %v2766_v52 = vadd.f32 %v2734_v21, %v2513_v31  ;;  %v3240_v15 = vmul.f32 %v3163_v63, %v4643_v26  ;;  %v3493_v29 = vmul.f32 %v3416_v62, %v4645_v46  ;;  %v4801_v46 = vld [vmem:[#allocation2 + $0x88] sm:$0xff] }
  0x62   :  { %7637 = vst [vmem:[#allocation84_spill] sm:$0xff] %v4778_v58  ;;  %v4788_v9 = vrot.slane %v4773_v22, %v4346_v25  ;;  %v3746_v35 = vmul.f32 %v3669_v41, %v4665_v0  ;;  %v490_v47 = vadd.f32 %v458_v59, %v237_v14  ;;  %v964_v10 = vmul.f32 %v4473_v44, %v4369_v37  ;;  %v4803_v0 = vld [vmem:[#allocation2 + $0x98] sm:$0xff] }
  0x63   :  { %v1217_v60 = vmul.f32 %v4507_v56, %v4439_v3  ;;  %v3019_v58 = vadd.f32 %v2987_v32, %v2766_v52  ;;  %v1470_v21 = vmul.f32 %v4549_v4, %v4478_v49  ;;  %v1723_v31 = vmul.f32 %v4579_v40, %v4496_v34  ;;  %v4809_v52 = vld [vmem:[#allocation2 + $0xa8] sm:$0xff]  ;;  %v4811_v59 = vld [vmem:[#allocation2 + $0xb8] sm:$0xff] }
  0x64   :  { %7638 = vst [vmem:[#allocation85_spill] sm:$0xff] %v4788_v9  ;;  %v3922_v7 = vrot.slane %v4788_v9, %v4325_v8  ;;  %v743_v14 = vadd.f32 %v711_v51, %v490_v47  ;;  %v1976_v44 = vmul.f32 %v4631_v57, %v4542_v11  ;;  %v2229_v56 = vmul.f32 %v2151_v24, %v4801_v46  ;;  %v4820_v47 = vld [vmem:[#allocation2 + $0xc8] sm:$0xff]  ;;  %v4822_v51 = vld [vmem:[#allocation2 + $0xd8] sm:$0xff] }
  0x65   :  { %v2482_v32 = vmul.f32 %v2404_v16, %v4803_v0  ;;  %v3272_v4 = vadd.f32 %v3240_v15, %v3019_v58  ;;  %v4815_v40 = vmul.f32 %v2657_v33, %v4809_v52  ;;  %v4818_v34 = vmul.f32 %v2910_v5, %v4811_v59 }
  0x66   :  { %v3999_v9 = vmul.f32 %v3922_v7, %v4719_v38  ;;  %v996_v57 = vadd.f32 %v964_v10, %v743_v14  ;;  %v4825_v16 = vmul.f32 %v3163_v63, %v4820_v47  ;;  %v4828_v24 = vmul.f32 %v3416_v62, %v4822_v51 }
  0x67   :  { %v73_v15 = vcombine.high %v4386_v43, %v4386_v43  ;;  %v3525_v58 = vadd.f32 %v3493_v29, %v3272_v4  ;;  %v7639_v33 = vcombine.high %v4389_v45, %v4389_v45  ;;  %v7641_v10 = vcombine.high %v4405_v53, %v4405_v53 }
  0x68   :  { %v7643_v62 = vcombine.high %v4437_v2, %v4437_v2  ;;  %v1249_v43 = vadd.f32 %v1217_v60, %v996_v57  ;;  %v7646_v45 = vcombine.high %v4476_v48, %v4476_v48  ;;  %v7648_v53 = vcombine.high %v4510_v23, %v4510_v23  ;;  %v4865_v2 = vld [vmem:[#allocation2 + $0xe8] sm:$0xff] }
  0x69   :  { %v4836_v5 = vrot.slane %v7639_v33, %v4346_v25  ;;  %v4842_v14 = vrot.slane %v7641_v10, %v4346_v25  ;;  %v4851_v29 = vrot.slane %v73_v15, %v4346_v25  ;;  %v3778_v10 = vadd.f32 %v3746_v35, %v3525_v58  ;;  %7650 = vst [vmem:[#allocation92_spill] sm:$0xff] %v4865_v2 }
  0x6a   :  { %v4848_v63 = vrot.slane %v7643_v62, %v4346_v25  ;;  %v4857_v4 = vrot.slane %v7646_v45, %v4346_v25  ;;  %v4863_v33 = vrot.slane %v7648_v53, %v4346_v25  ;;  %v4867_v62 = vld [vmem:[#allocation2 + $0xf8] sm:$0xff]  ;;  %v1502_v15 = vadd.f32 %v1470_v21, %v1249_v43 }
  0x6b   :  { %7640 = vst [vmem:[#allocation86_spill] sm:$0xff] %v4836_v5  ;;  %7642 = vst [vmem:[#allocation87_spill] sm:$0xff] %v4842_v14  ;;  %v384_v60 = vrot.slane %v4836_v5, %v4325_v8  ;;  %v637_v57 = vrot.slane %v4842_v14, %v4325_v8  ;;  %v4878_v23 = vmul.f32 %v3669_v41, %v4865_v2 }
  0x6c   :  { %7644 = vst [vmem:[#allocation88_spill] sm:$0xff] %v4848_v63  ;;  %7645 = vst [vmem:[#allocation89_spill] sm:$0xff] %v4851_v29  ;;  %v4875_v48 = vrot.slane %v4848_v63, %v4325_v8  ;;  %v4881_v35 = vmul.f32 %v3922_v7, %v4867_v62  ;;  %v163_v58 = vrot.slane %v4851_v29, %v4325_v8 }
  0x6d   :  { %7647 = vst [vmem:[#allocation90_spill] sm:$0xff] %v4857_v4  ;;  %7649 = vst [vmem:[#allocation91_spill] sm:$0xff] %v4863_v33  ;;  %v4031_v45 = vadd.f32 %v3999_v9, %v3778_v10  ;;  %v459_v53 = vmul.f32 %v384_v60, %v4333_v18  ;;  %v4888_v14 = vrot.slane %v4857_v4, %v4325_v8 }
  0x6e   :  { %7651 = vst [vmem:[#allocation93_spill] sm:$0xff] %v4867_v62  ;;  %v4892_v63 = vrot.slane %v4863_v33, %v4325_v8  ;;  %v1755_v21 = vadd.f32 %v1723_v31, %v1502_v15  ;;  %v238_v41 = vmul.f32 %v163_v58, %v4331_v17  ;;  %v712_v7 = vmul.f32 %v637_v57, %v4337_v20 }
  0x6f   :  { %v965_v43 = vmul.f32 %v4875_v48, %v4367_v36  ;;  %4063 = vst [vmem:[#allocation7] sm:$0xff] %v4031_v45  ;;  %v7652_v9 = vcombine.high %v4540_v30, %v4540_v30  ;;  %v4905_v4 = vrot.slane %v1812_v61, %v4346_v25  ;;  %v2065_v31 = vcombine.high %v4619_v6, %v4619_v6 }
  0x70   :  { %v2318_v15 = vcombine.high %v4653_v42, %v4653_v42  ;;  %v2008_v33 = vadd.f32 %v1976_v44, %v1755_v21  ;;  %v491_v5 = vadd.f32 %v459_v53, %v238_v41  ;;  %v2571_v45 = vcombine.high %v4698_v12, %v4698_v12 }
  0x71   :  { %v4902_v10 = vrot.slane %v7652_v9, %v4346_v25  ;;  %7654 = vst [vmem:[#allocation95_spill] sm:$0xff] %v4905_v4  ;;  %v2824_v29 = vcombine.high %v4702_v50, %v4702_v50  ;;  %v1902_v61 = vrot.slane %v4905_v4, %v4325_v8  ;;  %v4920_v9 = vrot.slane %v2065_v31, %v4346_v25 }
  0x72   :  { %v4923_v6 = vrot.slane %v2318_v15, %v4346_v25  ;;  %v2261_v42 = vadd.f32 %v2229_v56, %v2008_v33  ;;  %v744_v44 = vadd.f32 %v712_v7, %v491_v5  ;;  %v1218_v12 = vmul.f32 %v4888_v14, %v4372_v39 }
  0x73   :  { %7653 = vst [vmem:[#allocation94_spill] sm:$0xff] %v4902_v10  ;;  %v1649_v30 = vrot.slane %v4902_v10, %v4325_v8  ;;  %7655 = vst [vmem:[#allocation96_spill] sm:$0xff] %v4920_v9  ;;  %v1471_v50 = vmul.f32 %v4892_v63, %v4461_v28  ;;  %v2155_v53 = vrot.slane %v4920_v9, %v4325_v8 }
  0x74   :  { %7656 = vst [vmem:[#allocation97_spill] sm:$0xff] %v4923_v6  ;;  %v2408_v21 = vrot.slane %v4923_v6, %v4325_v8  ;;  %v4934_v41 = vrot.slane %v2571_v45, %v4346_v25  ;;  %v4937_v31 = vrot.slane %v2824_v29, %v4346_v25  ;;  %v2514_v56 = vadd.f32 %v2482_v32, %v2261_v42  ;;  %v7659_v45 = vld [vmem:[#allocation74_spill] sm:$0xff] }
  0x75   :  { %v997_v5 = vadd.f32 %v965_v43, %v744_v44  ;;  %v1724_v33 = vmul.f32 %v1649_v30, %v4486_v1  ;;  %v1977_v7 = vmul.f32 %v1902_v61, %v4530_v13  ;;  %v3077_v6 = vcombine.high %v4713_v55, %v4713_v55  ;;  %v7660_v43 = vld [vmem:[#allocation46_spill] sm:$0xff]  ;;  %v7661_v44 = vld [vmem:[#allocation49_spill] sm:$0xff] }
  0x76   :  { %7657 = vst [vmem:[#allocation98_spill] sm:$0xff] %v4934_v41  ;;  %7658 = vst [vmem:[#allocation99_spill] sm:$0xff] %v4937_v31  ;;  %v2661_v15 = vrot.slane %v4934_v41, %v4325_v8  ;;  %v2914_v9 = vrot.slane %v4937_v31, %v4325_v8  ;;  %v3330_v4 = vcombine.high %v7659_v45, %v7659_v45  ;;  %v7664_v31 = vld [vmem:[#allocation77_spill] sm:$0xff] }
  0x77   :  { %v2767_v29 = vadd.f32 %v4815_v40, %v2514_v56  ;;  %v1250_v32 = vadd.f32 %v1218_v12, %v997_v5  ;;  %v2230_v42 = vmul.f32 %v2155_v53, %v7660_v43  ;;  %v2483_v10 = vmul.f32 %v2408_v21, %v7661_v44 }
  0x78   :  { %v4953_v13 = vrot.slane %v3077_v6, %v4346_v25  ;;  %v4956_v41 = vrot.slane %v3330_v4, %v4346_v25  ;;  %v3583_v1 = vcombine.high %v7664_v31, %v7664_v31  ;;  %v3836_v55 = vcombine.high %v4773_v22, %v4773_v22 }
  0x79   :  { %v3020_v45 = vadd.f32 %v4818_v34, %v2767_v29  ;;  %v1503_v40 = vadd.f32 %v1471_v50, %v1250_v32  ;;  %v239_v12 = vmul.f32 %v163_v58, %v4759_v54  ;;  %v460_v56 = vmul.f32 %v384_v60, %v4335_v19  ;;  %v7667_v29 = vld [vmem:[#allocation57_spill] sm:$0xff]  ;;  %v7668_v32 = vld [vmem:[#allocation58_spill] sm:$0xff] }
  0x7a   :  { %7662 = vst [vmem:[#allocation74_spill] sm:$0xff] %v4953_v13  ;;  %7663 = vst [vmem:[#allocation46_spill] sm:$0xff] %v4956_v41  ;;  %v3167_v6 = vrot.slane %v4953_v13, %v4325_v8  ;;  %v3420_v4 = vrot.slane %v4956_v41, %v4325_v8  ;;  %v4970_v5 = vrot.slane %v3583_v1, %v4346_v25 }
  0x7b   :  { %v4973_v31 = vrot.slane %v3836_v55, %v4346_v25  ;;  %v3273_v22 = vadd.f32 %v4825_v16, %v3020_v45  ;;  %v1756_v34 = vadd.f32 %v1724_v33, %v1503_v40  ;;  %v492_v50 = vadd.f32 %v460_v56, %v239_v12  ;;  %v7670_v40 = vld [vmem:[#allocation66_spill] sm:$0xff] }
  0x7c   :  { %7665 = vst [vmem:[#allocation77_spill] sm:$0xff] %v4970_v5  ;;  %v713_v58 = vmul.f32 %v637_v57, %v4350_v27  ;;  %v2736_v60 = vmul.f32 %v2661_v15, %v7667_v29  ;;  %v2989_v44 = vmul.f32 %v2914_v9, %v7668_v32  ;;  %v3673_v13 = vrot.slane %v4970_v5, %v4325_v8  ;;  %v7669_v57 = vld [vmem:[#allocation62_spill] sm:$0xff] }
  0x7d   :  { %7666 = vst [vmem:[#allocation100_spill] sm:$0xff] %v4973_v31  ;;  %v3926_v1 = vrot.slane %v4973_v31, %v4325_v8  ;;  %v3526_v41 = vadd.f32 %v4828_v24, %v3273_v22  ;;  %v2009_v55 = vadd.f32 %v1977_v7, %v1756_v34  ;;  %v966_v16 = vmul.f32 %v4875_v48, %v4369_v37  ;;  %v7671_v22 = vld [vmem:[#allocation35_spill] sm:$0xff] }
  0x7e   :  { %v745_v25 = vadd.f32 %v713_v58, %v492_v50  ;;  %v3242_v33 = vmul.f32 %v3167_v6, %v4643_v26  ;;  %v3495_v45 = vmul.f32 %v3420_v4, %v7669_v57  ;;  %v3748_v12 = vmul.f32 %v3673_v13, %v7670_v40 }
  0x7f   :  { %v1219_v56 = vmul.f32 %v4888_v14, %v4439_v3  ;;  %v3779_v5 = vadd.f32 %v4878_v23, %v3526_v41  ;;  %v2262_v27 = vadd.f32 %v2230_v42, %v2009_v55  ;;  %v1472_v24 = vmul.f32 %v4892_v63, %v4478_v49  ;;  %v7672_v42 = vld [vmem:[#allocation21_spill] sm:$0xff] }
  0x80   :  { %v998_v31 = vadd.f32 %v966_v16, %v745_v25  ;;  %v4001_v7 = vmul.f32 %v3926_v1, %v4719_v38  ;;  %v1725_v48 = vmul.f32 %v1649_v30, %v7671_v22  ;;  %v1978_v34 = vmul.f32 %v1902_v61, %v4542_v11 }
  0x81   :  { %v2231_v50 = vmul.f32 %v2155_v53, %v4801_v46  ;;  %v4032_v58 = vadd.f32 %v4881_v35, %v3779_v5  ;;  %v2515_v40 = vadd.f32 %v2483_v10, %v2262_v27  ;;  %v2484_v14 = vmul.f32 %v2408_v21, %v4803_v0  ;;  %v7673_v35 = vld [vmem:[#allocation22_spill] sm:$0xff]  ;;  %v7674_v10 = vld [vmem:[#allocation25_spill] sm:$0xff] }
  0x82   :  { %v1251_v37 = vadd.f32 %v1219_v56, %v998_v31  ;;  %v2737_v23 = vmul.f32 %v2661_v15, %v4809_v52  ;;  %v2990_v25 = vmul.f32 %v2914_v9, %v4811_v59  ;;  %v3243_v63 = vmul.f32 %v3167_v6, %v4820_v47  ;;  %v7675_v15 = vld [vmem:[#allocation29_spill] sm:$0xff]  ;;  %v7676_v5 = vld [vmem:[#allocation34_spill] sm:$0xff] }
  0x83   :  { %v5004_v41 = vmul.f32 %v3420_v4, %v4822_v51  ;;  %4064 = vst [vmem:[#allocation7 + $0x8] sm:$0xff] %v4032_v58  ;;  %v2768_v30 = vadd.f32 %v2736_v60, %v2515_v40  ;;  %v103_v53 = vcombine.high %v7672_v42, %v7672_v42  ;;  %v324_v27 = vcombine.high %v7673_v35, %v7673_v35  ;;  %v7677_v4 = vld [vmem:[#allocation40_spill] sm:$0xff] }
  0x84   :  { %v1504_v61 = vadd.f32 %v1472_v24, %v1251_v37  ;;  %v577_v21 = vcombine.high %v7674_v10, %v7674_v10  ;;  %v830_v9 = vcombine.high %v7675_v15, %v7675_v15  ;;  %v1083_v6 = vcombine.high %v7676_v5, %v7676_v5  ;;  %v7678_v15 = vld [vmem:[#allocation44_spill] sm:$0xff]  ;;  %v7680_v5 = vld [vmem:[#allocation63_spill] sm:$0xff] }
  0x85   :  { %v1336_v31 = vcombine.high %v7677_v4, %v7677_v4  ;;  %v3021_v60 = vadd.f32 %v2989_v44, %v2768_v30  ;;  %v167_v55 = vrot.slane %v103_v53, %v4325_v8  ;;  %v388_v16 = vrot.slane %v324_v27, %v4325_v8  ;;  %v7681_v4 = vld [vmem:[#allocation70_spill] sm:$0xff] }
  0x86   :  { %v1757_v37 = vadd.f32 %v1725_v48, %v1504_v61  ;;  %v3749_v40 = vmul.f32 %v3673_v13, %v4865_v2  ;;  %v641_v56 = vrot.slane %v577_v21, %v4325_v8  ;;  %v894_v24 = vrot.slane %v830_v9, %v4325_v8 }
  0x87   :  { %v5024_v58 = vrot.slane %v1083_v6, %v4325_v8  ;;  %v3274_v42 = vadd.f32 %v3242_v33, %v3021_v60  ;;  %v240_v10 = vmul.f32 %v167_v55, %v4331_v17  ;;  %v461_v44 = vmul.f32 %v388_v16, %v4333_v18 }
  0x88   :  { %v2010_v35 = vadd.f32 %v1978_v34, %v1757_v37  ;;  %v714_v48 = vmul.f32 %v641_v56, %v4337_v20  ;;  %v967_v30 = vmul.f32 %v894_v24, %v4367_v36  ;;  %v1400_v61 = vrot.slane %v1336_v31, %v4325_v8  ;;  %v7679_v34 = vld [vmem:[#allocation53_spill] sm:$0xff]  ;;  %v7682_v37 = vld [vmem:[#allocation75_spill] sm:$0xff] }
  0x89   :  { %v1220_v13 = vmul.f32 %v5024_v58, %v4372_v39  ;;  %v3527_v53 = vadd.f32 %v3495_v45, %v3274_v42  ;;  %v493_v21 = vadd.f32 %v461_v44, %v240_v10  ;;  %v1589_v33 = vcombine.high %v7678_v15, %v7678_v15  ;;  %v7683_v20 = vld [vmem:[#allocation33_spill] sm:$0xff] }
  0x8a   :  { %v2263_v27 = vadd.f32 %v2231_v50, %v2010_v35  ;;  %v1842_v9 = vcombine.high %v7679_v34, %v7679_v34  ;;  %v2095_v6 = vcombine.high %v7680_v5, %v7680_v5  ;;  %v2348_v60 = vcombine.high %v7681_v4, %v7681_v4 }
  0x8b   :  { %v2601_v39 = vcombine.high %v7682_v37, %v7682_v37  ;;  %v3780_v36 = vadd.f32 %v3748_v12, %v3527_v53  ;;  %v746_v45 = vadd.f32 %v714_v48, %v493_v21  ;;  %v1653_v50 = vrot.slane %v1589_v33, %v4325_v8  ;;  %v7684_v12 = vld [vmem:[#allocation41_spill] sm:$0xff]  ;;  %v7685_v21 = vld [vmem:[#allocation76_spill] sm:$0xff] }
  0x8c   :  { %v2516_v31 = vadd.f32 %v2484_v14, %v2263_v27  ;;  %v4002_v42 = vmul.f32 %v3926_v1, %v4867_v62  ;;  %v1473_v35 = vmul.f32 %v1400_v61, %v4461_v28  ;;  %v1906_v10 = vrot.slane %v1842_v9, %v4325_v8  ;;  %v7686_v9 = vld [vmem:[#allocation79_spill] sm:$0xff] }
  0x8d   :  { %v2159_v44 = vrot.slane %v2095_v6, %v4325_v8  ;;  %v4033_v15 = vadd.f32 %v4001_v7, %v3780_v36  ;;  %v999_v5 = vadd.f32 %v967_v30, %v746_v45  ;;  %v2412_v4 = vrot.slane %v2348_v60, %v4325_v8  ;;  %v7687_v7 = vld [vmem:[#allocation80_spill] sm:$0xff]  ;;  %v7688_v30 = vld [vmem:[#allocation81_spill] sm:$0xff] }
  0x8e   :  { %v2769_v34 = vadd.f32 %v2737_v23, %v2516_v31  ;;  %v1726_v37 = vmul.f32 %v1653_v50, %v7683_v20  ;;  %v1979_v14 = vmul.f32 %v1906_v10, %v7684_v12  ;;  %v2665_v53 = vrot.slane %v2601_v39, %v4325_v8  ;;  %v7689_v60 = vld [vmem:[#allocation85_spill] sm:$0xff] }
  0x8f   :  { %v2232_v48 = vmul.f32 %v2159_v44, %v7660_v43  ;;  %4065 = vst [vmem:[#allocation7 + $0x10] sm:$0xff] %v4033_v15  ;;  %v1252_v27 = vadd.f32 %v1220_v13, %v999_v5  ;;  %v2854_v33 = vcombine.high %v7685_v21, %v7685_v21  ;;  %v3107_v36 = vcombine.high %v7686_v9, %v7686_v9 }
  0x90   :  { %v3022_v1 = vadd.f32 %v2990_v25, %v2769_v34  ;;  %v3360_v23 = vcombine.high %v7687_v7, %v7687_v7  ;;  %v3613_v6 = vcombine.high %v7688_v30, %v7688_v30  ;;  %v3866_v31 = vcombine.high %v7689_v60, %v7689_v60  ;;  %v7690_v60 = vld [vmem:[#allocation49_spill] sm:$0xff] }
  0x91   :  { %v241_v39 = vmul.f32 %v167_v55, %v4759_v54  ;;  %v1505_v25 = vadd.f32 %v1473_v35, %v1252_v27  ;;  %v2918_v13 = vrot.slane %v2854_v33, %v4325_v8  ;;  %v3171_v15 = vrot.slane %v3107_v36, %v4325_v8  ;;  %v7692_v54 = vld [vmem:[#allocation18_spill] sm:$0xff] }
  0x92   :  { %v3275_v45 = vadd.f32 %v3243_v63, %v3022_v1  ;;  %v3424_v34 = vrot.slane %v3360_v23, %v4325_v8  ;;  %v3677_v5 = vrot.slane %v3613_v6, %v4325_v8  ;;  %v5069_v21 = vrot.slane %v3866_v31, %v4325_v8  ;;  %v7691_v6 = vld [vmem:[#allocation15_spill] sm:$0xff] }
  0x93   :  { %v462_v9 = vmul.f32 %v388_v16, %v4335_v19  ;;  %v1758_v30 = vadd.f32 %v1726_v37, %v1505_v25  ;;  %v2485_v55 = vmul.f32 %v2412_v4, %v7690_v60  ;;  %v2738_v63 = vmul.f32 %v2665_v53, %v7667_v29  ;;  %v7693_v19 = vld [vmem:[#allocation66_spill] sm:$0xff] }
  0x94   :  { %v3528_v7 = vadd.f32 %v5004_v41, %v3275_v45  ;;  %v2991_v35 = vmul.f32 %v2918_v13, %v7668_v32  ;;  %v3244_v1 = vmul.f32 %v3171_v15, %v4643_v26  ;;  %v3497_v27 = vmul.f32 %v3424_v34, %v7669_v57 }
  0x95   :  { %v494_v33 = vadd.f32 %v462_v9, %v241_v39  ;;  %v2011_v23 = vadd.f32 %v1979_v14, %v1758_v30  ;;  %v715_v31 = vmul.f32 %v641_v56, %v7691_v6  ;;  %v968_v16 = vmul.f32 %v894_v24, %v7692_v54  ;;  %v7698_v30 = vld [vmem:[#allocation90_spill] sm:$0xff] }
  0x96   :  { %v3781_v36 = vadd.f32 %v3749_v40, %v3528_v7  ;;  %v3750_v41 = vmul.f32 %v3677_v5, %v7693_v19  ;;  %v4003_v37 = vmul.f32 %v5069_v21, %v4719_v38  ;;  %v1221_v45 = vmul.f32 %v5024_v58, %v4439_v3 }
  0x97   :  { %v1474_v25 = vmul.f32 %v1400_v61, %v4478_v49  ;;  %v2264_v32 = vadd.f32 %v2232_v48, %v2011_v23  ;;  %v747_v57 = vadd.f32 %v715_v31, %v494_v33  ;;  %v1727_v40 = vmul.f32 %v1653_v50, %v7671_v22  ;;  %v7694_v50 = vld [vmem:[#allocation89_spill] sm:$0xff]  ;;  %v7696_v48 = vld [vmem:[#allocation87_spill] sm:$0xff] }
  0x98   :  { %v4034_v26 = vadd.f32 %v4002_v42, %v3781_v36  ;;  %v1980_v14 = vmul.f32 %v1906_v10, %v4542_v11  ;;  %v2233_v56 = vmul.f32 %v2159_v44, %v4801_v46  ;;  %v2486_v24 = vmul.f32 %v2412_v4, %v4803_v0  ;;  %v7695_v44 = vld [vmem:[#allocation86_spill] sm:$0xff]  ;;  %v7699_v36 = vld [vmem:[#allocation91_spill] sm:$0xff] }
  0x99   :  { %v2739_v39 = vmul.f32 %v2665_v53, %v4809_v52  ;;  %v2517_v9 = vadd.f32 %v2485_v55, %v2264_v32  ;;  %v1000_v7 = vadd.f32 %v968_v16, %v747_v57  ;;  %v5092_v58 = vmul.f32 %v2918_v13, %v4811_v59  ;;  %v7697_v53 = vld [vmem:[#allocation88_spill] sm:$0xff] }
  0x9a   :  { %4066 = vst [vmem:[#allocation7 + $0x18] sm:$0xff] %v4034_v26  ;;  %v5095_v61 = vmul.f32 %v3171_v15, %v4820_v47  ;;  %v5098_v42 = vmul.f32 %v3424_v34, %v4822_v51  ;;  %v105_v10 = vcombine.high %v7694_v50, %v7694_v50  ;;  %v326_v4 = vcombine.high %v7695_v44, %v7695_v44 }
  0x9b   :  { %v579_v26 = vcombine.high %v7696_v48, %v7696_v48  ;;  %v2770_v32 = vadd.f32 %v2738_v63, %v2517_v9  ;;  %v1253_v57 = vadd.f32 %v1221_v45, %v1000_v7  ;;  %v832_v13 = vcombine.high %v7697_v53, %v7697_v53 }
  0x9c   :  { %v1085_v15 = vcombine.high %v7698_v30, %v7698_v30  ;;  %v171_v34 = vrot.slane %v105_v10, %v4325_v8  ;;  %v392_v55 = vrot.slane %v326_v4, %v4325_v8  ;;  %v1338_v23 = vcombine.high %v7699_v36, %v7699_v36  ;;  %v7700_v10 = vld [vmem:[#allocation12_spill] sm:$0xff]  ;;  %v7704_v30 = vld [vmem:[#allocation95_spill] sm:$0xff] }
  0x9d   :  { %v5113_v33 = vrot.slane %v579_v26, %v4325_v8  ;;  %v3023_v31 = vadd.f32 %v2991_v35, %v2770_v32  ;;  %v1506_v16 = vadd.f32 %v1474_v25, %v1253_v57  ;;  %v898_v63 = vrot.slane %v832_v13, %v4325_v8  ;;  %v7701_v26 = vld [vmem:[#allocation17_spill] sm:$0xff]  ;;  %v7702_v57 = vld [vmem:[#allocation19_spill] sm:$0xff]  ;;  %v7703_v13 = vld [vmem:[#allocation94_spill] sm:$0xff] }
  0x9e   :  { %v5119_v45 = vrot.slane %v1085_v15, %v4325_v8  ;;  %v5122_v9 = vmul.f32 %v3677_v5, %v4865_v2  ;;  %v242_v7 = vmul.f32 %v171_v34, %v4331_v17  ;;  %v463_v50 = vmul.f32 %v392_v55, %v4333_v18  ;;  %v7705_v36 = vld [vmem:[#allocation96_spill] sm:$0xff] }
  0x9f   :  { %v716_v44 = vmul.f32 %v5113_v33, %v7700_v10  ;;  %v3276_v4 = vadd.f32 %v3244_v1, %v3023_v31  ;;  %v1759_v48 = vadd.f32 %v1727_v40, %v1506_v16  ;;  %v969_v35 = vmul.f32 %v898_v63, %v7701_v26  ;;  %v7706_v40 = vld [vmem:[#allocation97_spill] sm:$0xff] }
  0xa0   :  { %v1404_v25 = vrot.slane %v1338_v23, %v4325_v8  ;;  %v495_v32 = vadd.f32 %v463_v50, %v242_v7  ;;  %v1222_v53 = vmul.f32 %v5119_v45, %v7702_v57  ;;  %v1591_v5 = vcombine.high %v7703_v13, %v7703_v13  ;;  %v7707_v50 = vld [vmem:[#allocation98_spill] sm:$0xff] }
  0xa1   :  { %v1844_v17 = vcombine.high %v7704_v30, %v7704_v30  ;;  %v3529_v18 = vadd.f32 %v3497_v27, %v3276_v4  ;;  %v2012_v15 = vadd.f32 %v1980_v14, %v1759_v48  ;;  %v2097_v1 = vcombine.high %v7705_v36, %v7705_v36 }
  0xa2   :  { %v2350_v31 = vcombine.high %v7706_v40, %v7706_v40  ;;  %v748_v16 = vadd.f32 %v716_v44, %v495_v32  ;;  %v1657_v23 = vrot.slane %v1591_v5, %v4325_v8  ;;  %v2603_v10 = vcombine.high %v7707_v50, %v7707_v50 }
  0xa3   :  { %v1910_v7 = vrot.slane %v1844_v17, %v4325_v8  ;;  %v3782_v26 = vadd.f32 %v3750_v41, %v3529_v18  ;;  %v2265_v57 = vadd.f32 %v2233_v56, %v2012_v15  ;;  %v4004_v27 = vmul.f32 %v5069_v21, %v4867_v62  ;;  %v7708_v18 = vld [vmem:[#allocation99_spill] sm:$0xff]  ;;  %v7709_v15 = vld [vmem:[#allocation74_spill] sm:$0xff] }
  0xa4   :  { %v2163_v14 = vrot.slane %v2097_v1, %v4325_v8  ;;  %v1001_v4 = vadd.f32 %v969_v35, %v748_v16  ;;  %v1475_v48 = vmul.f32 %v1404_v25, %v4461_v28  ;;  %v1728_v13 = vmul.f32 %v1657_v23, %v7683_v20  ;;  %v7710_v1 = vld [vmem:[#allocation46_spill] sm:$0xff] }
  0xa5   :  { %v2416_v44 = vrot.slane %v2350_v31, %v4325_v8  ;;  %v4035_v32 = vadd.f32 %v4003_v37, %v3782_v26  ;;  %v2518_v5 = vadd.f32 %v2486_v24, %v2265_v57  ;;  %v1981_v30 = vmul.f32 %v1910_v7, %v7684_v12  ;;  %v7711_v37 = vld [vmem:[#allocation77_spill] sm:$0xff]  ;;  %v7712_v31 = vld [vmem:[#allocation100_spill] sm:$0xff]  ;;  %v7713_v26 = vld [vmem:[#allocation83_spill] sm:$0xff] }
  0xa6   :  { %v2669_v17 = vrot.slane %v2603_v10, %v4325_v8  ;;  %v1254_v41 = vadd.f32 %v1222_v53, %v1001_v4  ;;  %v2234_v56 = vmul.f32 %v2163_v14, %v7660_v43  ;;  %v2856_v21 = vcombine.high %v7708_v18, %v7708_v18 }
  0xa7   :  { %v3109_v35 = vcombine.high %v7709_v15, %v7709_v15  ;;  %4067 = vst [vmem:[#allocation7 + $0x20] sm:$0xff] %v4035_v32  ;;  %v2771_v36 = vadd.f32 %v2739_v39, %v2518_v5  ;;  %v3362_v40 = vcombine.high %v7710_v1, %v7710_v1  ;;  %v3615_v24 = vcombine.high %v7711_v37, %v7711_v37 }
  0xa8   :  { %v3868_v16 = vcombine.high %v7712_v31, %v7712_v31  ;;  %v1507_v53 = vadd.f32 %v1475_v48, %v1254_v41  ;;  %v2922_v50 = vrot.slane %v2856_v21, %v4325_v8  ;;  %v243_v57 = vmul.f32 %v171_v34, %v7713_v26  ;;  %v7714_v48 = vld [vmem:[#allocation11_spill] sm:$0xff]  ;;  %v7716_v34 = vld [vmem:[#allocation61_spill] sm:$0xff] }
  0xa9   :  { %v3175_v10 = vrot.slane %v3109_v35, %v4325_v8  ;;  %v3024_v4 = vadd.f32 %v5092_v58, %v2771_v36  ;;  %v3428_v39 = vrot.slane %v3362_v40, %v4325_v8  ;;  %v3681_v32 = vrot.slane %v3615_v24, %v4325_v8  ;;  %v7715_v35 = vld [vmem:[#allocation58_spill] sm:$0xff] }
  0xaa   :  { %v3934_v5 = vrot.slane %v3868_v16, %v4325_v8  ;;  %v1760_v18 = vadd.f32 %v1728_v13, %v1507_v53  ;;  %v2487_v15 = vmul.f32 %v2416_v44, %v7690_v60  ;;  %v2740_v1 = vmul.f32 %v2669_v17, %v7667_v29  ;;  %v7717_v58 = vld [vmem:[#allocation62_spill] sm:$0xff] }
  0xab   :  { %v464_v41 = vmul.f32 %v392_v55, %v7714_v48  ;;  %v3277_v21 = vadd.f32 %v5095_v61, %v3024_v4  ;;  %v2993_v37 = vmul.f32 %v2922_v50, %v7715_v35  ;;  %v3246_v31 = vmul.f32 %v3175_v10, %v7716_v34 }
  0xac   :  { %v3499_v36 = vmul.f32 %v3428_v39, %v7717_v58  ;;  %v2013_v40 = vadd.f32 %v1981_v30, %v1760_v18  ;;  %v717_v24 = vmul.f32 %v5113_v33, %v7691_v6  ;;  %v970_v13 = vmul.f32 %v898_v63, %v7692_v54 }
  0xad   :  { %v496_v26 = vadd.f32 %v464_v41, %v243_v57  ;;  %v3530_v16 = vadd.f32 %v5098_v42, %v3277_v21  ;;  %v3752_v53 = vmul.f32 %v3681_v32, %v7693_v19  ;;  %v5183_v55 = vmul.f32 %v3934_v5, %v4719_v38 }
  0xae   :  { %v1223_v61 = vmul.f32 %v5119_v45, %v4439_v3  ;;  %v2266_v4 = vadd.f32 %v2234_v56, %v2013_v40  ;;  %v1476_v30 = vmul.f32 %v1404_v25, %v4478_v49  ;;  %v1729_v57 = vmul.f32 %v1657_v23, %v7671_v22 }
  0xaf   :  { %v749_v48 = vadd.f32 %v717_v24, %v496_v26  ;;  %v3783_v6 = vadd.f32 %v5122_v9, %v3530_v16  ;;  %v1982_v54 = vmul.f32 %v1910_v7, %v4542_v11  ;;  %v2235_v42 = vmul.f32 %v2163_v14, %v4801_v46  ;;  %v7718_v9 = vld [vmem:[#allocation16_spill] sm:$0xff]  ;;  %v7719_v7 = vld [vmem:[#allocation14_spill] sm:$0xff]  ;;  %v7720_v14 = vld [vmem:[#allocation23_spill] sm:$0xff] }
  0xb0   :  { %v2488_v33 = vmul.f32 %v2416_v44, %v4803_v0  ;;  %v2519_v63 = vadd.f32 %v2487_v15, %v2266_v4  ;;  %v2741_v41 = vmul.f32 %v2669_v17, %v4809_v52  ;;  %v5195_v3 = vmul.f32 %v2922_v50, %v4811_v59  ;;  %v7722_v17 = vld [vmem:[#allocation27_spill] sm:$0xff]  ;;  %v7726_v26 = vld [vmem:[#allocation36_spill] sm:$0xff]  ;;  %v7728_v15 = vld [vmem:[#allocation42_spill] sm:$0xff] }
  0xb1   :  { %v1002_v18 = vadd.f32 %v970_v13, %v749_v48  ;;  %v4036_v45 = vadd.f32 %v4004_v27, %v3783_v6  ;;  %v5198_v49 = vmul.f32 %v3175_v10, %v4820_v47  ;;  %v5201_v22 = vmul.f32 %v3428_v39, %v4822_v51  ;;  %v7724_v50 = vld [vmem:[#allocation31_spill] sm:$0xff] }
  0xb2   :  { %v58_v11 = vcombine.high %v7718_v9, %v7718_v9  ;;  %v2772_v25 = vadd.f32 %v2740_v1, %v2519_v63  ;;  %v5207_v44 = vrot.slane %v7720_v14, %v7719_v7  ;;  %v5211_v56 = vrot.slane %v7722_v17, %v7719_v7  ;;  %v5260_v63 = vld [vmem:[#allocation2 + $0x10] sm:$0xff] }
  0xb3   :  { %v1255_v23 = vadd.f32 %v1223_v61, %v1002_v18  ;;  %4068 = vst [vmem:[#allocation7 + $0x28] sm:$0xff] %v4036_v45  ;;  %v5218_v10 = vrot.slane %v7724_v50, %v7719_v7  ;;  %v5222_v39 = vrot.slane %v7726_v26, %v7719_v7  ;;  %v5226_v1 = vrot.slane %v7728_v15, %v7719_v7  ;;  %v5264_v45 = vld [vmem:[#allocation2 + $0x20] sm:$0xff] }
  0xb4   :  { %7721 = vst [vmem:[#allocation57_spill] sm:$0xff] %v5207_v44  ;;  %7723 = vst [vmem:[#allocation35_spill] sm:$0xff] %v5211_v56  ;;  %v5214_v27 = vrot.slane %v58_v11, %v7719_v7  ;;  %v3025_v21 = vadd.f32 %v2993_v37, %v2772_v25  ;;  %v5230_v24 = vrot.slane %v5207_v44, %v4325_v8 }
  0xb5   :  { %7725 = vst [vmem:[#allocation21_spill] sm:$0xff] %v5218_v10  ;;  %7727 = vst [vmem:[#allocation22_spill] sm:$0xff] %v5222_v39  ;;  %v1508_v40 = vadd.f32 %v1476_v30, %v1255_v23  ;;  %v5234_v13 = vrot.slane %v5211_v56, %v4325_v8  ;;  %v5237_v16 = vmul.f32 %v3681_v32, %v4865_v2  ;;  %v7734_v23 = vld [vmem:[#allocation47_spill] sm:$0xff]  ;;  %v7739_v56 = vld [vmem:[#allocation52_spill] sm:$0xff] }
  0xb6   :  { %7729 = vst [vmem:[#allocation25_spill] sm:$0xff] %v5226_v1  ;;  %v5240_v61 = vmul.f32 %v3934_v5, %v4867_v62  ;;  %v5244_v4 = vrot.slane %v5214_v27, %v7719_v7  ;;  %v5248_v37 = vrot.slane %v5218_v10, %v4325_v8  ;;  %v3278_v48 = vadd.f32 %v3246_v31, %v3025_v21 }
  0xb7   :  { %v1761_v30 = vadd.f32 %v1729_v57, %v1508_v40  ;;  %v5252_v6 = vrot.slane %v5222_v39, %v4325_v8  ;;  %v5256_v32 = vrot.slane %v5226_v1, %v4325_v8  ;;  %7731 = vst [vmem:[#allocation34_spill] sm:$0xff] %v5260_v63  ;;  %v465_v18 = vmul.f32 %v5260_v63, %v5230_v24  ;;  %v5268_v57 = vld [vmem:[#allocation2 + $0x30] sm:$0xff]  ;;  %v7736_v40 = vld [vmem:[#allocation54_spill] sm:$0xff]  ;;  %v5280_v39 = vld [vmem:[#allocation2] sm:$0xff] }
  0xb8   :  { %7730 = vst [vmem:[#allocation29_spill] sm:$0xff] %v5244_v4  ;;  %v175_v5 = vrot.slane %v5244_v4, %v4325_v8  ;;  %7732 = vst [vmem:[#allocation40_spill] sm:$0xff] %v5264_v45  ;;  %v718_v31 = vmul.f32 %v5264_v45, %v5234_v13  ;;  %v971_v9 = vmul.f32 %v5268_v57, %v5248_v37  ;;  %v7740_v4 = vld [vmem:[#allocation56_spill] sm:$0xff] }
  0xb9   :  { %7733 = vst [vmem:[#allocation44_spill] sm:$0xff] %v5268_v57  ;;  %v3531_v11 = vadd.f32 %v3499_v36, %v3278_v48  ;;  %v2014_v25 = vadd.f32 %v1982_v54, %v1761_v30  ;;  %v5274_v21 = vrot.slane %v7734_v23, %v7719_v7  ;;  %v5278_v1 = vrot.slane %v7736_v40, %v7719_v7  ;;  %v7741_v36 = vld [vmem:[#allocation67_spill] sm:$0xff]  ;;  %v5297_v57 = vld [vmem:[#allocation2 + $0x40] sm:$0xff] }
  0xba   :  { %7738 = vst [vmem:[#allocation70_spill] sm:$0xff] %v5280_v39  ;;  %v244_v10 = vmul.f32 %v5280_v39, %v175_v5  ;;  %v2050_v44 = vcombine.high %v7739_v56, %v7739_v56  ;;  %v2303_v62 = vcombine.high %v7740_v4, %v7740_v4  ;;  %v2556_v54 = vcombine.high %v7741_v36, %v7741_v36 }
  0xbb   :  { %7735 = vst [vmem:[#allocation53_spill] sm:$0xff] %v5274_v21  ;;  %7737 = vst [vmem:[#allocation63_spill] sm:$0xff] %v5278_v1  ;;  %v3784_v48 = vadd.f32 %v3752_v53, %v3531_v11  ;;  %v2267_v30 = vadd.f32 %v2235_v42, %v2014_v25  ;;  %v5291_v2 = vrot.slane %v5274_v21, %v4325_v8 }
  0xbc   :  { %v5295_v40 = vrot.slane %v5278_v1, %v4325_v8  ;;  %v497_v23 = vadd.f32 %v465_v18, %v244_v10  ;;  %v1224_v56 = vmul.f32 %v5297_v57, %v5252_v6  ;;  %v1477_v4 = vmul.f32 %v5256_v32, %v4461_v28 }
  0xbd   :  { %v5304_v53 = vrot.slane %v2050_v44, %v7719_v7  ;;  %v4037_v42 = vadd.f32 %v5183_v55, %v3784_v48  ;;  %v2520_v11 = vadd.f32 %v2488_v33, %v2267_v30  ;;  %v5308_v25 = vrot.slane %v2303_v62, %v7719_v7  ;;  %v7743_v33 = vld [vmem:[#allocation68_spill] sm:$0xff]  ;;  %v7744_v44 = vld [vmem:[#allocation71_spill] sm:$0xff] }
  0xbe   :  { %v5311_v36 = vrot.slane %v2556_v54, %v7719_v7  ;;  %v750_v10 = vadd.f32 %v718_v31, %v497_v23  ;;  %v1730_v18 = vmul.f32 %v5291_v2, %v7683_v20  ;;  %v1983_v1 = vmul.f32 %v5295_v40, %v7684_v12  ;;  %v7745_v48 = vld [vmem:[#allocation72_spill] sm:$0xff] }
  0xbf   :  { %v5319_v28 = vrot.slane %v5304_v53, %v7719_v7  ;;  %4069 = vst [vmem:[#allocation7 + $0x30] sm:$0xff] %v4037_v42  ;;  %v2773_v55 = vadd.f32 %v2741_v41, %v2520_v11  ;;  %v2809_v62 = vcombine.high %v7743_v33, %v7743_v33  ;;  %v3062_v54 = vcombine.high %v7744_v44, %v7744_v44 }
  0xc0   :  { %v3315_v31 = vcombine.high %v7745_v48, %v7745_v48  ;;  %v1003_v23 = vadd.f32 %v971_v9, %v750_v10  ;;  %v5331_v12 = vrot.slane %v5308_v25, %v7719_v7  ;;  %v5335_v41 = vrot.slane %v5311_v36, %v7719_v7 }
  0xc1   :  { %7742 = vst [vmem:[#allocation75_spill] sm:$0xff] %v5319_v28  ;;  %v2167_v20 = vrot.slane %v5319_v28, %v4325_v8  ;;  %v3026_v30 = vadd.f32 %v5195_v3, %v2773_v55  ;;  %v5339_v42 = vrot.slane %v2809_v62, %v7719_v7  ;;  %v5342_v11 = vrot.slane %v3062_v54, %v7719_v7  ;;  %v7751_v54 = vld [vmem:[#allocation73_spill] sm:$0xff] }
  0xc2   :  { %7746 = vst [vmem:[#allocation33_spill] sm:$0xff] %v5331_v12  ;;  %7747 = vst [vmem:[#allocation41_spill] sm:$0xff] %v5335_v41  ;;  %v5345_v9 = vrot.slane %v3315_v31, %v7719_v7  ;;  %v1256_v10 = vadd.f32 %v1224_v56, %v1003_v23  ;;  %v2420_v44 = vrot.slane %v5331_v12, %v4325_v8  ;;  %v7752_v23 = vld [vmem:[#allocation82_spill] sm:$0xff] }
  0xc3   :  { %v2236_v33 = vmul.f32 %v2167_v20, %v7660_v43  ;;  %v2673_v48 = vrot.slane %v5335_v41, %v4325_v8  ;;  %v3279_v3 = vadd.f32 %v5198_v49, %v3026_v30  ;;  %v5355_v55 = vrot.slane %v5339_v42, %v7719_v7  ;;  %v7753_v49 = vld [vmem:[#allocation83_spill] sm:$0xff] }
  0xc4   :  { %7748 = vst [vmem:[#allocation76_spill] sm:$0xff] %v5345_v9  ;;  %v5359_v62 = vrot.slane %v5342_v11, %v7719_v7  ;;  %v5363_v56 = vrot.slane %v5345_v9, %v7719_v7  ;;  %v1509_v43 = vadd.f32 %v1477_v4, %v1256_v10  ;;  %v3568_v31 = vcombine.high %v7751_v54, %v7751_v54 }
  0xc5   :  { %v3821_v41 = vcombine.high %v7752_v23, %v7752_v23  ;;  %v245_v30 = vmul.f32 %v175_v5, %v7753_v49  ;;  %v3532_v12 = vadd.f32 %v5201_v22, %v3279_v3  ;;  %v2926_v28 = vrot.slane %v5355_v55, %v4325_v8  ;;  %v5383_v23 = vld [vmem:[#allocation2 + $0x18] sm:$0xff] }
  0xc6   :  { %7749 = vst [vmem:[#allocation79_spill] sm:$0xff] %v5359_v62  ;;  %7750 = vst [vmem:[#allocation80_spill] sm:$0xff] %v5363_v56  ;;  %v3179_v21 = vrot.slane %v5359_v62, %v4325_v8  ;;  %v3432_v9 = vrot.slane %v5363_v56, %v4325_v8  ;;  %v1762_v4 = vadd.f32 %v1730_v18, %v1509_v43 }
  0xc7   :  { %v5378_v10 = vrot.slane %v3568_v31, %v7719_v7  ;;  %v5381_v54 = vrot.slane %v3821_v41, %v7719_v7  ;;  %v466_v22 = vmul.f32 %v5383_v23, %v5230_v24  ;;  %v3785_v5 = vadd.f32 %v5237_v16, %v3532_v12  ;;  %v5401_v12 = vld [vmem:[#allocation2 + $0x28] sm:$0xff] }
  0xc8   :  { %v2489_v3 = vmul.f32 %v2420_v44, %v7690_v60  ;;  %v2742_v49 = vmul.f32 %v2673_v48, %v7667_v29  ;;  %v2995_v56 = vmul.f32 %v2926_v28, %v7715_v35  ;;  %v2015_v18 = vadd.f32 %v1983_v1, %v1762_v4  ;;  %v5405_v60 = vld [vmem:[#allocation2 + $0x38] sm:$0xff] }
  0xc9   :  { %v5393_v43 = vrot.slane %v5378_v10, %v7719_v7  ;;  %v5397_v41 = vrot.slane %v5381_v54, %v7719_v7  ;;  %v498_v31 = vadd.f32 %v466_v22, %v245_v30  ;;  %v4038_v24 = vadd.f32 %v5240_v61, %v3785_v5  ;;  %v5418_v22 = vld [vmem:[#allocation2 + $0x48] sm:$0xff]  ;;  %v5422_v5 = vld [vmem:[#allocation2 + $0x58] sm:$0xff] }
  0xca   :  { %v3248_v16 = vmul.f32 %v3179_v21, %v7716_v34  ;;  %v719_v29 = vmul.f32 %v5401_v12, %v5234_v13  ;;  %v972_v35 = vmul.f32 %v5405_v60, %v5248_v37  ;;  %v2268_v1 = vadd.f32 %v2236_v33, %v2015_v18  ;;  %v5426_v37 = vld [vmem:[#allocation2 + $0x68] sm:$0xff] }
  0xcb   :  { %7754 = vst [vmem:[#allocation81_spill] sm:$0xff] %v5393_v43  ;;  %7755 = vst [vmem:[#allocation85_spill] sm:$0xff] %v5397_v41  ;;  %v3501_v4 = vmul.f32 %v3432_v9, %v7717_v58  ;;  %v5412_v30 = vrot.slane %v5393_v43, %v4325_v8  ;;  %v5416_v34 = vrot.slane %v5397_v41, %v4325_v8 }
  0xcc   :  { %4070 = vst [vmem:[#allocation7 + $0x38] sm:$0xff] %v4038_v24  ;;  %v751_v61 = vadd.f32 %v719_v29, %v498_v31  ;;  %v1225_v13 = vmul.f32 %v5418_v22, %v5252_v6  ;;  %v1478_v58 = vmul.f32 %v5422_v5, %v5256_v32  ;;  %v1731_v33 = vmul.f32 %v5426_v37, %v5291_v2  ;;  %v5432_v31 = vld [vmem:[#allocation2 + $0x78] sm:$0xff] }
  0xcd   :  { %v2521_v18 = vadd.f32 %v2489_v3, %v2268_v1  ;;  %v3754_v24 = vmul.f32 %v5412_v30, %v7693_v19  ;;  %v1984_v29 = vmul.f32 %v5432_v31, %v5295_v40  ;;  %v2237_v6 = vmul.f32 %v2167_v20, %v4801_v46 }
  0xce   :  { %v4007_v41 = vmul.f32 %v5416_v34, %v4719_v38  ;;  %v1004_v32 = vadd.f32 %v972_v35, %v751_v61  ;;  %v2490_v43 = vmul.f32 %v2420_v44, %v4803_v0  ;;  %v2743_v62 = vmul.f32 %v2673_v48, %v4809_v52 }
  0xcf   :  { %v2774_v2 = vadd.f32 %v2742_v49, %v2521_v18  ;;  %v2996_v3 = vmul.f32 %v2926_v28, %v4811_v59  ;;  %v5443_v19 = vmul.f32 %v3179_v21, %v4820_v47  ;;  %v5446_v1 = vmul.f32 %v3432_v9, %v4822_v51  ;;  %v7762_v18 = vld [vmem:[#allocation44_spill] sm:$0xff] }
  0xd0   :  { %v1257_v40 = vadd.f32 %v1225_v13, %v1004_v32  ;;  %v74_v46 = vcombine.high %v5214_v27, %v5214_v27  ;;  %v295_v38 = vcombine.high %v7720_v14, %v7720_v14  ;;  %v548_v0 = vcombine.high %v7722_v17, %v7722_v17 }
  0xd1   :  { %v3027_v52 = vadd.f32 %v2995_v56, %v2774_v2  ;;  %v801_v59 = vcombine.high %v7724_v50, %v7724_v50  ;;  %v1054_v47 = vcombine.high %v7726_v26, %v7726_v26  ;;  %v1307_v51 = vcombine.high %v7728_v15, %v7728_v15 }
  0xd2   :  { %v1510_v21 = vadd.f32 %v1478_v58, %v1257_v40  ;;  %v5461_v28 = vrot.slane %v74_v46, %v7719_v7  ;;  %v5464_v27 = vrot.slane %v295_v38, %v7719_v7  ;;  %v5467_v14 = vrot.slane %v548_v0, %v7719_v7  ;;  %v5509_v40 = vld [vmem:[#allocation2 + $0x50] sm:$0xff] }
  0xd3   :  { %v3280_v17 = vadd.f32 %v3248_v16, %v3027_v52  ;;  %v5470_v20 = vrot.slane %v801_v59, %v7719_v7  ;;  %v5473_v50 = vrot.slane %v1054_v47, %v7719_v7  ;;  %v5476_v26 = vrot.slane %v1307_v51, %v7719_v7  ;;  %v7763_v0 = vld [vmem:[#allocation47_spill] sm:$0xff]  ;;  %v7764_v59 = vld [vmem:[#allocation54_spill] sm:$0xff] }
  0xd4   :  { %7756 = vst [vmem:[#allocation49_spill] sm:$0xff] %v5461_v28  ;;  %7757 = vst [vmem:[#allocation15_spill] sm:$0xff] %v5464_v27  ;;  %v1763_v15 = vadd.f32 %v1731_v33, %v1510_v21  ;;  %v179_v9 = vrot.slane %v5461_v28, %v4325_v8  ;;  %v5482_v44 = vrot.slane %v5464_v27, %v4325_v8  ;;  %v7795_v27 = vld [vmem:[#allocation25_spill] sm:$0xff] }
  0xd5   :  { %7758 = vst [vmem:[#allocation18_spill] sm:$0xff] %v5467_v14  ;;  %7759 = vst [vmem:[#allocation66_spill] sm:$0xff] %v5470_v20  ;;  %v5486_v48 = vrot.slane %v5467_v14, %v4325_v8  ;;  %v3533_v56 = vadd.f32 %v3501_v4, %v3280_v17  ;;  %v5490_v49 = vrot.slane %v5470_v20, %v4325_v8  ;;  %v7794_v14 = vld [vmem:[#allocation22_spill] sm:$0xff] }
  0xd6   :  { %7760 = vst [vmem:[#allocation89_spill] sm:$0xff] %v5473_v50  ;;  %7761 = vst [vmem:[#allocation86_spill] sm:$0xff] %v5476_v26  ;;  %v5494_v16 = vrot.slane %v5473_v50, %v4325_v8  ;;  %v5498_v35 = vrot.slane %v5476_v26, %v4325_v8  ;;  %v2016_v61 = vadd.f32 %v1984_v29, %v1763_v15  ;;  %v7791_v26 = vld [vmem:[#allocation57_spill] sm:$0xff]  ;;  %v7792_v50 = vld [vmem:[#allocation35_spill] sm:$0xff] }
  0xd7   :  { %v246_v13 = vmul.f32 %v5280_v39, %v179_v9  ;;  %v467_v58 = vmul.f32 %v5260_v63, %v5482_v44  ;;  %v720_v4 = vmul.f32 %v5264_v45, %v5486_v48  ;;  %v3786_v33 = vadd.f32 %v3754_v24, %v3533_v56 }
  0xd8   :  { %v973_v32 = vmul.f32 %v7762_v18, %v5490_v49  ;;  %v1226_v2 = vmul.f32 %v5297_v57, %v5494_v16  ;;  %v1479_v29 = vmul.f32 %v5509_v40, %v5498_v35  ;;  %v2269_v46 = vadd.f32 %v2237_v6, %v2016_v61 }
  0xd9   :  { %v499_v38 = vadd.f32 %v467_v58, %v246_v13  ;;  %v1560_v52 = vcombine.high %v7763_v0, %v7763_v0  ;;  %v1813_v47 = vcombine.high %v7764_v59, %v7764_v59  ;;  %v4039_v24 = vadd.f32 %v4007_v41, %v3786_v33  ;;  %v7770_v33 = vld [vmem:[#allocation92_spill] sm:$0xff]  ;;  %v5560_v59 = vld [vmem:[#allocation2 + $0x60] sm:$0xff] }
  0xda   :  { %v2066_v51 = vcombine.high %v5304_v53, %v5304_v53  ;;  %v2319_v21 = vcombine.high %v5308_v25, %v5308_v25  ;;  %v2572_v17 = vcombine.high %v5311_v36, %v5311_v36  ;;  %v2522_v15 = vadd.f32 %v2490_v43, %v2269_v46  ;;  %7772 = vst [vmem:[#allocation17_spill] sm:$0xff] %v5560_v59 }
  0xdb   :  { %v752_v56 = vadd.f32 %v720_v4, %v499_v38  ;;  %v5524_v6 = vrot.slane %v1560_v52, %v7719_v7  ;;  %v5527_v61 = vrot.slane %v1813_v47, %v7719_v7  ;;  %4071 = vst [vmem:[#allocation7 + $0x40] sm:$0xff] %v4039_v24  ;;  %v2825_v36 = vcombine.high %v5339_v42, %v5339_v42  ;;  %v7771_v38 = vld [vmem:[#allocation93_spill] sm:$0xff]  ;;  %v5566_v24 = vld [vmem:[#allocation2 + $0x70] sm:$0xff] }
  0xdc   :  { %v5530_v41 = vrot.slane %v2066_v51, %v7719_v7  ;;  %v5533_v53 = vrot.slane %v2319_v21, %v7719_v7  ;;  %v5536_v25 = vrot.slane %v2572_v17, %v7719_v7  ;;  %v2775_v43 = vadd.f32 %v2743_v62, %v2522_v15  ;;  %v5570_v51 = vld [vmem:[#allocation2 + $0x80] sm:$0xff] }
  0xdd   :  { %7765 = vst [vmem:[#allocation87_spill] sm:$0xff] %v5524_v6  ;;  %7766 = vst [vmem:[#allocation88_spill] sm:$0xff] %v5527_v61  ;;  %v1005_v13 = vadd.f32 %v973_v32, %v752_v56  ;;  %v5542_v58 = vrot.slane %v5524_v6, %v4325_v8  ;;  %v5546_v4 = vrot.slane %v5527_v61, %v4325_v8 }
  0xde   :  { %7767 = vst [vmem:[#allocation90_spill] sm:$0xff] %v5530_v41  ;;  %7768 = vst [vmem:[#allocation91_spill] sm:$0xff] %v5533_v53  ;;  %v3755_v46 = vmul.f32 %v5412_v30, %v7770_v33  ;;  %v4008_v0 = vmul.f32 %v5416_v34, %v7771_v38  ;;  %v5554_v52 = vrot.slane %v5530_v41, %v4325_v8 }
  0xdf   :  { %7769 = vst [vmem:[#allocation12_spill] sm:$0xff] %v5536_v25  ;;  %v5558_v42 = vrot.slane %v5533_v53, %v4325_v8  ;;  %v3028_v62 = vadd.f32 %v2996_v3, %v2775_v43  ;;  %v1258_v32 = vadd.f32 %v1226_v2, %v1005_v13  ;;  %v1732_v47 = vmul.f32 %v5560_v59, %v5542_v58  ;;  %v5574_v3 = vld [vmem:[#allocation2 + $0x90] sm:$0xff]  ;;  %v7776_v13 = vld [vmem:[#allocation76_spill] sm:$0xff] }
  0xe0   :  { %v2677_v30 = vrot.slane %v5536_v25, %v4325_v8  ;;  %v1985_v34 = vmul.f32 %v5566_v24, %v5546_v4  ;;  %7773 = vst [vmem:[#allocation19_spill] sm:$0xff] %v5570_v51  ;;  %v2238_v21 = vmul.f32 %v5570_v51, %v5554_v52  ;;  %7774 = vst [vmem:[#allocation94_spill] sm:$0xff] %v5574_v3 }
  0xe1   :  { %v2491_v2 = vmul.f32 %v5574_v3, %v5558_v42  ;;  %v5579_v17 = vrot.slane %v2825_v36, %v7719_v7  ;;  %v3281_v15 = vadd.f32 %v5443_v19, %v3028_v62  ;;  %v1511_v56 = vadd.f32 %v1479_v29, %v1258_v32  ;;  %v5592_v36 = vld [vmem:[#allocation2 + $0x8] sm:$0xff] }
  0xe2   :  { %v3078_v43 = vcombine.high %v5342_v11, %v5342_v11  ;;  %v3331_v33 = vcombine.high %v7776_v13, %v7776_v13  ;;  %v3584_v25 = vcombine.high %v5378_v10, %v5378_v10  ;;  %v3837_v53 = vcombine.high %v5381_v54, %v5381_v54  ;;  %7777 = vst [vmem:[#allocation96_spill] sm:$0xff] %v5592_v36 }
  0xe3   :  { %7775 = vst [vmem:[#allocation95_spill] sm:$0xff] %v5579_v17  ;;  %v2930_v38 = vrot.slane %v5579_v17, %v4325_v8  ;;  %v247_v19 = vmul.f32 %v5592_v36, %v179_v9  ;;  %v3534_v29 = vadd.f32 %v5446_v1, %v3281_v15  ;;  %v1764_v62 = vadd.f32 %v1732_v47, %v1511_v56  ;;  %v5657_v17 = vld [vmem:[#allocation2 + $0x98] sm:$0xff] }
  0xe4   :  { %v5597_v11 = vrot.slane %v3078_v43, %v7719_v7  ;;  %v5600_v32 = vrot.slane %v3331_v33, %v7719_v7  ;;  %v5603_v13 = vrot.slane %v3584_v25, %v7719_v7  ;;  %v5606_v10 = vrot.slane %v3837_v53, %v7719_v7  ;;  %v5629_v7 = vld [vmem:[#allocation2 + $0xb0] sm:$0xff] }
  0xe5   :  { %v468_v54 = vmul.f32 %v5383_v23, %v5482_v44  ;;  %v721_v9 = vmul.f32 %v5401_v12, %v5486_v48  ;;  %v3787_v1 = vadd.f32 %v3755_v46, %v3534_v29  ;;  %v2017_v47 = vadd.f32 %v1985_v34, %v1764_v62  ;;  %v5626_v29 = vld [vmem:[#allocation2 + $0xa0] sm:$0xff]  ;;  %v5643_v48 = vld [vmem:[#allocation2 + $0xf0] sm:$0xff] }
  0xe6   :  { %7778 = vst [vmem:[#allocation97_spill] sm:$0xff] %v5597_v11  ;;  %7779 = vst [vmem:[#allocation98_spill] sm:$0xff] %v5600_v32  ;;  %v3183_v15 = vrot.slane %v5597_v11, %v4325_v8  ;;  %v3436_v56 = vrot.slane %v5600_v32, %v4325_v8  ;;  %v3689_v25 = vrot.slane %v5603_v13, %v4325_v8  ;;  %v5632_v32 = vld [vmem:[#allocation2 + $0xc0] sm:$0xff] }
  0xe7   :  { %7780 = vst [vmem:[#allocation99_spill] sm:$0xff] %v5603_v13  ;;  %7781 = vst [vmem:[#allocation74_spill] sm:$0xff] %v5606_v10  ;;  %v5620_v53 = vrot.slane %v5606_v10, %v4325_v8  ;;  %v500_v43 = vadd.f32 %v468_v54, %v247_v19  ;;  %v974_v44 = vmul.f32 %v5405_v60, %v5490_v49 }
  0xe8   :  { %v4040_v34 = vadd.f32 %v4008_v0, %v3787_v1  ;;  %v2270_v33 = vadd.f32 %v2238_v21, %v2017_v47  ;;  %7783 = vst [vmem:[#allocation46_spill] sm:$0xff] %v5626_v29  ;;  %v2744_v62 = vmul.f32 %v5626_v29, %v2677_v30  ;;  %v2997_v13 = vmul.f32 %v5629_v7, %v2930_v38  ;;  %v5637_v0 = vld [vmem:[#allocation2 + $0xd0] sm:$0xff]  ;;  %v5640_v1 = vld [vmem:[#allocation2 + $0xe0] sm:$0xff] }
  0xe9   :  { %7784 = vst [vmem:[#allocation77_spill] sm:$0xff] %v5632_v32  ;;  %v3250_v19 = vmul.f32 %v5632_v32, %v3183_v15  ;;  %v753_v54 = vadd.f32 %v721_v9, %v500_v43  ;;  %v1227_v49 = vmul.f32 %v5418_v22, %v5494_v16  ;;  %v3503_v21 = vmul.f32 %v5637_v0, %v3436_v56 }
  0xea   :  { %4072 = vst [vmem:[#allocation7 + $0x48] sm:$0xff] %v4040_v34  ;;  %v2523_v46 = vadd.f32 %v2491_v2, %v2270_v33  ;;  %7785 = vst [vmem:[#allocation100_spill] sm:$0xff] %v5640_v1  ;;  %v3756_v47 = vmul.f32 %v5640_v1, %v3689_v25  ;;  %v4009_v10 = vmul.f32 %v5643_v48, %v5620_v53  ;;  %v5653_v34 = vld [vmem:[#allocation2 + $0x88] sm:$0xff] }
  0xeb   :  { %7786 = vst [vmem:[#allocation11_spill] sm:$0xff] %v5643_v48  ;;  %v1006_v11 = vadd.f32 %v974_v44, %v753_v54  ;;  %v1480_v9 = vmul.f32 %v5422_v5, %v5498_v35  ;;  %v1733_v16 = vmul.f32 %v5426_v37, %v5542_v58  ;;  %v1986_v2 = vmul.f32 %v5432_v31, %v5546_v4  ;;  %v5661_v54 = vld [vmem:[#allocation2 + $0xa8] sm:$0xff]  ;;  %v5664_v58 = vld [vmem:[#allocation2 + $0xb8] sm:$0xff] }
  0xec   :  { %v2776_v43 = vadd.f32 %v2744_v62, %v2523_v46  ;;  %7787 = vst [vmem:[#allocation58_spill] sm:$0xff] %v5653_v34  ;;  %v2239_v33 = vmul.f32 %v5653_v34, %v5554_v52  ;;  %v2492_v44 = vmul.f32 %v5657_v17, %v5558_v42  ;;  %v2745_v35 = vmul.f32 %v5661_v54, %v2677_v30  ;;  %v5667_v46 = vld [vmem:[#allocation2 + $0xc8] sm:$0xff]  ;;  %v7790_v52 = vld [vmem:[#allocation29_spill] sm:$0xff] }
  0xed   :  { %v1259_v41 = vadd.f32 %v1227_v49, %v1006_v11  ;;  %7788 = vst [vmem:[#allocation61_spill] sm:$0xff] %v5664_v58  ;;  %v2998_v4 = vmul.f32 %v5664_v58, %v2930_v38  ;;  %7789 = vst [vmem:[#allocation62_spill] sm:$0xff] %v5667_v46  ;;  %v5670_v62 = vmul.f32 %v5667_v46, %v3183_v15  ;;  %v7793_v11 = vld [vmem:[#allocation21_spill] sm:$0xff]  ;;  %v5690_v46 = vld [vmem:[#allocation2 + $0xd8] sm:$0xff] }
  0xee   :  { %v104_v61 = vcombine.high %v7790_v52, %v7790_v52  ;;  %v3029_v6 = vadd.f32 %v2997_v13, %v2776_v43  ;;  %v325_v42 = vcombine.high %v7791_v26, %v7791_v26  ;;  %v578_v30 = vcombine.high %v7792_v50, %v7792_v50  ;;  %7796 = vst [vmem:[#allocation16_spill] sm:$0xff] %v5690_v46 }
  0xef   :  { %v831_v49 = vcombine.high %v7793_v11, %v7793_v11  ;;  %v1512_v20 = vadd.f32 %v1480_v9, %v1259_v41  ;;  %v1084_v15 = vcombine.high %v7794_v14, %v7794_v14  ;;  %v1337_v28 = vcombine.high %v7795_v27, %v7795_v27 }
  0xf0   :  { %v183_v38 = vrot.slane %v104_v61, %v4325_v8  ;;  %v3282_v52 = vadd.f32 %v3250_v19, %v3029_v6  ;;  %v404_v13 = vrot.slane %v325_v42, %v4325_v8  ;;  %v657_v26 = vrot.slane %v578_v30, %v4325_v8  ;;  %v5693_v61 = vld [vmem:[#allocation2 + $0xe8] sm:$0xff] }
  0xf1   :  { %v5688_v43 = vrot.slane %v831_v49, %v4325_v8  ;;  %v1765_v50 = vadd.f32 %v1733_v16, %v1512_v20  ;;  %v3504_v41 = vmul.f32 %v5690_v46, %v3436_v56  ;;  %7797 = vst [vmem:[#allocation23_spill] sm:$0xff] %v5693_v61  ;;  %v5696_v14 = vmul.f32 %v5693_v61, %v3689_v25  ;;  %v7798_v16 = vld [vmem:[#allocation53_spill] sm:$0xff]  ;;  %v7799_v61 = vld [vmem:[#allocation63_spill] sm:$0xff] }
  0xf2   :  { %v248_v27 = vmul.f32 %v5280_v39, %v183_v38  ;;  %v3535_v6 = vadd.f32 %v3503_v21, %v3282_v52  ;;  %v469_v19 = vmul.f32 %v5260_v63, %v404_v13  ;;  %v722_v9 = vmul.f32 %v5264_v45, %v657_v26  ;;  %v7800_v52 = vld [vmem:[#allocation75_spill] sm:$0xff] }
  0xf3   :  { %v1163_v42 = vrot.slane %v1084_v15, %v4325_v8  ;;  %v2018_v30 = vadd.f32 %v1986_v2, %v1765_v50  ;;  %v975_v20 = vmul.f32 %v7762_v18, %v5688_v43  ;;  %v1416_v56 = vrot.slane %v1337_v28, %v4325_v8  ;;  %v7801_v2 = vld [vmem:[#allocation33_spill] sm:$0xff] }
  0xf4   :  { %v1590_v11 = vcombine.high %v7798_v16, %v7798_v16  ;;  %v3788_v25 = vadd.f32 %v3756_v47, %v3535_v6  ;;  %v501_v49 = vadd.f32 %v469_v19, %v248_v27  ;;  %v1843_v21 = vcombine.high %v7799_v61, %v7799_v61  ;;  %v7802_v18 = vld [vmem:[#allocation41_spill] sm:$0xff]  ;;  %v5718_v61 = vld [vmem:[#allocation2 + $0xf8] sm:$0xff] }
  0xf5   :  { %v2096_v63 = vcombine.high %v7800_v52, %v7800_v52  ;;  %v2271_v45 = vadd.f32 %v2239_v33, %v2018_v30  ;;  %v2349_v50 = vcombine.high %v7801_v2, %v7801_v2  ;;  %v2602_v28 = vcombine.high %v7802_v18, %v7802_v18 }
  0xf6   :  { %v1669_v15 = vrot.slane %v1590_v11, %v4325_v8  ;;  %v4041_v39 = vadd.f32 %v4009_v10, %v3788_v25  ;;  %v754_v46 = vadd.f32 %v722_v9, %v501_v49  ;;  %v1228_v47 = vmul.f32 %v5297_v57, %v1163_v42  ;;  %v7803_v25 = vld [vmem:[#allocation79_spill] sm:$0xff] }
  0xf7   :  { %v1922_v27 = vrot.slane %v1843_v21, %v4325_v8  ;;  %v2524_v6 = vadd.f32 %v2492_v44, %v2271_v45  ;;  %v4010_v33 = vmul.f32 %v5718_v61, %v5620_v53  ;;  %v1481_v19 = vmul.f32 %v5509_v40, %v1416_v56 }
  0xf8   :  { %v2175_v30 = vrot.slane %v2096_v63, %v4325_v8  ;;  %4073 = vst [vmem:[#allocation7 + $0x50] sm:$0xff] %v4041_v39  ;;  %v1007_v16 = vadd.f32 %v975_v20, %v754_v46  ;;  %v1734_v18 = vmul.f32 %v5560_v59, %v1669_v15  ;;  %v2428_v10 = vrot.slane %v2349_v50, %v4325_v8  ;;  %v7804_v39 = vld [vmem:[#allocation80_spill] sm:$0xff]  ;;  %v7805_v20 = vld [vmem:[#allocation81_spill] sm:$0xff] }
  0xf9   :  { %v2855_v9 = vcombine.high %v5355_v55, %v5355_v55  ;;  %v2777_v11 = vadd.f32 %v2745_v35, %v2524_v6  ;;  %v1987_v45 = vmul.f32 %v5566_v24, %v1922_v27  ;;  %v2681_v44 = vrot.slane %v2602_v28, %v4325_v8  ;;  %v7806_v35 = vld [vmem:[#allocation85_spill] sm:$0xff] }
  0xfa   :  { %v3108_v53 = vcombine.high %v7803_v25, %v7803_v25  ;;  %v1260_v49 = vadd.f32 %v1228_v47, %v1007_v16  ;;  %v3361_v46 = vcombine.high %v7804_v39, %v7804_v39  ;;  %v3614_v21 = vcombine.high %v7805_v20, %v7805_v20 }
  0xfb   :  { %v2934_v63 = vrot.slane %v2855_v9, %v4325_v8  ;;  %v3030_v52 = vadd.f32 %v2998_v4, %v2777_v11  ;;  %v3867_v2 = vcombine.high %v7806_v35, %v7806_v35  ;;  %v249_v50 = vmul.f32 %v5592_v36, %v183_v38 }
  0xfc   :  { %v3187_v55 = vrot.slane %v3108_v53, %v4325_v8  ;;  %v1513_v28 = vadd.f32 %v1481_v19, %v1260_v49  ;;  %v2240_v6 = vmul.f32 %v5570_v51, %v2175_v30  ;;  %v3440_v47 = vrot.slane %v3361_v46, %v4325_v8 }
  0xfd   :  { %v3693_v16 = vrot.slane %v3614_v21, %v4325_v8  ;;  %v3283_v9 = vadd.f32 %v5670_v62, %v3030_v52  ;;  %v2493_v25 = vmul.f32 %v5574_v3, %v2428_v10  ;;  %v5747_v4 = vrot.slane %v3867_v2, %v4325_v8 }
  0xfe   :  { %v470_v11 = vmul.f32 %v5383_v23, %v404_v13  ;;  %v1766_v53 = vadd.f32 %v1734_v18, %v1513_v28  ;;  %v2746_v39 = vmul.f32 %v5626_v29, %v2681_v44  ;;  %v2999_v38 = vmul.f32 %v5629_v7, %v2934_v63 }
  0xff   :  { %v723_v19 = vmul.f32 %v5401_v12, %v657_v26  ;;  %v3536_v49 = vadd.f32 %v3504_v41, %v3283_v9  ;;  %v3252_v46 = vmul.f32 %v5632_v32, %v3187_v55  ;;  %v976_v62 = vmul.f32 %v5405_v60, %v5688_v43 }
 0x100   :  { %v502_v20 = vadd.f32 %v470_v11, %v249_v50  ;;  %v2019_v21 = vadd.f32 %v1987_v45, %v1766_v53  ;;  %v3505_v52 = vmul.f32 %v5637_v0, %v3440_v47  ;;  %v3758_v35 = vmul.f32 %v5640_v1, %v3693_v16 }
 0x101   :  { %v4011_v13 = vmul.f32 %v5643_v48, %v5747_v4  ;;  %v3789_v18 = vadd.f32 %v5696_v14, %v3536_v49  ;;  %v1229_v26 = vmul.f32 %v5418_v22, %v1163_v42  ;;  %v1482_v41 = vmul.f32 %v5422_v5, %v1416_v56  ;;  %v7808_v56 = vld [vmem:[#allocation49_spill] sm:$0xff] }
 0x102   :  { %v755_v2 = vadd.f32 %v723_v19, %v502_v20  ;;  %v2272_v28 = vadd.f32 %v2240_v6, %v2019_v21  ;;  %v1735_v50 = vmul.f32 %v5426_v37, %v1669_v15  ;;  %v1988_v43 = vmul.f32 %v5432_v31, %v1922_v27  ;;  %v7807_v19 = vld [vmem:[#allocation62_spill] sm:$0xff]  ;;  %v7809_v27 = vld [vmem:[#allocation15_spill] sm:$0xff]  ;;  %v7812_v20 = vld [vmem:[#allocation89_spill] sm:$0xff] }
 0x103   :  { %v2241_v45 = vmul.f32 %v5653_v34, %v2175_v30  ;;  %v4042_v9 = vadd.f32 %v4010_v33, %v3789_v18  ;;  %v2494_v53 = vmul.f32 %v5657_v17, %v2428_v10  ;;  %v2747_v48 = vmul.f32 %v5661_v54, %v2681_v44  ;;  %v7810_v33 = vld [vmem:[#allocation18_spill] sm:$0xff] }
 0x104   :  { %v1008_v11 = vadd.f32 %v976_v62, %v755_v2  ;;  %v2525_v1 = vadd.f32 %v2493_v25, %v2272_v28  ;;  %v3000_v14 = vmul.f32 %v5664_v58, %v2934_v63  ;;  %v5770_v42 = vmul.f32 %v7807_v19, %v3187_v55  ;;  %v7811_v10 = vld [vmem:[#allocation66_spill] sm:$0xff] }
 0x105   :  { %v106_v6 = vcombine.high %v7808_v56, %v7808_v56  ;;  %4074 = vst [vmem:[#allocation7 + $0x58] sm:$0xff] %v4042_v9  ;;  %v327_v30 = vcombine.high %v7809_v27, %v7809_v27  ;;  %v580_v49 = vcombine.high %v7810_v33, %v7810_v33  ;;  %v833_v44 = vcombine.high %v7811_v10, %v7811_v10  ;;  %v7813_v62 = vld [vmem:[#allocation86_spill] sm:$0xff] }
 0x106   :  { %v1261_v15 = vadd.f32 %v1229_v26, %v1008_v11  ;;  %v2778_v25 = vadd.f32 %v2746_v39, %v2525_v1  ;;  %v1086_v55 = vcombine.high %v7812_v20, %v7812_v20  ;;  %v1339_v21 = vcombine.high %v7813_v62, %v7813_v62  ;;  %v7814_v11 = vld [vmem:[#allocation16_spill] sm:$0xff]  ;;  %v7815_v1 = vld [vmem:[#allocation23_spill] sm:$0xff]  ;;  %v7817_v10 = vld [vmem:[#allocation34_spill] sm:$0xff] }
 0x107   :  { %v187_v63 = vrot.slane %v106_v6, %v4325_v8  ;;  %v408_v2 = vrot.slane %v327_v30, %v4325_v8  ;;  %v661_v26 = vrot.slane %v580_v49, %v4325_v8  ;;  %v5788_v28 = vrot.slane %v833_v44, %v4325_v8  ;;  %v7816_v6 = vld [vmem:[#allocation70_spill] sm:$0xff]  ;;  %v7818_v62 = vld [vmem:[#allocation40_spill] sm:$0xff] }
 0x108   :  { %v1514_v18 = vadd.f32 %v1482_v41, %v1261_v15  ;;  %v3031_v9 = vadd.f32 %v2999_v38, %v2778_v25  ;;  %v3506_v56 = vmul.f32 %v7814_v11, %v3440_v47  ;;  %v5792_v39 = vmul.f32 %v7815_v1, %v3693_v16  ;;  %v7819_v49 = vld [vmem:[#allocation44_spill] sm:$0xff]  ;;  %v7820_v25 = vld [vmem:[#allocation87_spill] sm:$0xff] }
 0x109   :  { %v250_v27 = vmul.f32 %v7816_v6, %v187_v63  ;;  %v471_v20 = vmul.f32 %v7817_v10, %v408_v2  ;;  %v724_v41 = vmul.f32 %v7818_v62, %v661_v26  ;;  %v1167_v15 = vrot.slane %v1086_v55, %v4325_v8  ;;  %v7821_v11 = vld [vmem:[#allocation88_spill] sm:$0xff] }
 0x10a   :  { %v1767_v33 = vadd.f32 %v1735_v50, %v1514_v18  ;;  %v3284_v30 = vadd.f32 %v3252_v46, %v3031_v9  ;;  %v977_v44 = vmul.f32 %v7819_v49, %v5788_v28  ;;  %v1420_v38 = vrot.slane %v1339_v21, %v4325_v8  ;;  %v7822_v18 = vld [vmem:[#allocation90_spill] sm:$0xff]  ;;  %v7823_v46 = vld [vmem:[#allocation91_spill] sm:$0xff]  ;;  %v7824_v49 = vld [vmem:[#allocation12_spill] sm:$0xff] }
 0x10b   :  { %v1592_v47 = vcombine.high %v7820_v25, %v7820_v25  ;;  %v503_v1 = vadd.f32 %v471_v20, %v250_v27  ;;  %v1845_v50 = vcombine.high %v7821_v11, %v7821_v11  ;;  %v2098_v6 = vcombine.high %v7822_v18, %v7822_v18 }
 0x10c   :  { %v2020_v16 = vadd.f32 %v1988_v43, %v1767_v33  ;;  %v3537_v62 = vadd.f32 %v3505_v52, %v3284_v30  ;;  %v2351_v9 = vcombine.high %v7823_v46, %v7823_v46  ;;  %v2604_v21 = vcombine.high %v7824_v49, %v7824_v49 }
 0x10d   :  { %v1673_v55 = vrot.slane %v1592_v47, %v4325_v8  ;;  %v756_v19 = vadd.f32 %v724_v41, %v503_v1  ;;  %v1230_v43 = vmul.f32 %v5297_v57, %v1167_v15  ;;  %v1926_v27 = vrot.slane %v1845_v50, %v4325_v8  ;;  %v7826_v50 = vld [vmem:[#allocation97_spill] sm:$0xff] }
 0x10e   :  { %v2273_v10 = vadd.f32 %v2241_v45, %v2020_v16  ;;  %v3790_v33 = vadd.f32 %v3758_v35, %v3537_v62  ;;  %v4012_v11 = vmul.f32 %v5718_v61, %v5747_v4  ;;  %v1483_v52 = vmul.f32 %v5509_v40, %v1420_v38  ;;  %v7825_v16 = vld [vmem:[#allocation95_spill] sm:$0xff] }
 0x10f   :  { %v2179_v20 = vrot.slane %v2098_v6, %v4325_v8  ;;  %v1009_v25 = vadd.f32 %v977_v44, %v756_v19  ;;  %v1736_v47 = vmul.f32 %v5560_v59, %v1673_v55  ;;  %v2432_v49 = vrot.slane %v2351_v9, %v4325_v8  ;;  %v7827_v6 = vld [vmem:[#allocation98_spill] sm:$0xff] }
 0x110   :  { %v2526_v30 = vadd.f32 %v2494_v53, %v2273_v10  ;;  %v4043_v45 = vadd.f32 %v4011_v13, %v3790_v33  ;;  %v1989_v1 = vmul.f32 %v5566_v24, %v1926_v27  ;;  %v2685_v41 = vrot.slane %v2604_v21, %v4325_v8  ;;  %v7828_v10 = vld [vmem:[#allocation99_spill] sm:$0xff]  ;;  %v7829_v44 = vld [vmem:[#allocation74_spill] sm:$0xff] }
 0x111   :  { %v2857_v35 = vcombine.high %v7825_v16, %v7825_v16  ;;  %v1262_v4 = vadd.f32 %v1230_v43, %v1009_v25  ;;  %v3110_v18 = vcombine.high %v7826_v50, %v7826_v50  ;;  %v3363_v53 = vcombine.high %v7827_v6, %v7827_v6 }
 0x112   :  { %v2779_v62 = vadd.f32 %v2747_v48, %v2526_v30  ;;  %4075 = vst [vmem:[#allocation7 + $0x60] sm:$0xff] %v4043_v45  ;;  %v3616_v13 = vcombine.high %v7828_v10, %v7828_v10  ;;  %v3869_v46 = vcombine.high %v7829_v44, %v7829_v44  ;;  %v251_v9 = vmul.f32 %v5592_v36, %v187_v63 }
 0x113   :  { %v2938_v19 = vrot.slane %v2857_v35, %v4325_v8  ;;  %v1515_v48 = vadd.f32 %v1483_v52, %v1262_v4  ;;  %v3191_v43 = vrot.slane %v3110_v18, %v4325_v8  ;;  %v3444_v33 = vrot.slane %v3363_v53, %v4325_v8 }
 0x114   :  { %v3032_v21 = vadd.f32 %v3000_v14, %v2779_v62  ;;  %v2242_v30 = vmul.f32 %v5570_v51, %v2179_v20  ;;  %v3697_v25 = vrot.slane %v3616_v13, %v4325_v8  ;;  %v3950_v45 = vrot.slane %v3869_v46, %v4325_v8  ;;  %v7831_v13 = vld [vmem:[#allocation11_spill] sm:$0xff] }
 0x115   :  { %v472_v16 = vmul.f32 %v5383_v23, %v408_v2  ;;  %v1768_v50 = vadd.f32 %v1736_v47, %v1515_v48  ;;  %v2495_v6 = vmul.f32 %v5574_v3, %v2432_v49  ;;  %v2748_v14 = vmul.f32 %v5626_v29, %v2685_v41 }
 0x116   :  { %v3285_v35 = vadd.f32 %v5770_v42, %v3032_v21  ;;  %v3001_v63 = vmul.f32 %v5629_v7, %v2938_v19  ;;  %v3254_v52 = vmul.f32 %v5632_v32, %v3191_v43  ;;  %v725_v4 = vmul.f32 %v5401_v12, %v661_v26  ;;  %v7830_v42 = vld [vmem:[#allocation100_spill] sm:$0xff] }
 0x117   :  { %v504_v62 = vadd.f32 %v472_v16, %v251_v9  ;;  %v2021_v53 = vadd.f32 %v1989_v1, %v1768_v50  ;;  %v3507_v10 = vmul.f32 %v5637_v0, %v3444_v33  ;;  %v978_v2 = vmul.f32 %v5405_v60, %v5788_v28 }
 0x118   :  { %v3538_v18 = vadd.f32 %v3506_v56, %v3285_v35  ;;  %v3760_v47 = vmul.f32 %v7830_v42, %v3697_v25  ;;  %v4013_v44 = vmul.f32 %v7831_v13, %v3950_v45  ;;  %v1231_v21 = vmul.f32 %v5418_v22, %v1167_v15 }
 0x119   :  { %v757_v46 = vadd.f32 %v725_v4, %v504_v62  ;;  %v2274_v32 = vadd.f32 %v2242_v30, %v2021_v53  ;;  %v1484_v9 = vmul.f32 %v5422_v5, %v1420_v38  ;;  %v1737_v26 = vmul.f32 %v5426_v37, %v1673_v55  ;;  %v7833_v38 = vld [vmem:[#allocation13_spill] sm:$0xff] }
 0x11a   :  { %v3791_v48 = vadd.f32 %v5792_v39, %v3538_v18  ;;  %v1990_v1 = vmul.f32 %v5432_v31, %v1926_v27  ;;  %v2243_v16 = vmul.f32 %v5653_v34, %v2179_v20  ;;  %v2496_v28 = vmul.f32 %v5657_v17, %v2432_v49  ;;  %v7832_v39 = vld [vmem:[#allocation62_spill] sm:$0xff]  ;;  %v7836_v27 = vld [vmem:[#allocation20_spill] sm:$0xff] }
 0x11b   :  { %v1010_v56 = vadd.f32 %v978_v2, %v757_v46  ;;  %v2527_v50 = vadd.f32 %v2495_v6, %v2274_v32  ;;  %v2749_v62 = vmul.f32 %v5661_v54, %v2685_v41  ;;  %v3002_v15 = vmul.f32 %v5664_v58, %v2938_v19  ;;  %v7835_v18 = vld [vmem:[#allocation14_spill] sm:$0xff] }
 0x11c   :  { %v4044_v35 = vadd.f32 %v4012_v11, %v3791_v48  ;;  %v5861_v30 = vmul.f32 %v7832_v39, %v3191_v43  ;;  %v5865_v55 = vmul.f32 %v5592_v36, %v7833_v38  ;;  %v5869_v53 = vrot.slane %v7836_v27, %v7835_v18  ;;  %v7838_v11 = vld [vmem:[#allocation16_spill] sm:$0xff]  ;;  %v7839_v49 = vld [vmem:[#allocation26_spill] sm:$0xff] }
 0x11d   :  { %v1263_v4 = vadd.f32 %v1231_v21, %v1010_v56  ;;  %v2780_v20 = vadd.f32 %v2748_v14, %v2527_v50  ;;  %v5872_v32 = vmul.f32 %v7838_v11, %v3444_v33  ;;  %v5876_v41 = vrot.slane %v7839_v49, %v7835_v18  ;;  %v7841_v19 = vld [vmem:[#allocation30_spill] sm:$0xff]  ;;  %v7843_v33 = vld [vmem:[#allocation37_spill] sm:$0xff] }
 0x11e   :  { %7834 = vst [vmem:[#allocation27_spill] sm:$0xff] %v5865_v55  ;;  %7837 = vst [vmem:[#allocation31_spill] sm:$0xff] %v5869_v53  ;;  %v5880_v43 = vrot.slane %v7841_v19, %v7835_v18  ;;  %v5884_v2 = vrot.slane %v5865_v55, %v7835_v18  ;;  %v5888_v46 = vrot.slane %v5869_v53, %v4325_v8  ;;  %v7845_v56 = vld [vmem:[#allocation38_spill] sm:$0xff]  ;;  %v7854_v19 = vld [vmem:[#allocation48_spill] sm:$0xff] }
 0x11f   :  { %4076 = vst [vmem:[#allocation7 + $0x68] sm:$0xff] %v4044_v35  ;;  %7840 = vst [vmem:[#allocation36_spill] sm:$0xff] %v5876_v41  ;;  %v1516_v6 = vadd.f32 %v1484_v9, %v1263_v4  ;;  %v5892_v14 = vrot.slane %v7843_v33, %v7835_v18  ;;  %v3033_v21 = vadd.f32 %v3001_v63, %v2780_v20  ;;  %v7847_v4 = vld [vmem:[#allocation23_spill] sm:$0xff]  ;;  %v7853_v33 = vld [vmem:[#allocation44_spill] sm:$0xff] }
 0x120   :  { %7842 = vst [vmem:[#allocation42_spill] sm:$0xff] %v5880_v43  ;;  %v5896_v48 = vrot.slane %v5876_v41, %v4325_v8  ;;  %v5900_v9 = vrot.slane %v5880_v43, %v4325_v8  ;;  %v5904_v35 = vrot.slane %v7845_v56, %v7835_v18  ;;  %v5907_v38 = vmul.f32 %v7847_v4, %v3697_v25  ;;  %v7849_v41 = vld [vmem:[#allocation34_spill] sm:$0xff] }
 0x121   :  { %7844 = vst [vmem:[#allocation52_spill] sm:$0xff] %v5892_v14  ;;  %v1769_v50 = vadd.f32 %v1737_v26, %v1516_v6  ;;  %v5910_v55 = vmul.f32 %v5718_v61, %v3950_v45  ;;  %v5914_v63 = vrot.slane %v5884_v2, %v7835_v18  ;;  %v3286_v20 = vadd.f32 %v3254_v52, %v3033_v21  ;;  %v7850_v6 = vld [vmem:[#allocation40_spill] sm:$0xff]  ;;  %v7851_v52 = vld [vmem:[#allocation45_spill] sm:$0xff] }
 0x122   :  { %7846 = vst [vmem:[#allocation56_spill] sm:$0xff] %v5904_v35  ;;  %v473_v43 = vmul.f32 %v7849_v41, %v5888_v46  ;;  %v5920_v53 = vrot.slane %v5892_v14, %v4325_v8  ;;  %v5924_v26 = vrot.slane %v5904_v35, %v4325_v8  ;;  %v726_v56 = vmul.f32 %v7850_v6, %v5896_v48  ;;  %v7856_v35 = vld [vmem:[#allocation50_spill] sm:$0xff] }
 0x123   :  { %7848 = vst [vmem:[#allocation67_spill] sm:$0xff] %v5914_v63  ;;  %v2022_v25 = vadd.f32 %v1990_v1, %v1769_v50  ;;  %v191_v45 = vrot.slane %v5914_v63, %v4325_v8  ;;  %v5932_v21 = vrot.slane %v7851_v52, %v7835_v18  ;;  %v3539_v41 = vadd.f32 %v3507_v10, %v3286_v20  ;;  %v7858_v63 = vld [vmem:[#allocation70_spill] sm:$0xff]  ;;  %v7859_v10 = vld [vmem:[#allocation55_spill] sm:$0xff] }
 0x124   :  { %v979_v14 = vmul.f32 %v7853_v33, %v5900_v9  ;;  %v5938_v49 = vmul.f32 %v5653_v34, %v7854_v19  ;;  %v5942_v1 = vmul.f32 %v5657_v17, %v7856_v35  ;;  %v5951_v20 = vrot.slane %v7859_v10, %v7835_v18 }
 0x125   :  { %7852 = vst [vmem:[#allocation68_spill] sm:$0xff] %v5932_v21  ;;  %v2275_v50 = vadd.f32 %v2243_v16, %v2022_v25  ;;  %v252_v27 = vmul.f32 %v7858_v63, %v191_v45  ;;  %v5947_v6 = vrot.slane %v5932_v21, %v4325_v8  ;;  %v3792_v33 = vadd.f32 %v3760_v47, %v3539_v41  ;;  %v7861_v16 = vld [vmem:[#allocation59_spill] sm:$0xff] }
 0x126   :  { %7855 = vst [vmem:[#allocation71_spill] sm:$0xff] %v5938_v49  ;;  %7857 = vst [vmem:[#allocation72_spill] sm:$0xff] %v5942_v1  ;;  %v5955_v19 = vrot.slane %v5938_v49, %v7835_v18  ;;  %v5959_v35 = vrot.slane %v5942_v1, %v7835_v18  ;;  %v5963_v63 = vmul.f32 %v5661_v54, %v7861_v16 }
 0x127   :  { %7860 = vst [vmem:[#allocation73_spill] sm:$0xff] %v5951_v20  ;;  %v2528_v25 = vadd.f32 %v2496_v28, %v2275_v50  ;;  %v505_v21 = vadd.f32 %v473_v43, %v252_v27  ;;  %v1232_v52 = vmul.f32 %v5297_v57, %v5920_v53  ;;  %v5969_v47 = vrot.slane %v5951_v20, %v4325_v8 }
 0x128   :  { %7862 = vst [vmem:[#allocation82_spill] sm:$0xff] %v5963_v63  ;;  %v4045_v41 = vadd.f32 %v4013_v44, %v3792_v33  ;;  %v5973_v49 = vrot.slane %v5955_v19, %v7835_v18  ;;  %v5977_v1 = vrot.slane %v5959_v35, %v7835_v18  ;;  %v5981_v28 = vrot.slane %v5963_v63, %v7835_v18  ;;  %v7866_v63 = vld [vmem:[#allocation60_spill] sm:$0xff] }
 0x129   :  { %v2781_v27 = vadd.f32 %v2749_v62, %v2528_v25  ;;  %v758_v43 = vadd.f32 %v726_v56, %v505_v21  ;;  %v1485_v57 = vmul.f32 %v5509_v40, %v5924_v26  ;;  %v1738_v44 = vmul.f32 %v5560_v59, %v5947_v6 }
 0x12a   :  { %7863 = vst [vmem:[#allocation83_spill] sm:$0xff] %v5973_v49  ;;  %7864 = vst [vmem:[#allocation47_spill] sm:$0xff] %v5977_v1  ;;  %v2183_v50 = vrot.slane %v5973_v49, %v4325_v8  ;;  %v2436_v33 = vrot.slane %v5977_v1, %v4325_v8  ;;  %v5993_v16 = vrot.slane %v5981_v28, %v7835_v18 }
 0x12b   :  { %4077 = vst [vmem:[#allocation7 + $0x70] sm:$0xff] %v4045_v41  ;;  %v5997_v62 = vmul.f32 %v5664_v58, %v7866_v63  ;;  %v3034_v56 = vadd.f32 %v3002_v15, %v2781_v27  ;;  %v1011_v21 = vadd.f32 %v979_v14, %v758_v43  ;;  %v1991_v25 = vmul.f32 %v5566_v24, %v5969_v47  ;;  %v7868_v41 = vld [vmem:[#allocation64_spill] sm:$0xff]  ;;  %v7870_v63 = vld [vmem:[#allocation65_spill] sm:$0xff] }
 0x12c   :  { %7865 = vst [vmem:[#allocation54_spill] sm:$0xff] %v5993_v16  ;;  %v6003_v20 = vmul.f32 %v7832_v39, %v7868_v41  ;;  %v2244_v49 = vmul.f32 %v5570_v51, %v2183_v50  ;;  %v2689_v1 = vrot.slane %v5993_v16, %v4325_v8  ;;  %v6014_v15 = vmul.f32 %v7838_v11, %v7870_v63  ;;  %v7873_v51 = vld [vmem:[#allocation69_spill] sm:$0xff] }
 0x12d   :  { %7867 = vst [vmem:[#allocation92_spill] sm:$0xff] %v5997_v62  ;;  %v6010_v59 = vrot.slane %v5997_v62, %v7835_v18  ;;  %v3287_v14 = vadd.f32 %v5861_v30, %v3034_v56  ;;  %v1264_v27 = vadd.f32 %v1232_v52, %v1011_v21  ;;  %v2497_v43 = vmul.f32 %v5574_v3, %v2436_v33  ;;  %v7875_v30 = vld [vmem:[#allocation78_spill] sm:$0xff] }
 0x12e   :  { %7869 = vst [vmem:[#allocation93_spill] sm:$0xff] %v6003_v20  ;;  %7871 = vst [vmem:[#allocation76_spill] sm:$0xff] %v6014_v15  ;;  %v6020_v41 = vrot.slane %v6003_v20, %v7835_v18  ;;  %v6028_v62 = vrot.slane %v6014_v15, %v7835_v18  ;;  %v6032_v63 = vmul.f32 %v7847_v4, %v7873_v51 }
 0x12f   :  { %v6024_v16 = vrot.slane %v6010_v59, %v7835_v18  ;;  %v6036_v52 = vmul.f32 %v5718_v61, %v7875_v30  ;;  %v3540_v56 = vadd.f32 %v5872_v32, %v3287_v14  ;;  %v1517_v21 = vadd.f32 %v1485_v57, %v1264_v27 }
 0x130   :  { %7874 = vst [vmem:[#allocation57_spill] sm:$0xff] %v6032_v63  ;;  %v6041_v20 = vrot.slane %v6020_v41, %v7835_v18  ;;  %v253_v3 = vmul.f32 %v5592_v36, %v191_v45  ;;  %v6048_v51 = vrot.slane %v6028_v62, %v7835_v18  ;;  %v6052_v30 = vrot.slane %v6032_v63, %v7835_v18 }
 0x131   :  { %7872 = vst [vmem:[#allocation29_spill] sm:$0xff] %v6024_v16  ;;  %7876 = vst [vmem:[#allocation35_spill] sm:$0xff] %v6036_v52  ;;  %v2942_v15 = vrot.slane %v6024_v16, %v4325_v8  ;;  %v6056_v32 = vrot.slane %v6036_v52, %v7835_v18  ;;  %v3793_v57 = vadd.f32 %v5907_v38, %v3540_v56 }
 0x132   :  { %7877 = vst [vmem:[#allocation21_spill] sm:$0xff] %v6041_v20  ;;  %7878 = vst [vmem:[#allocation22_spill] sm:$0xff] %v6048_v51  ;;  %v1770_v14 = vadd.f32 %v1738_v44, %v1517_v21  ;;  %v3195_v45 = vrot.slane %v6041_v20, %v4325_v8  ;;  %v474_v27 = vmul.f32 %v5383_v23, %v5888_v46 }
 0x133   :  { %7879 = vst [vmem:[#allocation25_spill] sm:$0xff] %v6056_v32  ;;  %v2750_v16 = vmul.f32 %v5626_v29, %v2689_v1  ;;  %v3448_v36 = vrot.slane %v6048_v51, %v4325_v8  ;;  %v6068_v63 = vrot.slane %v6052_v30, %v7835_v18  ;;  %v6072_v52 = vrot.slane %v6056_v32, %v7835_v18  ;;  %v7880_v32 = vld [vmem:[#allocation77_spill] sm:$0xff] }
 0x134   :  { %v4046_v38 = vadd.f32 %v5910_v55, %v3793_v57  ;;  %v2023_v44 = vadd.f32 %v1991_v25, %v1770_v14  ;;  %v506_v56 = vadd.f32 %v474_v27, %v253_v3  ;;  %v727_v23 = vmul.f32 %v5401_v12, %v5896_v48 }
 0x135   :  { %v3003_v46 = vmul.f32 %v5629_v7, %v2942_v15  ;;  %v3701_v21 = vrot.slane %v6068_v63, %v4325_v8  ;;  %v3954_v51 = vrot.slane %v6072_v52, %v4325_v8  ;;  %v980_v20 = vmul.f32 %v5405_v60, %v5900_v9 }
 0x136   :  { %4078 = vst [vmem:[#allocation7 + $0x78] sm:$0xff] %v4046_v38  ;;  %v2276_v29 = vadd.f32 %v2244_v49, %v2023_v44  ;;  %v3256_v55 = vmul.f32 %v7880_v32, %v3195_v45  ;;  %v759_v25 = vadd.f32 %v727_v23, %v506_v56  ;;  %v1233_v3 = vmul.f32 %v5418_v22, %v5920_v53  ;;  %v7891_v56 = vld [vmem:[#allocation37_spill] sm:$0xff] }
 0x137   :  { %v3509_v12 = vmul.f32 %v5637_v0, %v3448_v36  ;;  %v3762_v48 = vmul.f32 %v7830_v42, %v3701_v21  ;;  %v1486_v57 = vmul.f32 %v5422_v5, %v5924_v26  ;;  %v1739_v14 = vmul.f32 %v5426_v37, %v5947_v6 }
 0x138   :  { %v2529_v27 = vadd.f32 %v2497_v43, %v2276_v29  ;;  %v4015_v60 = vmul.f32 %v7831_v13, %v3954_v51  ;;  %v1012_v49 = vadd.f32 %v980_v20, %v759_v25  ;;  %v1992_v9 = vmul.f32 %v5432_v31, %v5969_v47  ;;  %v7881_v31 = vld [vmem:[#allocation20_spill] sm:$0xff] }
 0x139   :  { %v2245_v38 = vmul.f32 %v5653_v34, %v2183_v50  ;;  %v2498_v22 = vmul.f32 %v5657_v17, %v2436_v33  ;;  %v2751_v53 = vmul.f32 %v5661_v54, %v2689_v1  ;;  %v6100_v44 = vmul.f32 %v5664_v58, %v2942_v15  ;;  %v7884_v1 = vld [vmem:[#allocation26_spill] sm:$0xff] }
 0x13a   :  { %v2782_v5 = vadd.f32 %v2750_v16, %v2529_v27  ;;  %v1265_v26 = vadd.f32 %v1233_v3, %v1012_v49  ;;  %v6103_v37 = vmul.f32 %v7832_v39, %v3195_v45  ;;  %v122_v29 = vcombine.high %v5884_v2, %v5884_v2  ;;  %v7887_v16 = vld [vmem:[#allocation30_spill] sm:$0xff] }
 0x13b   :  { %v6108_v6 = vmul.f32 %v7838_v11, %v3448_v36  ;;  %v7882_v20 = vcombine.high %v7881_v31, %v7881_v31  ;;  %v7885_v50 = vcombine.high %v7884_v1, %v7884_v1  ;;  %v7888_v15 = vcombine.high %v7887_v16, %v7887_v16  ;;  %v6160_v1 = vld [vmem:[#allocation2 + $0x10] sm:$0xff]  ;;  %v6164_v16 = vld [vmem:[#allocation2 + $0x20] sm:$0xff] }
 0x13c   :  { %v3035_v36 = vadd.f32 %v3003_v46, %v2782_v5  ;;  %v1518_v43 = vadd.f32 %v1486_v57, %v1265_v26  ;;  %v6129_v45 = vrot.slane %v122_v29, %v7835_v18  ;;  %v7892_v23 = vcombine.high %v7891_v56, %v7891_v56  ;;  %v7894_v57 = vld [vmem:[#allocation38_spill] sm:$0xff]  ;;  %7897 = vst [vmem:[#allocation80_spill] sm:$0xff] %v6160_v1 }
 0x13d   :  { %v6114_v47 = vrot.slane %v7882_v20, %v7835_v18  ;;  %v6120_v33 = vrot.slane %v7885_v50, %v7835_v18  ;;  %v6126_v2 = vrot.slane %v7888_v15, %v7835_v18  ;;  %v7895_v49 = vcombine.high %v7894_v57, %v7894_v57  ;;  %7898 = vst [vmem:[#allocation81_spill] sm:$0xff] %v6164_v16 }
 0x13e   :  { %7890 = vst [vmem:[#allocation33_spill] sm:$0xff] %v6129_v45  ;;  %v6135_v25 = vrot.slane %v7892_v23, %v7835_v18  ;;  %v3288_v26 = vadd.f32 %v3256_v55, %v3035_v36  ;;  %v1771_v29 = vadd.f32 %v1739_v14, %v1518_v43  ;;  %v6156_v31 = vmul.f32 %v7847_v4, %v3701_v21  ;;  %v6176_v43 = vld [vmem:[#allocation2] sm:$0xff]  ;;  %v6179_v23 = vld [vmem:[#allocation2 + $0x30] sm:$0xff] }
 0x13f   :  { %7883 = vst [vmem:[#allocation53_spill] sm:$0xff] %v6114_v47  ;;  %7886 = vst [vmem:[#allocation63_spill] sm:$0xff] %v6120_v33  ;;  %v6139_v3 = vrot.slane %v6114_v47, %v4325_v8  ;;  %v6143_v27 = vrot.slane %v6120_v33, %v4325_v8  ;;  %v6147_v46 = vrot.slane %v6126_v2, %v4325_v8 }
 0x140   :  { %7889 = vst [vmem:[#allocation75_spill] sm:$0xff] %v6126_v2  ;;  %7893 = vst [vmem:[#allocation41_spill] sm:$0xff] %v6135_v25  ;;  %v6153_v5 = vrot.slane %v7895_v49, %v7835_v18  ;;  %v195_v20 = vrot.slane %v6129_v45, %v4325_v8  ;;  %v6170_v55 = vrot.slane %v6135_v25, %v4325_v8  ;;  %v7901_v49 = vld [vmem:[#allocation45_spill] sm:$0xff] }
 0x141   :  { %v475_v50 = vmul.f32 %v6160_v1, %v6139_v3  ;;  %v728_v15 = vmul.f32 %v6164_v16, %v6143_v27  ;;  %v3541_v14 = vadd.f32 %v3509_v12, %v3288_v26  ;;  %v2024_v36 = vadd.f32 %v1992_v9, %v1771_v29  ;;  %7899 = vst [vmem:[#allocation85_spill] sm:$0xff] %v6176_v43  ;;  %v6202_v45 = vld [vmem:[#allocation2 + $0x40] sm:$0xff] }
 0x142   :  { %7896 = vst [vmem:[#allocation79_spill] sm:$0xff] %v6153_v5  ;;  %v6174_v21 = vrot.slane %v6153_v5, %v4325_v8  ;;  %v254_v56 = vmul.f32 %v6176_v43, %v195_v20  ;;  %7900 = vst [vmem:[#allocation49_spill] sm:$0xff] %v6179_v23  ;;  %v981_v57 = vmul.f32 %v6179_v23, %v6147_v46 }
 0x143   :  { %v7902_v25 = vcombine.high %v7901_v49, %v7901_v49  ;;  %v7904_v12 = vcombine.high %v7859_v10, %v7859_v10  ;;  %v2114_v26 = vcombine.high %v5955_v19, %v5955_v19  ;;  %v2367_v29 = vcombine.high %v5959_v35, %v5959_v35  ;;  %7906 = vst [vmem:[#allocation66_spill] sm:$0xff] %v6202_v45 }
 0x144   :  { %v3794_v5 = vadd.f32 %v3762_v48, %v3541_v14  ;;  %v2277_v33 = vadd.f32 %v2245_v38, %v2024_v36  ;;  %v507_v47 = vadd.f32 %v475_v50, %v254_v56  ;;  %v2620_v49 = vcombine.high %v5981_v28, %v5981_v28 }
 0x145   :  { %v6187_v2 = vrot.slane %v7902_v25, %v7835_v18  ;;  %v6193_v9 = vrot.slane %v7904_v12, %v7835_v18  ;;  %v4016_v25 = vmul.f32 %v5718_v61, %v3954_v51  ;;  %v1234_v10 = vmul.f32 %v6202_v45, %v6170_v55  ;;  %v7907_v51 = vld [vmem:[#allocation17_spill] sm:$0xff] }
 0x146   :  { %v4047_v35 = vadd.f32 %v4015_v60, %v3794_v5  ;;  %v2530_v48 = vadd.f32 %v2498_v22, %v2277_v33  ;;  %v760_v38 = vadd.f32 %v728_v15, %v507_v47  ;;  %v1487_v28 = vmul.f32 %v5509_v40, %v6174_v21 }
 0x147   :  { %7903 = vst [vmem:[#allocation15_spill] sm:$0xff] %v6187_v2  ;;  %7905 = vst [vmem:[#allocation18_spill] sm:$0xff] %v6193_v9  ;;  %v6208_v12 = vrot.slane %v6187_v2, %v4325_v8  ;;  %v6212_v19 = vrot.slane %v6193_v9, %v4325_v8  ;;  %v6219_v14 = vrot.slane %v2114_v26, %v7835_v18 }
 0x148   :  { %v6222_v36 = vrot.slane %v2367_v29, %v7835_v18  ;;  %v6225_v56 = vrot.slane %v2620_v49, %v7835_v18  ;;  %4079 = vst [vmem:[#allocation7 + $0x80] sm:$0xff] %v4047_v35  ;;  %v2783_v9 = vadd.f32 %v2751_v53, %v2530_v48  ;;  %v1013_v60 = vadd.f32 %v981_v57, %v760_v38  ;;  %v7914_v35 = vld [vmem:[#allocation25_spill] sm:$0xff]  ;;  %v7915_v48 = vld [vmem:[#allocation96_spill] sm:$0xff] }
 0x149   :  { %v1740_v50 = vmul.f32 %v7907_v51, %v6208_v12  ;;  %7908 = vst [vmem:[#allocation89_spill] sm:$0xff] %v6219_v14  ;;  %v1993_v22 = vmul.f32 %v5566_v24, %v6212_v19  ;;  %v2873_v40 = vcombine.high %v6010_v59, %v6010_v59  ;;  %v2187_v47 = vrot.slane %v6219_v14, %v4325_v8 }
 0x14a   :  { %7909 = vst [vmem:[#allocation86_spill] sm:$0xff] %v6222_v36  ;;  %7910 = vst [vmem:[#allocation87_spill] sm:$0xff] %v6225_v56  ;;  %v2440_v33 = vrot.slane %v6222_v36, %v4325_v8  ;;  %v3126_v5 = vcombine.high %v6020_v41, %v6020_v41  ;;  %v3379_v15 = vcombine.high %v6028_v62, %v6028_v62 }
 0x14b   :  { %v3036_v53 = vadd.f32 %v6100_v44, %v2783_v9  ;;  %v1266_v57 = vadd.f32 %v1234_v10, %v1013_v60  ;;  %v2693_v26 = vrot.slane %v6225_v56, %v4325_v8  ;;  %v6243_v59 = vrot.slane %v2873_v40, %v7835_v18 }
 0x14c   :  { %v6246_v29 = vrot.slane %v3126_v5, %v7835_v18  ;;  %v6249_v49 = vrot.slane %v3379_v15, %v7835_v18  ;;  %v3632_v41 = vcombine.high %v6052_v30, %v6052_v30  ;;  %v3885_v62 = vcombine.high %v7914_v35, %v7914_v35  ;;  %v7918_v15 = vld [vmem:[#allocation19_spill] sm:$0xff]  ;;  %v7920_v35 = vld [vmem:[#allocation94_spill] sm:$0xff] }
 0x14d   :  { %7911 = vst [vmem:[#allocation88_spill] sm:$0xff] %v6243_v59  ;;  %v3289_v44 = vadd.f32 %v6103_v37, %v3036_v53  ;;  %v1519_v9 = vadd.f32 %v1487_v28, %v1266_v57  ;;  %v2946_v10 = vrot.slane %v6243_v59, %v4325_v8  ;;  %v255_v38 = vmul.f32 %v7915_v48, %v195_v20  ;;  %v6271_v57 = vld [vmem:[#allocation2 + $0x18] sm:$0xff]  ;;  %v7921_v59 = vld [vmem:[#allocation46_spill] sm:$0xff] }
 0x14e   :  { %7912 = vst [vmem:[#allocation90_spill] sm:$0xff] %v6246_v29  ;;  %7913 = vst [vmem:[#allocation91_spill] sm:$0xff] %v6249_v49  ;;  %v3199_v60 = vrot.slane %v6246_v29, %v4325_v8  ;;  %v3452_v40 = vrot.slane %v6249_v49, %v4325_v8  ;;  %v6264_v5 = vrot.slane %v3632_v41, %v7835_v18 }
 0x14f   :  { %v6267_v30 = vrot.slane %v3885_v62, %v7835_v18  ;;  %v3542_v37 = vadd.f32 %v6108_v6, %v3289_v44  ;;  %v1772_v28 = vadd.f32 %v1740_v50, %v1519_v9  ;;  %v2246_v53 = vmul.f32 %v7918_v15, %v2187_v47  ;;  %7919 = vst [vmem:[#allocation97_spill] sm:$0xff] %v6271_v57  ;;  %v6286_v9 = vld [vmem:[#allocation2 + $0x28] sm:$0xff] }
 0x150   :  { %7916 = vst [vmem:[#allocation12_spill] sm:$0xff] %v6264_v5  ;;  %v476_v20 = vmul.f32 %v6271_v57, %v6139_v3  ;;  %v2499_v29 = vmul.f32 %v7920_v35, %v2440_v33  ;;  %v2752_v49 = vmul.f32 %v7921_v59, %v2693_v26  ;;  %v6279_v41 = vrot.slane %v6264_v5, %v4325_v8  ;;  %v6293_v5 = vld [vmem:[#allocation2 + $0x38] sm:$0xff] }
 0x151   :  { %7917 = vst [vmem:[#allocation95_spill] sm:$0xff] %v6267_v30  ;;  %v6283_v62 = vrot.slane %v6267_v30, %v4325_v8  ;;  %v3795_v6 = vadd.f32 %v6156_v31, %v3542_v37  ;;  %v2025_v50 = vadd.f32 %v1993_v22, %v1772_v28  ;;  %v729_v3 = vmul.f32 %v6286_v9, %v6143_v27 }
 0x152   :  { %v508_v44 = vadd.f32 %v476_v20, %v255_v38  ;;  %v3005_v15 = vmul.f32 %v5629_v7, %v2946_v10  ;;  %v3258_v35 = vmul.f32 %v7880_v32, %v3199_v60  ;;  %v3511_v18 = vmul.f32 %v5637_v0, %v3452_v40  ;;  %v6297_v38 = vld [vmem:[#allocation2 + $0x48] sm:$0xff]  ;;  %v6305_v20 = vld [vmem:[#allocation2 + $0x58] sm:$0xff] }
 0x153   :  { %v982_v30 = vmul.f32 %v6293_v5, %v6147_v46  ;;  %v4048_v56 = vadd.f32 %v4016_v25, %v3795_v6  ;;  %v2278_v31 = vadd.f32 %v2246_v53, %v2025_v50  ;;  %v1235_v37 = vmul.f32 %v6297_v38, %v6170_v55  ;;  %v6309_v46 = vld [vmem:[#allocation2 + $0x68] sm:$0xff]  ;;  %v6313_v55 = vld [vmem:[#allocation2 + $0x78] sm:$0xff] }
 0x154   :  { %v761_v22 = vadd.f32 %v729_v3, %v508_v44  ;;  %v3764_v27 = vmul.f32 %v7830_v42, %v6279_v41  ;;  %v4017_v28 = vmul.f32 %v7831_v13, %v6283_v62  ;;  %v1488_v36 = vmul.f32 %v6305_v20, %v6174_v21 }
 0x155   :  { %v1741_v25 = vmul.f32 %v6309_v46, %v6208_v12  ;;  %4080 = vst [vmem:[#allocation7 + $0x88] sm:$0xff] %v4048_v56  ;;  %v2531_v53 = vadd.f32 %v2499_v29, %v2278_v31  ;;  %v1994_v50 = vmul.f32 %v6313_v55, %v6212_v19  ;;  %v2247_v44 = vmul.f32 %v5653_v34, %v2187_v47  ;;  %v7922_v29 = vld [vmem:[#allocation67_spill] sm:$0xff]  ;;  %v7924_v19 = vld [vmem:[#allocation36_spill] sm:$0xff]  ;;  %v7925_v34 = vld [vmem:[#allocation42_spill] sm:$0xff] }
 0x156   :  { %v1014_v6 = vadd.f32 %v982_v30, %v761_v22  ;;  %v2500_v3 = vmul.f32 %v5657_v17, %v2440_v33  ;;  %v2753_v14 = vmul.f32 %v5661_v54, %v2693_v26  ;;  %v3006_v21 = vmul.f32 %v5664_v58, %v2946_v10  ;;  %v7923_v31 = vld [vmem:[#allocation31_spill] sm:$0xff]  ;;  %v7926_v26 = vld [vmem:[#allocation52_spill] sm:$0xff] }
 0x157   :  { %v6322_v2 = vmul.f32 %v7832_v39, %v3199_v60  ;;  %v2784_v12 = vadd.f32 %v2752_v49, %v2531_v53  ;;  %v152_v30 = vcombine.high %v7922_v29, %v7922_v29  ;;  %v373_v22 = vcombine.high %v7923_v31, %v7923_v31  ;;  %v7927_v58 = vld [vmem:[#allocation56_spill] sm:$0xff] }
 0x158   :  { %v1267_v56 = vadd.f32 %v1235_v37, %v1014_v6  ;;  %v626_v47 = vcombine.high %v7924_v19, %v7924_v19  ;;  %v879_v33 = vcombine.high %v7925_v34, %v7925_v34  ;;  %v1132_v10 = vcombine.high %v7926_v26, %v7926_v26 }
 0x159   :  { %v1385_v60 = vcombine.high %v7927_v58, %v7927_v58  ;;  %v3037_v49 = vadd.f32 %v3005_v15, %v2784_v12  ;;  %v199_v53 = vrot.slane %v152_v30, %v4325_v8  ;;  %v420_v6 = vrot.slane %v373_v22, %v4325_v8 }
 0x15a   :  { %v1520_v37 = vadd.f32 %v1488_v36, %v1267_v56  ;;  %v6339_v29 = vmul.f32 %v7838_v11, %v3452_v40  ;;  %v6342_v31 = vrot.slane %v626_v47, %v4325_v8  ;;  %v6345_v34 = vrot.slane %v879_v33, %v4325_v8 }
 0x15b   :  { %v6348_v19 = vrot.slane %v1132_v10, %v4325_v8  ;;  %v3290_v26 = vadd.f32 %v3258_v35, %v3037_v49  ;;  %v256_v36 = vmul.f32 %v6176_v43, %v199_v53  ;;  %v477_v15 = vmul.f32 %v6160_v1, %v420_v6  ;;  %v7929_v10 = vld [vmem:[#allocation73_spill] sm:$0xff]  ;;  %v7931_v1 = vld [vmem:[#allocation47_spill] sm:$0xff]  ;;  %v7932_v43 = vld [vmem:[#allocation54_spill] sm:$0xff] }
 0x15c   :  { %v1773_v58 = vadd.f32 %v1741_v25, %v1520_v37  ;;  %v730_v12 = vmul.f32 %v6164_v16, %v6342_v31  ;;  %v983_v40 = vmul.f32 %v6179_v23, %v6345_v34  ;;  %v6359_v30 = vrot.slane %v1385_v60, %v4325_v8  ;;  %v7928_v25 = vld [vmem:[#allocation68_spill] sm:$0xff]  ;;  %v7930_v37 = vld [vmem:[#allocation83_spill] sm:$0xff] }
 0x15d   :  { %v1236_v56 = vmul.f32 %v6202_v45, %v6348_v19  ;;  %v3543_v22 = vadd.f32 %v3511_v18, %v3290_v26  ;;  %v509_v35 = vadd.f32 %v477_v15, %v256_v36  ;;  %v1638_v33 = vcombine.high %v7928_v25, %v7928_v25  ;;  %v6376_v36 = vld [vmem:[#allocation2 + $0x50] sm:$0xff] }
 0x15e   :  { %v2026_v47 = vadd.f32 %v1994_v50, %v1773_v58  ;;  %v1891_v49 = vcombine.high %v7929_v10, %v7929_v10  ;;  %v2144_v16 = vcombine.high %v7930_v37, %v7930_v37  ;;  %v2397_v23 = vcombine.high %v7931_v1, %v7931_v1  ;;  %7933 = vst [vmem:[#allocation98_spill] sm:$0xff] %v6376_v36  ;;  %v7935_v10 = vld [vmem:[#allocation21_spill] sm:$0xff] }
 0x15f   :  { %v2650_v45 = vcombine.high %v7932_v43, %v7932_v43  ;;  %v3796_v60 = vadd.f32 %v3764_v27, %v3543_v22  ;;  %v762_v18 = vadd.f32 %v730_v12, %v509_v35  ;;  %v1685_v50 = vrot.slane %v1638_v33, %v4325_v8  ;;  %v7934_v35 = vld [vmem:[#allocation29_spill] sm:$0xff] }
 0x160   :  { %v2279_v11 = vadd.f32 %v2247_v44, %v2026_v47  ;;  %v3765_v26 = vmul.f32 %v7847_v4, %v6279_v41  ;;  %v4018_v58 = vmul.f32 %v5718_v61, %v6283_v62  ;;  %v1489_v15 = vmul.f32 %v6376_v36, %v6359_v30 }
 0x161   :  { %v1938_v1 = vrot.slane %v1891_v49, %v4325_v8  ;;  %v4049_v25 = vadd.f32 %v4017_v28, %v3796_v60  ;;  %v1015_v27 = vadd.f32 %v983_v40, %v762_v18  ;;  %v2191_v44 = vrot.slane %v2144_v16, %v4325_v8  ;;  %v7936_v28 = vld [vmem:[#allocation22_spill] sm:$0xff] }
 0x162   :  { %v2532_v43 = vadd.f32 %v2500_v3, %v2279_v11  ;;  %v1742_v12 = vmul.f32 %v7907_v51, %v1685_v50  ;;  %v2444_v4 = vrot.slane %v2397_v23, %v4325_v8  ;;  %v2697_v41 = vrot.slane %v2650_v45, %v4325_v8 }
 0x163   :  { %v1995_v22 = vmul.f32 %v5566_v24, %v1938_v1  ;;  %4081 = vst [vmem:[#allocation7 + $0x90] sm:$0xff] %v4049_v25  ;;  %v1268_v47 = vadd.f32 %v1236_v56, %v1015_v27  ;;  %v2903_v33 = vcombine.high %v7934_v35, %v7934_v35  ;;  %v3156_v11 = vcombine.high %v7935_v10, %v7935_v10 }
 0x164   :  { %v2785_v62 = vadd.f32 %v2753_v14, %v2532_v43  ;;  %v3409_v16 = vcombine.high %v7936_v28, %v7936_v28  ;;  %v3662_v51 = vcombine.high %v6068_v63, %v6068_v63  ;;  %v3915_v24 = vcombine.high %v6072_v52, %v6072_v52 }
 0x165   :  { %v257_v45 = vmul.f32 %v7915_v48, %v199_v53  ;;  %v1521_v14 = vadd.f32 %v1489_v15, %v1268_v47  ;;  %v2950_v3 = vrot.slane %v2903_v33, %v4325_v8  ;;  %v3203_v40 = vrot.slane %v3156_v11, %v4325_v8  ;;  %v6408_v48 = vld [vmem:[#allocation2 + $0x80] sm:$0xff]  ;;  %v6411_v53 = vld [vmem:[#allocation2 + $0x90] sm:$0xff] }
 0x166   :  { %v3038_v23 = vadd.f32 %v3006_v21, %v2785_v62  ;;  %v3456_v56 = vrot.slane %v3409_v16, %v4325_v8  ;;  %v6401_v49 = vrot.slane %v3662_v51, %v4325_v8  ;;  %v6404_v37 = vrot.slane %v3915_v24, %v4325_v8  ;;  %v7940_v24 = vld [vmem:[#allocation53_spill] sm:$0xff] }
 0x167   :  { %v478_v63 = vmul.f32 %v6271_v57, %v420_v6  ;;  %v1774_v60 = vadd.f32 %v1742_v12, %v1521_v14  ;;  %v2248_v21 = vmul.f32 %v6408_v48, %v2191_v44  ;;  %v2501_v18 = vmul.f32 %v6411_v53, %v2444_v4 }
 0x168   :  { %v3291_v52 = vadd.f32 %v6322_v2, %v3038_v23  ;;  %v2754_v15 = vmul.f32 %v7921_v59, %v2697_v41  ;;  %v3007_v25 = vmul.f32 %v5629_v7, %v2950_v3  ;;  %v3260_v43 = vmul.f32 %v7880_v32, %v3203_v40  ;;  %v7943_v23 = vld [vmem:[#allocation41_spill] sm:$0xff] }
 0x169   :  { %v510_v27 = vadd.f32 %v478_v63, %v257_v45  ;;  %v2027_v62 = vadd.f32 %v1995_v22, %v1774_v60  ;;  %v731_v2 = vmul.f32 %v6286_v9, %v6342_v31  ;;  %v984_v12 = vmul.f32 %v6293_v5, %v6345_v34  ;;  %v7942_v45 = vld [vmem:[#allocation75_spill] sm:$0xff] }
 0x16a   :  { %v3544_v6 = vadd.f32 %v6339_v29, %v3291_v52  ;;  %v3513_v47 = vmul.f32 %v5637_v0, %v3456_v56  ;;  %v3766_v35 = vmul.f32 %v7830_v42, %v6401_v49  ;;  %v4019_v7 = vmul.f32 %v7831_v13, %v6404_v37  ;;  %v7937_v0 = vld [vmem:[#allocation58_spill] sm:$0xff] }
 0x16b   :  { %v1237_v32 = vmul.f32 %v6297_v38, %v6348_v19  ;;  %v2280_v29 = vadd.f32 %v2248_v21, %v2027_v62  ;;  %v763_v22 = vadd.f32 %v731_v2, %v510_v27  ;;  %v1490_v31 = vmul.f32 %v6305_v20, %v6359_v30  ;;  %v7938_v19 = vld [vmem:[#allocation61_spill] sm:$0xff]  ;;  %v7947_v62 = vld [vmem:[#allocation80_spill] sm:$0xff] }
 0x16c   :  { %v3797_v59 = vadd.f32 %v3765_v26, %v3544_v6  ;;  %v1743_v33 = vmul.f32 %v6309_v46, %v1685_v50  ;;  %v1996_v34 = vmul.f32 %v6313_v55, %v1938_v1  ;;  %v2249_v10 = vmul.f32 %v7937_v0, %v2191_v44  ;;  %v7939_v30 = vld [vmem:[#allocation33_spill] sm:$0xff] }
 0x16d   :  { %v2502_v42 = vmul.f32 %v5657_v17, %v2444_v4  ;;  %v2533_v28 = vadd.f32 %v2501_v18, %v2280_v29  ;;  %v1016_v13 = vadd.f32 %v984_v12, %v763_v22  ;;  %v2755_v16 = vmul.f32 %v5661_v54, %v2697_v41  ;;  %v7945_v18 = vld [vmem:[#allocation16_spill] sm:$0xff]  ;;  %v7946_v27 = vld [vmem:[#allocation85_spill] sm:$0xff] }
 0x16e   :  { %v4050_v11 = vadd.f32 %v4018_v58, %v3797_v59  ;;  %v6437_v26 = vmul.f32 %v7938_v19, %v2950_v3  ;;  %v6440_v51 = vmul.f32 %v7832_v39, %v3203_v40  ;;  %v154_v50 = vcombine.high %v7939_v30, %v7939_v30  ;;  %v7941_v58 = vld [vmem:[#allocation63_spill] sm:$0xff]  ;;  %v7948_v59 = vld [vmem:[#allocation81_spill] sm:$0xff] }
 0x16f   :  { %v375_v1 = vcombine.high %v7940_v24, %v7940_v24  ;;  %v2786_v44 = vadd.f32 %v2754_v15, %v2533_v28  ;;  %v1269_v17 = vadd.f32 %v1237_v32, %v1016_v13  ;;  %v628_v4 = vcombine.high %v7941_v58, %v7941_v58  ;;  %v7944_v3 = vld [vmem:[#allocation79_spill] sm:$0xff]  ;;  %v7953_v24 = vld [vmem:[#allocation89_spill] sm:$0xff]  ;;  %v7954_v58 = vld [vmem:[#allocation86_spill] sm:$0xff] }
 0x170   :  { %4082 = vst [vmem:[#allocation7 + $0x98] sm:$0xff] %v4050_v11  ;;  %v881_v54 = vcombine.high %v7942_v45, %v7942_v45  ;;  %v203_v41 = vrot.slane %v154_v50, %v4325_v8  ;;  %v1134_v14 = vcombine.high %v7943_v23, %v7943_v23  ;;  %v1387_v40 = vcombine.high %v7944_v3, %v7944_v3  ;;  %v7950_v11 = vld [vmem:[#allocation66_spill] sm:$0xff]  ;;  %v7951_v13 = vld [vmem:[#allocation15_spill] sm:$0xff] }
 0x171   :  { %v6452_v39 = vrot.slane %v375_v1, %v4325_v8  ;;  %v3039_v63 = vadd.f32 %v3007_v25, %v2786_v44  ;;  %v1522_v52 = vadd.f32 %v1490_v31, %v1269_v17  ;;  %v6459_v60 = vrot.slane %v628_v4, %v4325_v8  ;;  %v7955_v45 = vld [vmem:[#allocation87_spill] sm:$0xff] }
 0x172   :  { %v6462_v21 = vrot.slane %v881_v54, %v4325_v8  ;;  %v6465_v15 = vmul.f32 %v7945_v18, %v3456_v56  ;;  %v258_v6 = vmul.f32 %v7946_v27, %v203_v41  ;;  %v6471_v12 = vrot.slane %v1134_v14, %v4325_v8  ;;  %v7949_v56 = vld [vmem:[#allocation49_spill] sm:$0xff] }
 0x173   :  { %v479_v2 = vmul.f32 %v7947_v62, %v6452_v39  ;;  %v3292_v32 = vadd.f32 %v3260_v43, %v3039_v63  ;;  %v1775_v25 = vadd.f32 %v1743_v33, %v1522_v52  ;;  %v732_v29 = vmul.f32 %v7948_v59, %v6459_v60  ;;  %v7952_v43 = vld [vmem:[#allocation18_spill] sm:$0xff] }
 0x174   :  { %v6476_v22 = vrot.slane %v1387_v40, %v4325_v8  ;;  %v985_v0 = vmul.f32 %v7949_v56, %v6462_v21  ;;  %v1238_v28 = vmul.f32 %v7950_v11, %v6471_v12  ;;  %v1640_v19 = vcombine.high %v7951_v13, %v7951_v13  ;;  %v7960_v13 = vld [vmem:[#allocation91_spill] sm:$0xff] }
 0x175   :  { %v511_v31 = vadd.f32 %v479_v2, %v258_v6  ;;  %v3545_v30 = vadd.f32 %v3513_v47, %v3292_v32  ;;  %v2028_v50 = vadd.f32 %v1996_v34, %v1775_v25  ;;  %v1893_v33 = vcombine.high %v7952_v43, %v7952_v43  ;;  %v6495_v47 = vld [vmem:[#allocation2 + $0xe8] sm:$0xff]  ;;  %v6512_v25 = vld [vmem:[#allocation2 + $0x70] sm:$0xff] }
 0x176   :  { %v2146_v1 = vcombine.high %v7953_v24, %v7953_v24  ;;  %v6489_v17 = vrot.slane %v1640_v19, %v4325_v8  ;;  %v2399_v4 = vcombine.high %v7954_v58, %v7954_v58  ;;  %v2652_v54 = vcombine.high %v7955_v45, %v7955_v45  ;;  %7956 = vst [vmem:[#allocation99_spill] sm:$0xff] %v6495_v47 }
 0x177   :  { %v764_v44 = vadd.f32 %v732_v29, %v511_v31  ;;  %v3798_v23 = vadd.f32 %v3766_v35, %v3545_v30  ;;  %v2281_v14 = vadd.f32 %v2249_v10, %v2028_v50  ;;  %v3767_v34 = vmul.f32 %v6495_v47, %v6401_v49  ;;  %v6507_v10 = vld [vmem:[#allocation2 + $0x60] sm:$0xff]  ;;  %v7958_v29 = vld [vmem:[#allocation88_spill] sm:$0xff] }
 0x178   :  { %v1942_v3 = vrot.slane %v1893_v33, %v4325_v8  ;;  %v6502_v40 = vmul.f32 %v5718_v61, %v6404_v37  ;;  %v1491_v52 = vmul.f32 %v6376_v36, %v6476_v22  ;;  %v2195_v18 = vrot.slane %v2146_v1, %v4325_v8  ;;  %7957 = vst [vmem:[#allocation74_spill] sm:$0xff] %v6507_v10  ;;  %v7961_v30 = vld [vmem:[#allocation12_spill] sm:$0xff]  ;;  %v7962_v33 = vld [vmem:[#allocation95_spill] sm:$0xff]  ;;  %v6527_v1 = vld [vmem:[#allocation2 + $0x8] sm:$0xff] }
 0x179   :  { %v1017_v63 = vadd.f32 %v985_v0, %v764_v44  ;;  %v4051_v6 = vadd.f32 %v4019_v7, %v3798_v23  ;;  %v2534_v35 = vadd.f32 %v2502_v42, %v2281_v14  ;;  %v1744_v2 = vmul.f32 %v6507_v10, %v6489_v17  ;;  %v7959_v42 = vld [vmem:[#allocation90_spill] sm:$0xff] }
 0x17a   :  { %v2448_v49 = vrot.slane %v2399_v4, %v4325_v8  ;;  %v1997_v61 = vmul.f32 %v6512_v25, %v1942_v3  ;;  %v2701_v37 = vrot.slane %v2652_v54, %v4325_v8  ;;  %v2905_v31 = vcombine.high %v7958_v29, %v7958_v29  ;;  %v6546_v29 = vld [vmem:[#allocation2 + $0xc0] sm:$0xff] }
 0x17b   :  { %v1270_v32 = vadd.f32 %v1238_v28, %v1017_v63  ;;  %4083 = vst [vmem:[#allocation7 + $0xa0] sm:$0xff] %v4051_v6  ;;  %v2787_v7 = vadd.f32 %v2755_v16, %v2534_v35  ;;  %v3158_v0 = vcombine.high %v7959_v42, %v7959_v42  ;;  %v3411_v19 = vcombine.high %v7960_v13, %v7960_v13  ;;  %v6540_v6 = vld [vmem:[#allocation2 + $0xa0] sm:$0xff]  ;;  %v6543_v35 = vld [vmem:[#allocation2 + $0xb0] sm:$0xff] }
 0x17c   :  { %v3664_v28 = vcombine.high %v7961_v30, %v7961_v30  ;;  %v2954_v43 = vrot.slane %v2905_v31, %v4325_v8  ;;  %v3917_v24 = vcombine.high %v7962_v33, %v7962_v33  ;;  %v259_v44 = vmul.f32 %v6527_v1, %v203_v41  ;;  %v6552_v42 = vld [vmem:[#allocation2 + $0xd0] sm:$0xff]  ;;  %v6555_v13 = vld [vmem:[#allocation2 + $0xe0] sm:$0xff] }
 0x17d   :  { %v1523_v50 = vadd.f32 %v1491_v52, %v1270_v32  ;;  %v3040_v16 = vadd.f32 %v6437_v26, %v2787_v7  ;;  %v3207_v58 = vrot.slane %v3158_v0, %v4325_v8  ;;  %v3460_v4 = vrot.slane %v3411_v19, %v4325_v8  ;;  %7963 = vst [vmem:[#allocation100_spill] sm:$0xff] %v6555_v13 }
 0x17e   :  { %v3713_v45 = vrot.slane %v3664_v28, %v4325_v8  ;;  %v2250_v23 = vmul.f32 %v6408_v48, %v2195_v18  ;;  %v3966_v14 = vrot.slane %v3917_v24, %v4325_v8  ;;  %v480_v63 = vmul.f32 %v6271_v57, %v6452_v39  ;;  %v6560_v28 = vld [vmem:[#allocation2 + $0xf0] sm:$0xff] }
 0x17f   :  { %v1776_v54 = vadd.f32 %v1744_v2, %v1523_v50  ;;  %v3293_v52 = vadd.f32 %v6440_v51, %v3040_v16  ;;  %v2503_v41 = vmul.f32 %v6411_v53, %v2448_v49  ;;  %v2756_v26 = vmul.f32 %v6540_v6, %v2701_v37  ;;  %7964 = vst [vmem:[#allocation11_spill] sm:$0xff] %v6560_v28 }
 0x180   :  { %v3009_v32 = vmul.f32 %v6543_v35, %v2954_v43  ;;  %v3262_v31 = vmul.f32 %v6546_v29, %v3207_v58  ;;  %v512_v7 = vadd.f32 %v480_v63, %v259_v44  ;;  %v733_v39 = vmul.f32 %v6286_v9, %v6459_v60 }
 0x181   :  { %v2029_v2 = vadd.f32 %v1997_v61, %v1776_v54  ;;  %v3546_v51 = vadd.f32 %v6465_v15, %v3293_v52  ;;  %v3515_v0 = vmul.f32 %v6552_v42, %v3460_v4  ;;  %v3768_v19 = vmul.f32 %v6555_v13, %v3713_v45  ;;  %v6575_v52 = vld [vmem:[#allocation2 + $0x98] sm:$0xff] }
 0x182   :  { %v986_v61 = vmul.f32 %v6293_v5, %v6462_v21  ;;  %v6563_v50 = vmul.f32 %v6560_v28, %v3966_v14  ;;  %v765_v60 = vadd.f32 %v733_v39, %v512_v7  ;;  %v1239_v15 = vmul.f32 %v6297_v38, %v6471_v12  ;;  %v6582_v7 = vld [vmem:[#allocation2 + $0xb8] sm:$0xff] }
 0x183   :  { %v2282_v30 = vadd.f32 %v2250_v23, %v2029_v2  ;;  %v3799_v33 = vadd.f32 %v3767_v34, %v3546_v51  ;;  %v1492_v24 = vmul.f32 %v6305_v20, %v6476_v22  ;;  %v1745_v44 = vmul.f32 %v6309_v46, %v6489_v17  ;;  %v6572_v23 = vld [vmem:[#allocation2 + $0x88] sm:$0xff]  ;;  %7965 = vst [vmem:[#allocation62_spill] sm:$0xff] %v6582_v7  ;;  %v7966_v51 = vld [vmem:[#allocation27_spill] sm:$0xff] }
 0x184   :  { %v1998_v16 = vmul.f32 %v6313_v55, %v1942_v3  ;;  %v1018_v54 = vadd.f32 %v986_v61, %v765_v60  ;;  %v2251_v63 = vmul.f32 %v6572_v23, %v2195_v18  ;;  %v2504_v2 = vmul.f32 %v6575_v52, %v2448_v49  ;;  %v6579_v34 = vld [vmem:[#allocation2 + $0xa8] sm:$0xff]  ;;  %v7968_v61 = vld [vmem:[#allocation24_spill] sm:$0xff] }
 0x185   :  { %v2535_v21 = vadd.f32 %v2503_v41, %v2282_v30  ;;  %v4052_v12 = vadd.f32 %v6502_v40, %v3799_v33  ;;  %v2757_v22 = vmul.f32 %v6579_v34, %v2701_v37  ;;  %v6585_v17 = vmul.f32 %v6582_v7, %v2954_v43  ;;  %v6587_v3 = vld [vmem:[#allocation2 + $0xc8] sm:$0xff]  ;;  %v6598_v37 = vld [vmem:[#allocation2 + $0xd8] sm:$0xff] }
 0x186   :  { %v6590_v41 = vmul.f32 %v6587_v3, %v3207_v58  ;;  %v1271_v39 = vadd.f32 %v1239_v15, %v1018_v54  ;;  %v107_v49 = vcombine.high %v7966_v51, %v7966_v51  ;;  %v7967_v40 = vld [vmem:[#allocation14_spill] sm:$0xff]  ;;  %7970 = vst [vmem:[#allocation23_spill] sm:$0xff] %v6598_v37  ;;  %v6601_v43 = vmul.f32 %v6598_v37, %v3460_v4  ;;  %v7971_v58 = vld [vmem:[#allocation28_spill] sm:$0xff]  ;;  %v7976_v37 = vld [vmem:[#allocation39_spill] sm:$0xff] }
 0x187   :  { %v2788_v18 = vadd.f32 %v2756_v26, %v2535_v21  ;;  %v6596_v30 = vrot.slane %v7968_v61, %v7967_v40  ;;  %4084 = vst [vmem:[#allocation7 + $0xa8] sm:$0xff] %v4052_v12  ;;  %v6604_v60 = vmul.f32 %v6495_v47, %v3713_v45  ;;  %v6608_v26 = vrot.slane %v7971_v58, %v7967_v40  ;;  %v7973_v15 = vld [vmem:[#allocation32_spill] sm:$0xff]  ;;  %v7987_v61 = vld [vmem:[#allocation82_spill] sm:$0xff] }
 0x188   :  { %v6612_v33 = vrot.slane %v7973_v15, %v7967_v40  ;;  %v1524_v54 = vadd.f32 %v1492_v24, %v1271_v39  ;;  %v6615_v12 = vrot.slane %v107_v49, %v7967_v40  ;;  %v6621_v51 = vld [vmem:[#allocation2 + $0xf8] sm:$0xff]  ;;  %v7978_v24 = vld [vmem:[#allocation43_spill] sm:$0xff] }
 0x189   :  { %7969 = vst [vmem:[#allocation13_spill] sm:$0xff] %v6596_v30  ;;  %7972 = vst [vmem:[#allocation34_spill] sm:$0xff] %v6608_v26  ;;  %v3041_v21 = vadd.f32 %v3009_v32, %v2788_v18  ;;  %v6619_v4 = vrot.slane %v6596_v30, %v4325_v8  ;;  %v6624_v45 = vmul.f32 %v6621_v51, %v3966_v14  ;;  %v7985_v15 = vld [vmem:[#allocation71_spill] sm:$0xff]  ;;  %v7986_v58 = vld [vmem:[#allocation72_spill] sm:$0xff] }
 0x18a   :  { %7974 = vst [vmem:[#allocation40_spill] sm:$0xff] %v6612_v33  ;;  %7975 = vst [vmem:[#allocation44_spill] sm:$0xff] %v6621_v51  ;;  %v6628_v47 = vrot.slane %v6608_v26, %v4325_v8  ;;  %v6632_v32 = vrot.slane %v7976_v37, %v7967_v40  ;;  %v6636_v18 = vrot.slane %v7978_v24, %v7967_v40 }
 0x18b   :  { %v3294_v39 = vadd.f32 %v3262_v31, %v3041_v21  ;;  %v1777_v49 = vadd.f32 %v1745_v44, %v1524_v54  ;;  %v6640_v30 = vrot.slane %v6615_v12, %v7967_v40  ;;  %v6644_v14 = vrot.slane %v6612_v33, %v4325_v8  ;;  %v7981_v33 = vld [vmem:[#allocation51_spill] sm:$0xff] }
 0x18c   :  { %7977 = vst [vmem:[#allocation48_spill] sm:$0xff] %v6632_v32  ;;  %7979 = vst [vmem:[#allocation50_spill] sm:$0xff] %v6636_v18  ;;  %v481_v26 = vmul.f32 %v7947_v62, %v6619_v4  ;;  %v734_v51 = vmul.f32 %v7948_v59, %v6628_v47  ;;  %v6652_v24 = vrot.slane %v6632_v32, %v4325_v8  ;;  %v7983_v62 = vld [vmem:[#allocation84_spill] sm:$0xff] }
 0x18d   :  { %7980 = vst [vmem:[#allocation70_spill] sm:$0xff] %v6640_v30  ;;  %v6656_v31 = vrot.slane %v6636_v18, %v4325_v8  ;;  %v3547_v44 = vadd.f32 %v3515_v0, %v3294_v39  ;;  %v2030_v21 = vadd.f32 %v1998_v16, %v1777_v49  ;;  %v207_v54 = vrot.slane %v6640_v30, %v4325_v8 }
 0x18e   :  { %v6662_v37 = vrot.slane %v7981_v33, %v7967_v40  ;;  %v6666_v59 = vrot.slane %v7983_v62, %v7967_v40  ;;  %v2099_v32 = vcombine.high %v7985_v15, %v7985_v15  ;;  %v2352_v18 = vcombine.high %v7986_v58, %v7986_v58 }
 0x18f   :  { %v2605_v0 = vcombine.high %v7987_v61, %v7987_v61  ;;  %v3800_v16 = vadd.f32 %v3768_v19, %v3547_v44  ;;  %v2283_v39 = vadd.f32 %v2251_v63, %v2030_v21  ;;  %v260_v49 = vmul.f32 %v7946_v27, %v207_v54 }
 0x190   :  { %7982 = vst [vmem:[#allocation55_spill] sm:$0xff] %v6662_v37  ;;  %7984 = vst [vmem:[#allocation59_spill] sm:$0xff] %v6666_v59  ;;  %v6677_v30 = vrot.slane %v6662_v37, %v4325_v8  ;;  %v987_v62 = vmul.f32 %v7949_v56, %v6644_v14  ;;  %v1240_v15 = vmul.f32 %v7950_v11, %v6652_v24 }
 0x191   :  { %v1493_v58 = vmul.f32 %v6376_v36, %v6656_v31  ;;  %v6686_v33 = vrot.slane %v2099_v32, %v7967_v40  ;;  %v4053_v19 = vadd.f32 %v6563_v50, %v3800_v16  ;;  %v2536_v63 = vadd.f32 %v2504_v2, %v2283_v39  ;;  %v7991_v39 = vld [vmem:[#allocation93_spill] sm:$0xff] }
 0x192   :  { %v513_v61 = vadd.f32 %v481_v26, %v260_v49  ;;  %v1946_v44 = vrot.slane %v6666_v59, %v4325_v8  ;;  %v1746_v21 = vmul.f32 %v6507_v10, %v6677_v30  ;;  %v6698_v11 = vrot.slane %v2352_v18, %v7967_v40  ;;  %v7990_v26 = vld [vmem:[#allocation92_spill] sm:$0xff] }
 0x193   :  { %v6695_v37 = vrot.slane %v6686_v33, %v7967_v40  ;;  %v6701_v32 = vrot.slane %v2605_v0, %v7967_v40  ;;  %4085 = vst [vmem:[#allocation7 + $0xb0] sm:$0xff] %v4053_v19  ;;  %v2789_v50 = vadd.f32 %v2757_v22, %v2536_v63  ;;  %v2858_v16 = vcombine.high %v7990_v26, %v7990_v26  ;;  %v7994_v0 = vld [vmem:[#allocation76_spill] sm:$0xff] }
 0x194   :  { %v766_v2 = vadd.f32 %v734_v51, %v513_v61  ;;  %v3111_v49 = vcombine.high %v7991_v39, %v7991_v39  ;;  %v6711_v10 = vrot.slane %v6698_v11, %v7967_v40  ;;  %v3364_v22 = vcombine.high %v7994_v0, %v7994_v0 }
 0x195   :  { %7988 = vst [vmem:[#allocation60_spill] sm:$0xff] %v6695_v37  ;;  %7989 = vst [vmem:[#allocation64_spill] sm:$0xff] %v6701_v32  ;;  %v2199_v59 = vrot.slane %v6695_v37, %v4325_v8  ;;  %v6715_v18 = vrot.slane %v6701_v32, %v7967_v40  ;;  %v3042_v51 = vadd.f32 %v6585_v17, %v2789_v50 }
 0x196   :  { %7992 = vst [vmem:[#allocation65_spill] sm:$0xff] %v6711_v10  ;;  %v1019_v19 = vadd.f32 %v987_v62, %v766_v2  ;;  %v1999_v63 = vmul.f32 %v6512_v25, %v1946_v44  ;;  %v6722_v61 = vrot.slane %v2858_v16, %v7967_v40  ;;  %v2452_v39 = vrot.slane %v6711_v10, %v4325_v8  ;;  %v7998_v16 = vld [vmem:[#allocation57_spill] sm:$0xff]  ;;  %v7999_v10 = vld [vmem:[#allocation35_spill] sm:$0xff] }
 0x197   :  { %7993 = vst [vmem:[#allocation69_spill] sm:$0xff] %v6715_v18  ;;  %v2252_v26 = vmul.f32 %v6408_v48, %v2199_v59  ;;  %v2705_v37 = vrot.slane %v6715_v18, %v4325_v8  ;;  %v6730_v32 = vrot.slane %v3111_v49, %v7967_v40  ;;  %v3295_v0 = vadd.f32 %v6590_v41, %v3042_v51 }
 0x198   :  { %v1272_v17 = vadd.f32 %v1240_v15, %v1019_v19  ;;  %v6735_v62 = vrot.slane %v6722_v61, %v7967_v40  ;;  %v6738_v50 = vrot.slane %v3364_v22, %v7967_v40  ;;  %v3617_v18 = vcombine.high %v7998_v16, %v7998_v16 }
 0x199   :  { %7995 = vst [vmem:[#allocation78_spill] sm:$0xff] %v6730_v32  ;;  %v6742_v2 = vrot.slane %v6730_v32, %v7967_v40  ;;  %v3870_v49 = vcombine.high %v7999_v10, %v7999_v10  ;;  %v261_v41 = vmul.f32 %v6527_v1, %v207_v54  ;;  %v3548_v15 = vadd.f32 %v6601_v43, %v3295_v0 }
 0x19a   :  { %7996 = vst [vmem:[#allocation77_spill] sm:$0xff] %v6735_v62  ;;  %v1525_v51 = vadd.f32 %v1493_v58, %v1272_v17  ;;  %v2958_v19 = vrot.slane %v6735_v62, %v4325_v8  ;;  %v6754_v22 = vrot.slane %v6738_v50, %v7967_v40  ;;  %v6759_v16 = vrot.slane %v3617_v18, %v7967_v40 }
 0x19b   :  { %7997 = vst [vmem:[#allocation20_spill] sm:$0xff] %v6742_v2  ;;  %v3211_v32 = vrot.slane %v6742_v2, %v4325_v8  ;;  %v6762_v10 = vrot.slane %v3870_v49, %v7967_v40  ;;  %v482_v43 = vmul.f32 %v6271_v57, %v6619_v4  ;;  %v3801_v54 = vadd.f32 %v6604_v60, %v3548_v15 }
 0x19c   :  { %8000 = vst [vmem:[#allocation26_spill] sm:$0xff] %v6754_v22  ;;  %v1778_v58 = vadd.f32 %v1746_v21, %v1525_v51  ;;  %v2505_v0 = vmul.f32 %v6411_v53, %v2452_v39  ;;  %v6770_v17 = vrot.slane %v6754_v22, %v4325_v8  ;;  %v2758_v2 = vmul.f32 %v6540_v6, %v2705_v37 }
 0x19d   :  { %v6775_v18 = vrot.slane %v6759_v16, %v7967_v40  ;;  %v6779_v49 = vrot.slane %v6762_v10, %v7967_v40  ;;  %v514_v4 = vadd.f32 %v482_v43, %v261_v41  ;;  %v4054_v60 = vadd.f32 %v6624_v45, %v3801_v54 }
 0x19e   :  { %v2031_v21 = vadd.f32 %v1999_v63, %v1778_v58  ;;  %v735_v15 = vmul.f32 %v6286_v9, %v6628_v47  ;;  %v988_v51 = vmul.f32 %v6293_v5, %v6644_v14  ;;  %v3011_v22 = vmul.f32 %v6543_v35, %v2958_v19 }
 0x19f   :  { %8001 = vst [vmem:[#allocation30_spill] sm:$0xff] %v6775_v18  ;;  %8002 = vst [vmem:[#allocation37_spill] sm:$0xff] %v6779_v49  ;;  %v3264_v62 = vmul.f32 %v6546_v29, %v3211_v32  ;;  %v6790_v57 = vrot.slane %v6775_v18, %v4325_v8  ;;  %v6794_v41 = vrot.slane %v6779_v49, %v4325_v8 }
 0x1a0   :  { %4086 = vst [vmem:[#allocation7 + $0xb8] sm:$0xff] %v4054_v60  ;;  %v2284_v45 = vadd.f32 %v2252_v26, %v2031_v21  ;;  %v3517_v47 = vmul.f32 %v6552_v42, %v6770_v17  ;;  %v767_v63 = vadd.f32 %v735_v15, %v514_v4  ;;  %v1241_v14 = vmul.f32 %v6297_v38, %v6652_v24 }
 0x1a1   :  { %v3770_v43 = vmul.f32 %v6555_v13, %v6790_v57  ;;  %v1494_v54 = vmul.f32 %v6305_v20, %v6656_v31  ;;  %v1747_v58 = vmul.f32 %v6309_v46, %v6677_v30  ;;  %v2000_v49 = vmul.f32 %v6313_v55, %v1946_v44 }
 0x1a2   :  { %v2537_v60 = vadd.f32 %v2505_v0, %v2284_v45  ;;  %v4023_v26 = vmul.f32 %v6560_v28, %v6794_v41  ;;  %v1020_v21 = vadd.f32 %v988_v51, %v767_v63  ;;  %v2253_v4 = vmul.f32 %v6572_v23, %v2199_v59  ;;  %v8003_v0 = vld [vmem:[#allocation24_spill] sm:$0xff] }
 0x1a3   :  { %v2506_v24 = vmul.f32 %v6575_v52, %v2452_v39  ;;  %v2759_v15 = vmul.f32 %v6579_v34, %v2705_v37  ;;  %v3012_v18 = vmul.f32 %v6582_v7, %v2958_v19  ;;  %v6814_v31 = vmul.f32 %v6587_v3, %v3211_v32  ;;  %v8004_v51 = vld [vmem:[#allocation28_spill] sm:$0xff]  ;;  %v8006_v37 = vld [vmem:[#allocation39_spill] sm:$0xff] }
 0x1a4   :  { %v2790_v13 = vadd.f32 %v2758_v2, %v2537_v60  ;;  %v1273_v30 = vadd.f32 %v1241_v14, %v1020_v21  ;;  %v123_v44 = vcombine.high %v6615_v12, %v6615_v12  ;;  %v344_v45 = vcombine.high %v8003_v0, %v8003_v0  ;;  %v8005_v63 = vld [vmem:[#allocation32_spill] sm:$0xff]  ;;  %v8007_v7 = vld [vmem:[#allocation43_spill] sm:$0xff] }
 0x1a5   :  { %v597_v59 = vcombine.high %v8004_v51, %v8004_v51  ;;  %v850_v39 = vcombine.high %v8005_v63, %v8005_v63  ;;  %v1103_v19 = vcombine.high %v8006_v37, %v8006_v37  ;;  %v1356_v32 = vcombine.high %v8007_v7, %v8007_v7  ;;  %v8014_v37 = vld [vmem:[#allocation80_spill] sm:$0xff] }
 0x1a6   :  { %v3043_v2 = vadd.f32 %v3011_v22, %v2790_v13  ;;  %v1526_v14 = vadd.f32 %v1494_v54, %v1273_v30  ;;  %v6829_v60 = vrot.slane %v123_v44, %v7967_v40  ;;  %v6832_v12 = vrot.slane %v344_v45, %v7967_v40 }
 0x1a7   :  { %v6835_v21 = vrot.slane %v597_v59, %v7967_v40  ;;  %v6838_v0 = vrot.slane %v850_v39, %v7967_v40  ;;  %v6841_v51 = vrot.slane %v1103_v19, %v7967_v40  ;;  %v6844_v63 = vrot.slane %v1356_v32, %v7967_v40  ;;  %v8015_v32 = vld [vmem:[#allocation81_spill] sm:$0xff] }
 0x1a8   :  { %8008 = vst [vmem:[#allocation38_spill] sm:$0xff] %v6829_v60  ;;  %8009 = vst [vmem:[#allocation45_spill] sm:$0xff] %v6832_v12  ;;  %v3296_v13 = vadd.f32 %v3264_v62, %v3043_v2  ;;  %v1779_v7 = vadd.f32 %v1747_v58, %v1526_v14  ;;  %v211_v22 = vrot.slane %v6829_v60, %v4325_v8 }
 0x1a9   :  { %8010 = vst [vmem:[#allocation17_spill] sm:$0xff] %v6835_v21  ;;  %8011 = vst [vmem:[#allocation25_spill] sm:$0xff] %v6838_v0  ;;  %v432_v54 = vrot.slane %v6832_v12, %v4325_v8  ;;  %v6852_v30 = vrot.slane %v6835_v21, %v4325_v8  ;;  %v6856_v44 = vrot.slane %v6838_v0, %v4325_v8  ;;  %v8016_v0 = vld [vmem:[#allocation66_spill] sm:$0xff] }
 0x1aa   :  { %8012 = vst [vmem:[#allocation96_spill] sm:$0xff] %v6841_v51  ;;  %8013 = vst [vmem:[#allocation19_spill] sm:$0xff] %v6844_v63  ;;  %v6860_v45 = vrot.slane %v6841_v51, %v4325_v8  ;;  %v6864_v62 = vrot.slane %v6844_v63, %v4325_v8  ;;  %v3549_v58 = vadd.f32 %v3517_v47, %v3296_v13  ;;  %v8018_v13 = vld [vmem:[#allocation84_spill] sm:$0xff] }
 0x1ab   :  { %v2032_v59 = vadd.f32 %v2000_v49, %v1779_v7  ;;  %v262_v39 = vmul.f32 %v7946_v27, %v211_v22  ;;  %v483_v19 = vmul.f32 %v8014_v37, %v432_v54  ;;  %v736_v2 = vmul.f32 %v8015_v32, %v6852_v30  ;;  %v8017_v49 = vld [vmem:[#allocation51_spill] sm:$0xff]  ;;  %v8019_v32 = vld [vmem:[#allocation64_spill] sm:$0xff] }
 0x1ac   :  { %v989_v14 = vmul.f32 %v7949_v56, %v6856_v44  ;;  %v1242_v51 = vmul.f32 %v8016_v0, %v6860_v45  ;;  %v1495_v21 = vmul.f32 %v6376_v36, %v6864_v62  ;;  %v3802_v63 = vadd.f32 %v3770_v43, %v3549_v58 }
 0x1ad   :  { %v2285_v12 = vadd.f32 %v2253_v4, %v2032_v59  ;;  %v515_v47 = vadd.f32 %v483_v19, %v262_v39  ;;  %v1609_v27 = vcombine.high %v8017_v49, %v8017_v49  ;;  %v1862_v7 = vcombine.high %v8018_v13, %v8018_v13  ;;  %v8026_v13 = vld [vmem:[#allocation44_spill] sm:$0xff] }
 0x1ae   :  { %v2115_v37 = vcombine.high %v6686_v33, %v6686_v33  ;;  %v2368_v56 = vcombine.high %v6698_v11, %v6698_v11  ;;  %v2621_v0 = vcombine.high %v8019_v32, %v8019_v32  ;;  %v4055_v60 = vadd.f32 %v4023_v26, %v3802_v63  ;;  %v8023_v63 = vld [vmem:[#allocation23_spill] sm:$0xff] }
 0x1af   :  { %v2538_v36 = vadd.f32 %v2506_v24, %v2285_v12  ;;  %v768_v43 = vadd.f32 %v736_v2, %v515_v47  ;;  %v6887_v4 = vrot.slane %v1609_v27, %v7967_v40  ;;  %v6890_v58 = vrot.slane %v1862_v7, %v7967_v40 }
 0x1b0   :  { %v6893_v59 = vrot.slane %v2115_v37, %v7967_v40  ;;  %v6896_v33 = vrot.slane %v2368_v56, %v7967_v40  ;;  %v6899_v11 = vrot.slane %v2621_v0, %v7967_v40  ;;  %4087 = vst [vmem:[#allocation7 + $0xc0] sm:$0xff] %v4055_v60  ;;  %v2874_v12 = vcombine.high %v6722_v61, %v6722_v61  ;;  %v8028_v0 = vld [vmem:[#allocation78_spill] sm:$0xff] }
 0x1b1   :  { %v2791_v39 = vadd.f32 %v2759_v15, %v2538_v36  ;;  %v1021_v26 = vadd.f32 %v989_v14, %v768_v43  ;;  %v1697_v24 = vrot.slane %v6887_v4, %v4325_v8  ;;  %v3518_v19 = vmul.f32 %v8023_v63, %v6770_v17  ;;  %v8024_v14 = vld [vmem:[#allocation74_spill] sm:$0xff]  ;;  %v8025_v17 = vld [vmem:[#allocation99_spill] sm:$0xff] }
 0x1b2   :  { %8020 = vst [vmem:[#allocation94_spill] sm:$0xff] %v6893_v59  ;;  %8021 = vst [vmem:[#allocation46_spill] sm:$0xff] %v6896_v33  ;;  %v1950_v2 = vrot.slane %v6890_v58, %v4325_v8  ;;  %v6911_v47 = vrot.slane %v6893_v59, %v4325_v8  ;;  %v6915_v36 = vrot.slane %v6896_v33, %v4325_v8 }
 0x1b3   :  { %8022 = vst [vmem:[#allocation67_spill] sm:$0xff] %v6899_v11  ;;  %v3044_v15 = vadd.f32 %v3012_v18, %v2791_v39  ;;  %v1274_v60 = vadd.f32 %v1242_v51, %v1021_v26  ;;  %v1748_v49 = vmul.f32 %v8024_v14, %v1697_v24  ;;  %v6920_v61 = vrot.slane %v6899_v11, %v4325_v8 }
 0x1b4   :  { %v3771_v27 = vmul.f32 %v8025_v17, %v6790_v57  ;;  %v4024_v7 = vmul.f32 %v8026_v13, %v6794_v41  ;;  %v2001_v37 = vmul.f32 %v6512_v25, %v1950_v2  ;;  %v6928_v56 = vrot.slane %v2874_v12, %v7967_v40 }
 0x1b5   :  { %v3297_v18 = vadd.f32 %v6814_v31, %v3044_v15  ;;  %v1527_v51 = vadd.f32 %v1495_v21, %v1274_v60  ;;  %v2254_v32 = vmul.f32 %v6408_v48, %v6911_v47  ;;  %v3127_v43 = vcombine.high %v8028_v0, %v8028_v0 }
 0x1b6   :  { %8027 = vst [vmem:[#allocation31_spill] sm:$0xff] %v6928_v56  ;;  %v3380_v57 = vcombine.high %v6738_v50, %v6738_v50  ;;  %v3633_v41 = vcombine.high %v6759_v16, %v6759_v16  ;;  %v3886_v39 = vcombine.high %v6762_v10, %v6762_v10  ;;  %v263_v26 = vmul.f32 %v6527_v1, %v211_v22  ;;  %v8031_v10 = vld [vmem:[#allocation97_spill] sm:$0xff] }
 0x1b7   :  { %v3550_v12 = vadd.f32 %v3518_v19, %v3297_v18  ;;  %v1780_v31 = vadd.f32 %v1748_v49, %v1527_v51  ;;  %v2507_v21 = vmul.f32 %v6411_v53, %v6915_v36  ;;  %v2760_v15 = vmul.f32 %v6540_v6, %v6920_v61 }
 0x1b8   :  { %v6948_v60 = vrot.slane %v6928_v56, %v4325_v8  ;;  %v6951_v50 = vrot.slane %v3127_v43, %v7967_v40  ;;  %v6954_v16 = vrot.slane %v3380_v57, %v7967_v40  ;;  %v484_v22 = vmul.f32 %v8031_v10, %v432_v54 }
 0x1b9   :  { %v3803_v19 = vadd.f32 %v3771_v27, %v3550_v12  ;;  %v2033_v49 = vadd.f32 %v2001_v37, %v1780_v31  ;;  %v6958_v18 = vrot.slane %v3633_v41, %v7967_v40  ;;  %v737_v51 = vmul.f32 %v6286_v9, %v6852_v30 }
 0x1ba   :  { %8029 = vst [vmem:[#allocation36_spill] sm:$0xff] %v6951_v50  ;;  %8030 = vst [vmem:[#allocation42_spill] sm:$0xff] %v6954_v16  ;;  %v6964_v0 = vrot.slane %v6951_v50, %v4325_v8  ;;  %v6968_v43 = vrot.slane %v6954_v16, %v4325_v8  ;;  %v6971_v57 = vrot.slane %v3886_v39, %v7967_v40  ;;  %v8039_v50 = vld [vmem:[#allocation48_spill] sm:$0xff] }
 0x1bb   :  { %8032 = vst [vmem:[#allocation52_spill] sm:$0xff] %v6958_v18  ;;  %v516_v54 = vadd.f32 %v484_v22, %v263_v26  ;;  %v4056_v27 = vadd.f32 %v4024_v7, %v3803_v19  ;;  %v2286_v37 = vadd.f32 %v2254_v32, %v2033_v49  ;;  %v6975_v41 = vrot.slane %v6958_v18, %v4325_v8  ;;  %v8034_v19 = vld [vmem:[#allocation100_spill] sm:$0xff] }
 0x1bc   :  { %8033 = vst [vmem:[#allocation56_spill] sm:$0xff] %v6971_v57  ;;  %v990_v30 = vmul.f32 %v6293_v5, %v6856_v44  ;;  %v6981_v12 = vrot.slane %v6971_v57, %v4325_v8  ;;  %v3013_v40 = vmul.f32 %v6543_v35, %v6948_v60  ;;  %v1243_v7 = vmul.f32 %v6297_v38, %v6860_v45  ;;  %v8038_v57 = vld [vmem:[#allocation40_spill] sm:$0xff] }
 0x1bd   :  { %v769_v31 = vadd.f32 %v737_v51, %v516_v54  ;;  %4088 = vst [vmem:[#allocation7 + $0xc8] sm:$0xff] %v4056_v27  ;;  %v2539_v16 = vadd.f32 %v2507_v21, %v2286_v37  ;;  %v1496_v39 = vmul.f32 %v6305_v20, %v6864_v62  ;;  %v3266_v44 = vmul.f32 %v6546_v29, %v6964_v0  ;;  %v8035_v20 = vld [vmem:[#allocation70_spill] sm:$0xff] }
 0x1be   :  { %v3519_v22 = vmul.f32 %v6552_v42, %v6968_v43  ;;  %v3772_v21 = vmul.f32 %v8034_v19, %v6975_v41  ;;  %v4025_v49 = vmul.f32 %v6560_v28, %v6981_v12  ;;  %v1749_v45 = vmul.f32 %v6309_v46, %v1697_v24  ;;  %v8037_v37 = vld [vmem:[#allocation34_spill] sm:$0xff]  ;;  %v7048_v28 = vld [vmem:[#allocation2 + $0x40] sm:$0xff] }
 0x1bf   :  { %v1022_v32 = vadd.f32 %v990_v30, %v769_v31  ;;  %v2792_v26 = vadd.f32 %v2760_v15, %v2539_v16  ;;  %v2002_v54 = vmul.f32 %v6313_v55, %v1950_v2  ;;  %v153_v62 = vcombine.high %v8035_v20, %v8035_v20  ;;  %v8036_v15 = vld [vmem:[#allocation13_spill] sm:$0xff]  ;;  %v8040_v46 = vld [vmem:[#allocation50_spill] sm:$0xff] }
 0x1c0   :  { %v374_v16 = vcombine.high %v8036_v15, %v8036_v15  ;;  %v627_v30 = vcombine.high %v8037_v37, %v8037_v37  ;;  %v880_v18 = vcombine.high %v8038_v57, %v8038_v57  ;;  %v1386_v55 = vcombine.high %v8040_v46, %v8040_v46  ;;  %v7022_v20 = vld [vmem:[#allocation2] sm:$0xff] }
 0x1c1   :  { %v1275_v51 = vadd.f32 %v1243_v7, %v1022_v32  ;;  %v3045_v27 = vadd.f32 %v3013_v40, %v2792_v26  ;;  %v1133_v7 = vcombine.high %v8039_v50, %v8039_v50  ;;  %v215_v2 = vrot.slane %v153_v62, %v4325_v8  ;;  %v7028_v15 = vld [vmem:[#allocation2 + $0x20] sm:$0xff] }
 0x1c2   :  { %v436_v40 = vrot.slane %v374_v16, %v4325_v8  ;;  %v689_v32 = vrot.slane %v627_v30, %v4325_v8  ;;  %v7033_v16 = vld [vmem:[#allocation2 + $0x30] sm:$0xff]  ;;  %v7038_v37 = vrot.slane %v1386_v55, %v4325_v8 }
 0x1c3   :  { %v1528_v31 = vadd.f32 %v1496_v39, %v1275_v51  ;;  %v3298_v24 = vadd.f32 %v3266_v44, %v3045_v27  ;;  %v2255_v39 = vmul.f32 %v6572_v23, %v6911_v47  ;;  %v7017_v51 = vrot.slane %v880_v18, %v4325_v8  ;;  %v7025_v27 = vld [vmem:[#allocation2 + $0x10] sm:$0xff] }
 0x1c4   :  { %v7020_v57 = vrot.slane %v1133_v7, %v4325_v8  ;;  %v264_v44 = vmul.f32 %v7022_v20, %v215_v2  ;;  %v485_v62 = vmul.f32 %v7025_v27, %v436_v40  ;;  %v2508_v18 = vmul.f32 %v6575_v52, %v6915_v36  ;;  %v8041_v7 = vld [vmem:[#allocation55_spill] sm:$0xff] }
 0x1c5   :  { %v1781_v26 = vadd.f32 %v1749_v45, %v1528_v31  ;;  %v3551_v50 = vadd.f32 %v3519_v22, %v3298_v24  ;;  %v738_v45 = vmul.f32 %v7028_v15, %v689_v32  ;;  %v991_v22 = vmul.f32 %v7033_v16, %v7017_v51  ;;  %v8042_v24 = vld [vmem:[#allocation59_spill] sm:$0xff] }
 0x1c6   :  { %v517_v31 = vadd.f32 %v485_v62, %v264_v44  ;;  %v1639_v46 = vcombine.high %v8041_v7, %v8041_v7  ;;  %v1892_v56 = vcombine.high %v8042_v24, %v8042_v24  ;;  %v2761_v36 = vmul.f32 %v6579_v34, %v6920_v61  ;;  %v8044_v44 = vld [vmem:[#allocation62_spill] sm:$0xff]  ;;  %v8045_v61 = vld [vmem:[#allocation65_spill] sm:$0xff] }
 0x1c7   :  { %v2034_v47 = vadd.f32 %v2002_v54, %v1781_v26  ;;  %v3804_v30 = vadd.f32 %v3772_v21, %v3551_v50  ;;  %v8043_v26 = vld [vmem:[#allocation60_spill] sm:$0xff]  ;;  %v1244_v21 = vmul.f32 %v7048_v28, %v7020_v57  ;;  %v3014_v62 = vmul.f32 %v8044_v44, %v6948_v60  ;;  %v8047_v7 = vld [vmem:[#allocation69_spill] sm:$0xff] }
 0x1c8   :  { %v2145_v11 = vcombine.high %v8043_v26, %v8043_v26  ;;  %v770_v59 = vadd.f32 %v738_v45, %v517_v31  ;;  %v1701_v55 = vrot.slane %v1639_v46, %v4325_v8  ;;  %v8046_v45 = vld [vmem:[#allocation98_spill] sm:$0xff]  ;;  %v1954_v31 = vrot.slane %v1892_v56, %v4325_v8  ;;  %v8049_v56 = vld [vmem:[#allocation20_spill] sm:$0xff] }
 0x1c9   :  { %v2287_v54 = vadd.f32 %v2255_v39, %v2034_v47  ;;  %v4057_v33 = vadd.f32 %v4025_v49, %v3804_v30  ;;  %v3267_v39 = vmul.f32 %v6587_v3, %v6964_v0  ;;  %v2398_v47 = vcombine.high %v8045_v61, %v8045_v61  ;;  %v8048_v0 = vld [vmem:[#allocation77_spill] sm:$0xff] }
 0x1ca   :  { %v1023_v49 = vadd.f32 %v991_v22, %v770_v59  ;;  %v1497_v30 = vmul.f32 %v8046_v45, %v7038_v37  ;;  %v2651_v46 = vcombine.high %v8047_v7, %v8047_v7  ;;  %v3520_v60 = vmul.f32 %v8023_v63, %v6968_v43  ;;  %v8050_v43 = vld [vmem:[#allocation26_spill] sm:$0xff] }
 0x1cb   :  { %v2540_v50 = vadd.f32 %v2508_v18, %v2287_v54  ;;  %4089 = vst [vmem:[#allocation7 + $0xd0] sm:$0xff] %v4057_v33  ;;  %v7067_v24 = vrot.slane %v2145_v11, %v4325_v8  ;;  %v2904_v54 = vcombine.high %v8048_v0, %v8048_v0  ;;  %v3773_v59 = vmul.f32 %v8025_v17, %v6975_v41 }
 0x1cc   :  { %v1276_v33 = vadd.f32 %v1244_v21, %v1023_v49  ;;  %v1750_v22 = vmul.f32 %v8024_v14, %v1701_v55  ;;  %v3157_v26 = vcombine.high %v8049_v56, %v8049_v56  ;;  %v3410_v11 = vcombine.high %v8050_v43, %v8050_v43  ;;  %v8051_v21 = vld [vmem:[#allocation30_spill] sm:$0xff] }
 0x1cd   :  { %v2793_v18 = vadd.f32 %v2761_v36, %v2540_v50  ;;  %v7077_v36 = vrot.slane %v2398_v47, %v4325_v8  ;;  %v265_v50 = vmul.f32 %v6527_v1, %v215_v2  ;;  %v2003_v0 = vmul.f32 %v6512_v25, %v1954_v31 }
 0x1ce   :  { %v1529_v7 = vadd.f32 %v1497_v30, %v1276_v33  ;;  %v7084_v41 = vrot.slane %v2651_v46, %v4325_v8  ;;  %v3663_v49 = vcombine.high %v8051_v21, %v8051_v21  ;;  %v7091_v47 = vrot.slane %v2904_v54, %v4325_v8  ;;  %v8052_v30 = vld [vmem:[#allocation37_spill] sm:$0xff] }
 0x1cf   :  { %v3046_v61 = vadd.f32 %v3014_v62, %v2793_v18  ;;  %v2256_v62 = vmul.f32 %v6408_v48, %v7067_v24  ;;  %v486_v18 = vmul.f32 %v8031_v10, %v436_v40  ;;  %v7095_v2 = vrot.slane %v3157_v26, %v4325_v8 }
 0x1d0   :  { %v1782_v56 = vadd.f32 %v1750_v22, %v1529_v7  ;;  %v3916_v46 = vcombine.high %v8052_v30, %v8052_v30  ;;  %v739_v33 = vmul.f32 %v6286_v9, %v689_v32  ;;  %v2509_v10 = vmul.f32 %v6411_v53, %v7077_v36 }
 0x1d1   :  { %v3299_v17 = vadd.f32 %v3267_v39, %v3046_v61  ;;  %v4026_v39 = vmul.f32 %v8026_v13, %v6981_v12  ;;  %v7103_v61 = vrot.slane %v3410_v11, %v4325_v8  ;;  %v518_v54 = vadd.f32 %v486_v18, %v265_v50  ;;  %v7134_v18 = vld [vmem:[#allocation2 + $0x78] sm:$0xff] }
 0x1d2   :  { %v2035_v21 = vadd.f32 %v2003_v0, %v1782_v56  ;;  %v7108_v40 = vrot.slane %v3663_v49, %v4325_v8  ;;  %v992_v22 = vmul.f32 %v6293_v5, %v7017_v51  ;;  %v2762_v9 = vmul.f32 %v6540_v6, %v7084_v41  ;;  %v7131_v49 = vld [vmem:[#allocation2 + $0x68] sm:$0xff] }
 0x1d3   :  { %v3552_v43 = vadd.f32 %v3520_v60, %v3299_v17  ;;  %v771_v17 = vadd.f32 %v739_v33, %v518_v54  ;;  %v1245_v12 = vmul.f32 %v6297_v38, %v7020_v57  ;;  %v3015_v60 = vmul.f32 %v6543_v35, %v7091_v47 }
 0x1d4   :  { %v2288_v32 = vadd.f32 %v2256_v62, %v2035_v21  ;;  %v3268_v11 = vmul.f32 %v6546_v29, %v7095_v2  ;;  %v7121_v50 = vrot.slane %v3916_v46, %v4325_v8  ;;  %v3521_v5 = vmul.f32 %v6552_v42, %v7103_v61  ;;  %v8053_v46 = vld [vmem:[#allocation38_spill] sm:$0xff] }
 0x1d5   :  { %v3805_v26 = vadd.f32 %v3773_v59, %v3552_v43  ;;  %v1024_v51 = vadd.f32 %v992_v22, %v771_v17  ;;  %v7125_v59 = vld [vmem:[#allocation2 + $0x58] sm:$0xff]  ;;  %v3774_v0 = vmul.f32 %v8034_v19, %v7108_v40  ;;  %v1751_v62 = vmul.f32 %v7131_v49, %v1701_v55  ;;  %v8054_v43 = vld [vmem:[#allocation45_spill] sm:$0xff]  ;;  %v8058_v17 = vld [vmem:[#allocation19_spill] sm:$0xff] }
 0x1d6   :  { %v1498_v38 = vmul.f32 %v7125_v59, %v7038_v37  ;;  %v2541_v57 = vadd.f32 %v2509_v10, %v2288_v32  ;;  %v2004_v56 = vmul.f32 %v7134_v18, %v1954_v31  ;;  %v155_v33 = vcombine.high %v8053_v46, %v8053_v46  ;;  %v8056_v10 = vld [vmem:[#allocation25_spill] sm:$0xff]  ;;  %v8057_v55 = vld [vmem:[#allocation96_spill] sm:$0xff] }
 0x1d7   :  { %v4058_v7 = vadd.f32 %v4026_v39, %v3805_v26  ;;  %v1277_v30 = vadd.f32 %v1245_v12, %v1024_v51  ;;  %v376_v37 = vcombine.high %v8054_v43, %v8054_v43  ;;  %v8055_v39 = vld [vmem:[#allocation17_spill] sm:$0xff]  ;;  %v882_v22 = vcombine.high %v8056_v10, %v8056_v10 }
 0x1d8   :  { %v629_v54 = vcombine.high %v8055_v39, %v8055_v39  ;;  %v2794_v21 = vadd.f32 %v2762_v9, %v2541_v57  ;;  %v1135_v26 = vcombine.high %v8057_v55, %v8057_v55  ;;  %v1388_v31 = vcombine.high %v8058_v17, %v8058_v17 }
 0x1d9   :  { %4090 = vst [vmem:[#allocation7 + $0xd8] sm:$0xff] %v4058_v7  ;;  %v1530_v12 = vadd.f32 %v1498_v38, %v1277_v30  ;;  %v219_v32 = vrot.slane %v155_v33, %v4325_v8  ;;  %v440_v7 = vrot.slane %v376_v37, %v4325_v8  ;;  %v2257_v9 = vmul.f32 %v6572_v23, %v7067_v24 }
 0x1da   :  { %v7152_v51 = vrot.slane %v629_v54, %v4325_v8  ;;  %v3047_v46 = vadd.f32 %v3015_v60, %v2794_v21  ;;  %v946_v57 = vrot.slane %v882_v22, %v4325_v8  ;;  %v7158_v43 = vrot.slane %v1135_v26, %v4325_v8  ;;  %v8060_v26 = vld [vmem:[#allocation94_spill] sm:$0xff] }
 0x1db   :  { %v1783_v39 = vadd.f32 %v1751_v62, %v1530_v12  ;;  %v266_v10 = vmul.f32 %v7022_v20, %v219_v32  ;;  %v487_v38 = vmul.f32 %v7025_v27, %v440_v7  ;;  %v2510_v60 = vmul.f32 %v6575_v52, %v7077_v36 }
 0x1dc   :  { %v740_v30 = vmul.f32 %v7028_v15, %v7152_v51  ;;  %v3300_v33 = vadd.f32 %v3268_v11, %v3047_v46  ;;  %v993_v37 = vmul.f32 %v7033_v16, %v946_v57  ;;  %v7168_v24 = vrot.slane %v1388_v31, %v4325_v8  ;;  %v8059_v15 = vld [vmem:[#allocation11_spill] sm:$0xff] }
 0x1dd   :  { %v2036_v54 = vadd.f32 %v2004_v56, %v1783_v39  ;;  %v519_v21 = vadd.f32 %v487_v38, %v266_v10  ;;  %v1641_v62 = vcombine.high %v6887_v4, %v6887_v4  ;;  %v1894_v20 = vcombine.high %v6890_v58, %v6890_v58  ;;  %v8062_v10 = vld [vmem:[#allocation67_spill] sm:$0xff] }
 0x1de   :  { %v3553_v27 = vadd.f32 %v3521_v5, %v3300_v33  ;;  %v4027_v11 = vmul.f32 %v8059_v15, %v7121_v50  ;;  %v2763_v36 = vmul.f32 %v6579_v34, %v7084_v41  ;;  %v1246_v16 = vmul.f32 %v7048_v28, %v7158_v43  ;;  %v8061_v5 = vld [vmem:[#allocation46_spill] sm:$0xff] }
 0x1df   :  { %v2289_v22 = vadd.f32 %v2257_v9, %v2036_v54  ;;  %v772_v55 = vadd.f32 %v740_v30, %v519_v21  ;;  %v7181_v56 = vrot.slane %v1641_v62, %v4325_v8  ;;  %v2147_v4 = vcombine.high %v8060_v26, %v8060_v26 }
 0x1e0   :  { %v3806_v17 = vadd.f32 %v3774_v0, %v3553_v27  ;;  %v3016_v58 = vmul.f32 %v8044_v44, %v7091_v47  ;;  %v2400_v31 = vcombine.high %v8061_v5, %v8061_v5  ;;  %v1499_v28 = vmul.f32 %v8046_v45, %v7168_v24  ;;  %v8063_v45 = vld [vmem:[#allocation31_spill] sm:$0xff] }
 0x1e1   :  { %v2542_v12 = vadd.f32 %v2510_v60, %v2289_v22  ;;  %v1025_v41 = vadd.f32 %v993_v37, %v772_v55  ;;  %v1958_v46 = vrot.slane %v1894_v20, %v4325_v8  ;;  %v3269_v39 = vmul.f32 %v6587_v3, %v7095_v2  ;;  %v8064_v27 = vld [vmem:[#allocation99_spill] sm:$0xff]  ;;  %v4195_v22 = vld [vmem:[#allocation2 + $0x18] sm:$0xff] }
 0x1e2   :  { %v4059_v9 = vadd.f32 %v4027_v11, %v3806_v17  ;;  %v2653_v0 = vcombine.high %v8062_v10, %v8062_v10  ;;  %v1752_v47 = vmul.f32 %v8024_v14, %v7181_v56  ;;  %v2211_v33 = vrot.slane %v2147_v4, %v4325_v8  ;;  %v8066_v17 = vld [vmem:[#allocation42_spill] sm:$0xff] }
 0x1e3   :  { %v2795_v38 = vadd.f32 %v2763_v36, %v2542_v12  ;;  %v1278_v30 = vadd.f32 %v1246_v16, %v1025_v41  ;;  %v2464_v60 = vrot.slane %v2400_v31, %v4325_v8  ;;  %v2906_v37 = vcombine.high %v8063_v45, %v8063_v45  ;;  %v8065_v36 = vld [vmem:[#allocation36_spill] sm:$0xff]  ;;  %v4196_v12 = vld [vmem:[#allocation2 + $0x28] sm:$0xff] }
 0x1e4   :  { %4091 = vst [vmem:[#allocation7 + $0xe0] sm:$0xff] %v4059_v9  ;;  %v267_v54 = vmul.f32 %v6527_v1, %v219_v32  ;;  %v3522_v2 = vmul.f32 %v8023_v63, %v7103_v61  ;;  %v2005_v20 = vmul.f32 %v6512_v25, %v1958_v46  ;;  %v3775_v14 = vmul.f32 %v8064_v27, %v7108_v40  ;;  %v4197_v41 = vld [vmem:[#allocation2 + $0x38] sm:$0xff] }
 0x1e5   :  { %v3048_v21 = vadd.f32 %v3016_v58, %v2795_v38  ;;  %v1531_v62 = vadd.f32 %v1499_v28, %v1278_v30  ;;  %v2717_v11 = vrot.slane %v2653_v0, %v4325_v8  ;;  %v3159_v16 = vcombine.high %v8065_v36, %v8065_v36  ;;  %v4198_v38 = vld [vmem:[#allocation2 + $0x48] sm:$0xff] }
 0x1e6   :  { %v488_v55 = vmul.f32 %v4195_v22, %v440_v7  ;;  %v4028_v1 = vmul.f32 %v8026_v13, %v7121_v50  ;;  %v2258_v61 = vmul.f32 %v6408_v48, %v2211_v33  ;;  %v2511_v4 = vmul.f32 %v6411_v53, %v2464_v60  ;;  %v8067_v48 = vld [vmem:[#allocation52_spill] sm:$0xff] }
 0x1e7   :  { %v3301_v26 = vadd.f32 %v3269_v39, %v3048_v21  ;;  %v1784_v32 = vadd.f32 %v1752_v47, %v1531_v62  ;;  %v2970_v25 = vrot.slane %v2906_v37, %v4325_v8  ;;  %v3412_v40 = vcombine.high %v8066_v17, %v8066_v17 }
 0x1e8   :  { %v520_v58 = vadd.f32 %v488_v55, %v267_v54  ;;  %v741_v7 = vmul.f32 %v4196_v12, %v7152_v51  ;;  %v994_v28 = vmul.f32 %v4197_v41, %v946_v57  ;;  %v2764_v50 = vmul.f32 %v6540_v6, %v2717_v11  ;;  %v8068_v51 = vld [vmem:[#allocation56_spill] sm:$0xff] }
 0x1e9   :  { %v3554_v5 = vadd.f32 %v3522_v2, %v3301_v26  ;;  %v2037_v31 = vadd.f32 %v2005_v20, %v1784_v32  ;;  %v3223_v9 = vrot.slane %v3159_v16, %v4325_v8  ;;  %v3665_v53 = vcombine.high %v8067_v48, %v8067_v48 }
 0x1ea   :  { %v773_v0 = vadd.f32 %v741_v7, %v520_v58  ;;  %v1247_v30 = vmul.f32 %v4198_v38, %v7158_v43  ;;  %v3017_v47 = vmul.f32 %v6543_v35, %v2970_v25  ;;  %v3476_v45 = vrot.slane %v3412_v40, %v4325_v8 }
 0x1eb   :  { %v3807_v39 = vadd.f32 %v3775_v14, %v3554_v5  ;;  %v2290_v10 = vadd.f32 %v2258_v61, %v2037_v31  ;;  %v3918_v57 = vcombine.high %v8068_v51, %v8068_v51  ;;  %v1500_v21 = vmul.f32 %v7125_v59, %v7168_v24 }
 0x1ec   :  { %v1026_v54 = vadd.f32 %v994_v28, %v773_v0  ;;  %v3729_v2 = vrot.slane %v3665_v53, %v4325_v8  ;;  %v3270_v20 = vmul.f32 %v6546_v29, %v3223_v9  ;;  %v1753_v35 = vmul.f32 %v7131_v49, %v7181_v56 }
 0x1ed   :  { %v4060_v37 = vadd.f32 %v4028_v1, %v3807_v39  ;;  %v2543_v6 = vadd.f32 %v2511_v4, %v2290_v10  ;;  %v3982_v14 = vrot.slane %v3918_v57, %v4325_v8  ;;  %v3523_v16 = vmul.f32 %v6552_v42, %v3476_v45 }
 0x1ee   :  { %v1279_v43 = vadd.f32 %v1247_v30, %v1026_v54  ;;  %v2006_v55 = vmul.f32 %v7134_v18, %v1958_v46  ;;  %v3776_v59 = vmul.f32 %v8034_v19, %v3729_v2  ;;  %v2259_v1 = vmul.f32 %v6572_v23, %v2211_v33 }
 0x1ef   :  { %4092 = vst [vmem:[#allocation7 + $0xe8] sm:$0xff] %v4060_v37  ;;  %v2796_v62 = vadd.f32 %v2764_v50, %v2543_v6  ;;  %v4029_v29 = vmul.f32 %v8059_v15, %v3982_v14  ;;  %v2512_v49 = vmul.f32 %v6575_v52, %v2464_v60  ;;  %v2765_v4 = vmul.f32 %v6579_v34, %v2717_v11 }
 0x1f0   :  { %v1532_v22 = vadd.f32 %v1500_v21, %v1279_v43  ;;  %v3018_v18 = vmul.f32 %v8044_v44, %v2970_v25  ;;  %v3271_v19 = vmul.f32 %v6587_v3, %v3223_v9  ;;  %v3524_v23 = vmul.f32 %v8023_v63, %v3476_v45 }
 0x1f1   :  { %v3049_v36 = vadd.f32 %v3017_v47, %v2796_v62  ;;  %v3777_v15 = vmul.f32 %v8064_v27, %v3729_v2  ;;  %v4030_v52 = vmul.f32 %v8026_v13, %v3982_v14 }
 0x1f2   :  { %v1785_v24 = vadd.f32 %v1753_v35, %v1532_v22 }
 0x1f3   :  { %v3302_v26 = vadd.f32 %v3270_v20, %v3049_v36 }
 0x1f4   :  { %v2038_v61 = vadd.f32 %v2006_v55, %v1785_v24 }
 0x1f5   :  { %v3555_v32 = vadd.f32 %v3523_v16, %v3302_v26 }
 0x1f6   :  { %v2291_v8 = vadd.f32 %v2259_v1, %v2038_v61 }
 0x1f7   :  { %v3808_v56 = vadd.f32 %v3776_v59, %v3555_v32 }
 0x1f8   :  { %v2544_v17 = vadd.f32 %v2512_v49, %v2291_v8 }
 0x1f9   :  { %v4061_v42 = vadd.f32 %v4029_v29, %v3808_v56 }
 0x1fa   :  { %v2797_v46 = vadd.f32 %v2765_v4, %v2544_v17 }
 0x1fb   :  { %4093 = vst [vmem:[#allocation7 + $0xf0] sm:$0xff] %v4061_v42 }
 0x1fc   :  { %v3050_v40 = vadd.f32 %v3018_v18, %v2797_v46 }
 0x1fe   :  { %v3303_v33 = vadd.f32 %v3271_v19, %v3050_v40 }
 0x200   :  { %v3556_v58 = vadd.f32 %v3524_v23, %v3303_v33 }
 0x202   :  { %v3809_v34 = vadd.f32 %v3777_v15, %v3556_v58 }
 0x204   :  { %v4062_v60 = vadd.f32 %v4030_v52, %v3809_v34 }
 0x206   :  { %4094 = vst [vmem:[#allocation7 + $0xf8] sm:$0xff] %v4062_v60 }
 0x207   :  { %4254 = shalt.err (!%p4251_p6)
}
 0x208   :  { %s4255_s10 = scalar_lea.hbm %s7264_s2, 4096 }
 0x209   :  { %p4256_p7 = scmp.ne.s32.totalorder %s7264_s2, %s4255_s10  ;;  %p4259_p8 = scmp.lt.u32.totalorder %s4255_s10, %s7264_s2 }
 0x20b   :  { %p4261_p9 = pnand %p4259_p8, %p4256_p7 }
 0x20d   :  { %4264 = shalt.err (!%p4261_p9)
}
 0x20e   :  { %4106 = dma.vmem_to_hbm [thread:$0]  %s4101_s6, 4096, %s7264_s2, [#allocation4], %s4272_s19, %s4272_s19, %s4273_s20  }
 0x20f   :  { %4269 = dma.done.wait [#allocation4], 4096  }
 0x210   :  { %4270 = vsyncadd [#allocation4], 4294963200 }
 0x211   :  { %4110 = vsyncpa [#allocation3], 1 }
 0x212   :  { %4111 = vsyncpa [#allocation6], 1 }
 0x213   :  { %4112 = vsyncpa [#allocation4], 1 }

</bundles_post_ra>
